<compile_context>
chip_gen: v7x
topology: tpu7x:2x2x1
jax: 0.10.0
libtpu: 0.0.40
codegen_flags: <defaults>
</compile_context>

<pallas_src>
import jax
import jax.numpy as jnp
from jax.experimental import pallas as pl
from jax.experimental.pallas import tpu as pltpu

_C = 64            # every conv layer in the module has 64 output channels
_TAPS = 9          # 3x3 kernel
_IMG = 2           # images lane-batched per grid step
_CL = _IMG * _C    # 128 lanes


# ----------------------------- static planning ------------------------------

def _out_sz(s):
    # Conv2d(k=3, s=2, p=1) output size.
    return (s + 2 - 3) // 2 + 1


def _round8(n):
    return -(-n // 8) * 8


def _conv_plan(input_h, input_w):
    """Per conv layer: (h_in, w_in, h_out, w_out, padded_output_rows)."""
    h, w = input_h, input_w
    plan = []
    for _ in range(4):
        ho, wo = _out_sz(h), _out_sz(w)
        plan.append((h, w, ho, wo, _round8(ho * wo)))
        h, w = ho, wo
    return plan


def _build_selection(h, w, rows_per_tap, n_cols):
    """0/1 matrix S of shape (9*rows_per_tap, n_cols).

    (S @ x)[t*rpt + o, :] == padded-input pixel read by tap t at output
    position o of a 3x3/stride-2/pad-1 conv (zero rows for padding taps and
    alignment-padding rows, zero cols for alignment-padding input rows).
    """
    ho, wo = _out_sz(h), _out_sz(w)
    kh, kw, oi, oj = jnp.meshgrid(jnp.arange(3), jnp.arange(3),
                                  jnp.arange(ho), jnp.arange(wo), indexing="ij")
    hi = 2 * oi + kh - 1
    wi = 2 * oj + kw - 1
    valid = (hi >= 0) & (hi < h) & (wi >= 0) & (wi < w)
    col = jnp.where(valid, hi * w + wi, 0)
    sel = jax.nn.one_hot(col, h * w, dtype=jnp.float32)
    sel = sel * valid[..., None].astype(jnp.float32)
    sel = sel.reshape(_TAPS, ho * wo, h * w)
    sel = jnp.pad(sel, ((0, 0),
                        (0, rows_per_tap - ho * wo),
                        (0, n_cols - h * w)))
    return sel.reshape(_TAPS * rows_per_tap, n_cols)


def _block_diag2(m):
    """blockdiag(m, m): one copy per lane-batched image."""
    z = jnp.zeros_like(m)
    top = jnp.concatenate([m, z], axis=1)
    bot = jnp.concatenate([z, m], axis=1)
    return jnp.concatenate([top, bot], axis=0)


# ------------------------------ fused kernel ---------------------------------

def _make_kernel(rpts, n_flat):
    rpt2, rpt3, rpt4 = rpts

    def kernel(p1_ref, w1_ref, b1_ref,
               s2_ref, w2_ref, b2_ref,
               s3_ref, w3_ref, b3_ref,
               s4_ref, w4_ref, b4_ref,
               fw1_ref, fb1_ref, fw2_ref, fb2_ref,
               o_ref,
               sel2_scr, sel3_scr, sel4_scr):
        f32 = jnp.float32

        # conv1: wrapper-side im2col patches (both images in lanes) @ block-diag
        # weight, bias + ReLU.  (rows, 2*K1) @ (2*K1, 128) -> (rows, 128).
        x = jnp.dot(p1_ref[...], w1_ref[...], preferred_element_type=f32)
        x = jnp.maximum(x + b1_ref[...], 0.0)

        # conv2..conv4: one selection matmul per layer (staged in VMEM scratch),
        # then 9 block-diagonal tap matmuls with two parallel accumulators.
        for s_ref, w_ref, b_ref, scr, rpt in (
                (s2_ref, w2_ref, b2_ref, sel2_scr, rpt2),
                (s3_ref, w3_ref, b3_ref, sel3_scr, rpt3),
                (s4_ref, w4_ref, b4_ref, sel4_scr, rpt4)):
            scr[...] = jnp.dot(s_ref[...], x, preferred_element_type=f32)
            acc_a = jnp.dot(scr[0:rpt, :], w_ref[0:_CL, :],
                            preferred_element_type=f32)
            acc_b = jnp.dot(scr[rpt:2 * rpt, :], w_ref[_CL:2 * _CL, :],
                            preferred_element_type=f32)
            for t in range(2, _TAPS):
                d = jnp.dot(scr[t * rpt:(t + 1) * rpt, :],
                            w_ref[t * _CL:(t + 1) * _CL, :],
                            preferred_element_type=f32)
                if t % 2 == 0:
                    acc_a = acc_a + d
                else:
                    acc_b = acc_b + d
            x = jnp.maximum(acc_a + acc_b + b_ref[...], 0.0)     # (rpt, 128)

        # fc1: gather the n_flat REAL conv4 rows into a (2, n_flat*64) lane-dense
        # slab (per-image flatten) and do one dot.  Padding rows are never read.
        rows = []
        for n in range(_IMG):
            pieces = [x[r:r + 1, n * _C:(n + 1) * _C] for r in range(n_flat)]
            rows.append(pieces[0] if n_flat == 1
                        else jnp.concatenate(pieces, axis=1))
        flat = jnp.concatenate(rows, axis=0)                     # (2, n_flat*64)
        h = jnp.dot(flat, fw1_ref[...], preferred_element_type=f32) + fb1_ref[...]
        h = jnp.maximum(h, 0.0)                                  # (2, 1024)

        # fc2 + ReLU + softmax (module applies ReLU before softmax), batched over
        # both lane-batched images; single output store.
        logits = jnp.dot(h, fw2_ref[...], preferred_element_type=f32) + fb2_ref[...]
        logits = jnp.maximum(logits, 0.0)
        m = jnp.max(logits, axis=-1, keepdims=True)
        e = jnp.exp(logits - m)
        probs = e / jnp.sum(e, axis=-1, keepdims=True)
        o_ref[...] = probs.astype(o_ref.dtype)

    return kernel


# ------------------------------- wrapper glue --------------------------------

def _im2col_3x3_s2(x_nhwc):
    """Wrapper-side im2col for conv1 only (plain XLA, runs once on the input)."""
    n, h, w, c = x_nhwc.shape
    ho, wo = _out_sz(h), _out_sz(w)
    xp = jnp.pad(x_nhwc, ((0, 0), (1, 1), (1, 1), (0, 0)))
    cols = []
    for kh in range(3):
        for kw in range(3):
            cols.append(xp[:, kh:kh + 2 * ho:2, kw:kw + 2 * wo:2, :])
    patches = jnp.concatenate(cols, axis=-1)                    # (n, ho, wo, 9c)
    return patches.reshape(n, ho * wo, 9 * c)


def prepare_params(params, input_h, input_w):
    """One-time transform of PyTorch-layout params into kernel-ready tensors."""
    plan = _conv_plan(input_h, input_w)
    prep = {}

    # conv1: (kh, kw, cin)-ordered im2col weight, K padded to 8, block-diag per image.
    w1 = jnp.transpose(params["conv1_w"], (2, 3, 1, 0)).reshape(-1, _C)
    k1 = w1.shape[0]
    k1p = _round8(k1)
    w1 = jnp.pad(w1, ((0, k1p - k1), (0, 0)))
    prep["w1"] = _block_diag2(w1)                               # (2*k1p, 128)
    prep["b1"] = jnp.tile(params["conv1_b"].reshape(1, _C), (1, _IMG))

    # conv2..conv4: selection matrices + per-tap block-diagonal weights.
    n_cols = plan[0][4]
    for idx, layer in enumerate((2, 3, 4)):
        h_in, w_in, _, _, rpt = plan[idx + 1]
        prep[f"s{layer}"] = _build_selection(h_in, w_in, rpt, n_cols)
        wt = jnp.transpose(params[f"conv{layer}_w"],
                           (2, 3, 1, 0)).reshape(_TAPS, _C, _C)
        prep[f"w{layer}"] = jnp.concatenate(
            [_block_diag2(wt[t]) for t in range(_TAPS)], axis=0)  # (9*128, 128)
        prep[f"b{layer}"] = jnp.tile(
            params[f"conv{layer}_b"].reshape(1, _C), (1, _IMG))
        n_cols = rpt

    # fc1: fold PyTorch's NCHW (c, h, w) flatten into the kernel's (h, w, c) order.
    h4, w4 = plan[3][2], plan[3][3]
    fw1 = params["fc1_w"].reshape(_C, h4, w4, -1)
    prep["fw1"] = jnp.transpose(fw1, (1, 2, 0, 3)).reshape(h4 * w4 * _C, -1)
    prep["fb1"] = params["fc1_b"].reshape(1, -1)
    prep["fw2"] = params["fc2_w"]
    prep["fb2"] = params["fc2_b"].reshape(1, -1)
    return prep


def cave_classifier_forward(x_nchw, prep):
    n, _, hh, ww = x_nchw.shape
    plan = _conv_plan(hh, ww)
    conv1_rows = plan[0][4]
    rpts = (plan[1][4], plan[2][4], plan[3][4])
    n_flat = plan[3][2] * plan[3][3]

    # Wrapper-side im2col for conv1 + lane-batched (2 images / 128 lanes) packing.
    x = jnp.transpose(x_nchw, (0, 2, 3, 1))                     # NCHW -> NHWC
    patches = _im2col_3x3_s2(x)                                 # (n, ho*wo, 9*cin)
    k1 = patches.shape[-1]
    k1p = _round8(k1)
    patches = jnp.pad(patches, ((0, 0),
                                (0, conv1_rows - patches.shape[1]),
                                (0, k1p - k1)))
    ntiles = -(-n // _IMG)
    if ntiles * _IMG != n:
        patches = jnp.pad(patches, ((0, ntiles * _IMG - n), (0, 0), (0, 0)))
    patches = patches.reshape(ntiles, _IMG, conv1_rows, k1p)
    patches = jnp.transpose(patches, (0, 2, 1, 3)).reshape(
        ntiles, conv1_rows, _IMG * k1p)

    n_classes = prep["fw2"].shape[1]
    kernel = _make_kernel(rpts, n_flat)

    def full(a):
        return pl.BlockSpec(a.shape, lambda b: (0,) * a.ndim)

    grid_spec = pltpu.PrefetchScalarGridSpec(
        num_scalar_prefetch=0,
        grid=(ntiles,),
        in_specs=[
            pl.BlockSpec((None, conv1_rows, _IMG * k1p), lambda b: (b, 0, 0)),
            full(prep["w1"]), full(prep["b1"]),
            full(prep["s2"]), full(prep["w2"]), full(prep["b2"]),
            full(prep["s3"]), full(prep["w3"]), full(prep["b3"]),
            full(prep["s4"]), full(prep["w4"]), full(prep["b4"]),
            full(prep["fw1"]), full(prep["fb1"]),
            full(prep["fw2"]), full(prep["fb2"]),
        ],
        out_specs=pl.BlockSpec((None, _IMG, n_classes), lambda b: (b, 0, 0)),
        scratch_shapes=[
            pltpu.VMEM((_TAPS * rpts[0], _CL), jnp.float32),
            pltpu.VMEM((_TAPS * rpts[1], _CL), jnp.float32),
            pltpu.VMEM((_TAPS * rpts[2], _CL), jnp.float32),
        ],
    )
    out = pl.pallas_call(
        kernel,
        out_shape=jax.ShapeDtypeStruct((ntiles, _IMG, n_classes), jnp.float32),
        grid_spec=grid_spec,
        compiler_params=pltpu.CompilerParams(
            dimension_semantics=("parallel",),
            vmem_limit_bytes=16 * 1024 * 1024),
    )(patches, prep["w1"], prep["b1"],
      prep["s2"], prep["w2"], prep["b2"],
      prep["s3"], prep["w3"], prep["b3"],
      prep["s4"], prep["w4"], prep["b4"],
      prep["fw1"], prep["fb1"], prep["fw2"], prep["fb2"])
    return out.reshape(ntiles * _IMG, n_classes)[:n]


# ---------------------------- pure-JAX reference ----------------------------

def reference_forward(x_nchw, params):
    x = x_nchw
    for i in range(1, 5):
        w = params[f"conv{i}_w"]
        b = params[f"conv{i}_b"]
        x = jax.lax.conv_general_dilated(
            x, w, window_strides=(2, 2), padding=((1, 1), (1, 1)),
            dimension_numbers=("NCHW", "OIHW", "NCHW"))
        x = jax.nn.relu(x + b[None, :, None, None])
    x = x.reshape(x.shape[0], -1)
    x = jax.nn.relu(x @ params["fc1_w"] + params["fc1_b"])
    x = jax.nn.relu(x @ params["fc2_w"] + params["fc2_b"])
    return jax.nn.softmax(x, axis=1)


# ------------------------------ parameter init ------------------------------

def init_params(key, in_channels, input_h, input_w):
    h, w = input_h, input_w
    for _ in range(4):
        h, w = _out_sz(h), _out_sz(w)
    flat_feats = _C * h * w

    params = {}
    cin = in_channels
    keys = jax.random.split(key, 12)
    k_idx = 0
    for i in range(1, 5):
        scale = 1.0 / jnp.sqrt(cin * 9.0)
        params[f"conv{i}_w"] = jax.random.uniform(
            keys[k_idx], (_C, cin, 3, 3), jnp.float32, -scale, scale)
        params[f"conv{i}_b"] = jax.random.uniform(
            keys[k_idx + 1], (_C,), jnp.float32, -scale, scale)
        k_idx += 2
        cin = _C

    s1 = 1.0 / jnp.sqrt(float(flat_feats))
    params["fc1_w"] = jax.random.uniform(
        keys[k_idx], (flat_feats, 1024), jnp.float32, -s1, s1)
    params["fc1_b"] = jax.random.uniform(
        keys[k_idx + 1], (1024,), jnp.float32, -s1, s1)
    s2 = 1.0 / jnp.sqrt(1024.0)
    params["fc2_w"] = jax.random.uniform(
        keys[k_idx + 2], (1024, 2), jnp.float32, -s2, s2)
    params["fc2_b"] = jax.random.uniform(
        keys[k_idx + 3], (2,), jnp.float32, -s2, s2)
    return params


# ---------------------------------- main ------------------------------------

if __name__ == "__main__":
    key = jax.random.PRNGKey(0)
    k_in, k_par = jax.random.split(key)

    batch, in_channels, H, W = 2, 3, 32, 32          # small CaveClassifier config
    x = jax.random.normal(k_in, (batch, in_channels, H, W), jnp.float32)
    params = init_params(k_par, in_channels, H, W)
    prep = prepare_params(params, H, W)

    fwd = jax.jit(cave_classifier_forward)
    out = jax.block_until_ready(fwd(x, prep))

    ref = jax.block_until_ready(reference_forward(x, params))
    assert out.shape == (batch, 2), out.shape
    assert jnp.allclose(out, ref, atol=2e-5, rtol=1e-5), (out, ref)
    assert jnp.allclose(jnp.sum(out, axis=1), 1.0, atol=1e-5)

    print("KERNEL_OK")
</pallas_src>

<mosaic_0001>
module attributes {stable_mosaic.version = 11 : i64} {
  func.func @kernel(%arg0: i32, %arg1: memref<1x256x64xf32, #tpu.memory_space<vmem>>, %arg2: memref<64x128xf32, #tpu.memory_space<vmem>>, %arg3: memref<1x128xf32, #tpu.memory_space<vmem>>, %arg4: memref<576x256xf32, #tpu.memory_space<vmem>>, %arg5: memref<1152x128xf32, #tpu.memory_space<vmem>>, %arg6: memref<1x128xf32, #tpu.memory_space<vmem>>, %arg7: memref<144x64xf32, #tpu.memory_space<vmem>>, %arg8: memref<1152x128xf32, #tpu.memory_space<vmem>>, %arg9: memref<1x128xf32, #tpu.memory_space<vmem>>, %arg10: memref<72x16xf32, #tpu.memory_space<vmem>>, %arg11: memref<1152x128xf32, #tpu.memory_space<vmem>>, %arg12: memref<1x128xf32, #tpu.memory_space<vmem>>, %arg13: memref<256x1024xf32, #tpu.memory_space<vmem>>, %arg14: memref<1x1024xf32, #tpu.memory_space<vmem>>, %arg15: memref<1024x2xf32, #tpu.memory_space<vmem>>, %arg16: memref<1x2xf32, #tpu.memory_space<vmem>>, %arg17: memref<1x2x2xf32, #tpu.memory_space<vmem>>, %arg18: memref<576x128xf32, #tpu.memory_space<vmem>>, %arg19: memref<144x128xf32, #tpu.memory_space<vmem>>, %arg20: memref<72x128xf32, #tpu.memory_space<vmem>>) attributes {dimension_semantics = [#tpu.dimension_semantics<parallel>], iteration_bounds = array<i64: 1>, scalar_prefetch = 0 : i64, scratch_operands = 3 : i64, tpu.core_type = #tpu.core_type<tc>, window_params = [{transform_indices = @transform_0, window_bounds = array<i64: 1, 256, 64>}, {pipeline_mode = #tpu.pipeline_mode<synchronous>, transform_indices = @transform_1, window_bounds = array<i64: 64, 128>}, {pipeline_mode = #tpu.pipeline_mode<synchronous>, transform_indices = @transform_2, window_bounds = array<i64: 1, 128>}, {pipeline_mode = #tpu.pipeline_mode<synchronous>, transform_indices = @transform_3, window_bounds = array<i64: 576, 256>}, {pipeline_mode = #tpu.pipeline_mode<synchronous>, transform_indices = @transform_4, window_bounds = array<i64: 1152, 128>}, {pipeline_mode = #tpu.pipeline_mode<synchronous>, transform_indices = @transform_5, window_bounds = array<i64: 1, 128>}, {pipeline_mode = #tpu.pipeline_mode<synchronous>, transform_indices = @transform_6, window_bounds = array<i64: 144, 64>}, {pipeline_mode = #tpu.pipeline_mode<synchronous>, transform_indices = @transform_7, window_bounds = array<i64: 1152, 128>}, {pipeline_mode = #tpu.pipeline_mode<synchronous>, transform_indices = @transform_8, window_bounds = array<i64: 1, 128>}, {pipeline_mode = #tpu.pipeline_mode<synchronous>, transform_indices = @transform_9, window_bounds = array<i64: 72, 16>}, {pipeline_mode = #tpu.pipeline_mode<synchronous>, transform_indices = @transform_10, window_bounds = array<i64: 1152, 128>}, {pipeline_mode = #tpu.pipeline_mode<synchronous>, transform_indices = @transform_11, window_bounds = array<i64: 1, 128>}, {pipeline_mode = #tpu.pipeline_mode<synchronous>, transform_indices = @transform_12, window_bounds = array<i64: 256, 1024>}, {pipeline_mode = #tpu.pipeline_mode<synchronous>, transform_indices = @transform_13, window_bounds = array<i64: 1, 1024>}, {pipeline_mode = #tpu.pipeline_mode<synchronous>, transform_indices = @transform_14, window_bounds = array<i64: 1024, 2>}, {pipeline_mode = #tpu.pipeline_mode<synchronous>, transform_indices = @transform_15, window_bounds = array<i64: 1, 2>}, {transform_indices = @transform_16, window_bounds = array<i64: 1, 2, 2>}]} {
    %c0 = arith.constant 0 : index
    %c0_0 = arith.constant 0 : index
    %c0_1 = arith.constant 0 : index
    %0 = vector.load %arg1[%c0, %c0_0, %c0_1] : memref<1x256x64xf32, #tpu.memory_space<vmem>>, vector<1x256x64xf32>
    %1 = vector.shape_cast %0 : vector<1x256x64xf32> to vector<256x64xf32>
    %c0_2 = arith.constant 0 : index
    %c0_3 = arith.constant 0 : index
    %2 = vector.load %arg2[%c0_2, %c0_3] : memref<64x128xf32, #tpu.memory_space<vmem>>, vector<64x128xf32>
    %cst = arith.constant dense<0.000000e+00> : vector<256x128xf32>
    %3 = tpu.matmul %1, %2, %cst {dimension_numbers = #tpu.dot_dimension_numbers<[1], [0], [0], [1], [0, 0, 1, 1], [], []>} : vector<256x64xf32>, vector<64x128xf32>, vector<256x128xf32> -> vector<256x128xf32>
    %c0_4 = arith.constant 0 : index
    %c0_5 = arith.constant 0 : index
    %4 = vector.load %arg3[%c0_4, %c0_5] : memref<1x128xf32, #tpu.memory_space<vmem>>, vector<1x128xf32>
    %5 = vector.broadcast %4 : vector<1x128xf32> to vector<256x128xf32>
    %6 = arith.addf %3, %5 : vector<256x128xf32>
    %cst_6 = arith.constant 0.000000e+00 : f32
    %7 = vector.broadcast %cst_6 : f32 to vector<256x128xf32>
    %8 = arith.maximumf %6, %7 : vector<256x128xf32>
    %c0_7 = arith.constant 0 : index
    %c0_8 = arith.constant 0 : index
    %9 = vector.load %arg4[%c0_7, %c0_8] : memref<576x256xf32, #tpu.memory_space<vmem>>, vector<576x256xf32>
    %cst_9 = arith.constant dense<0.000000e+00> : vector<576x128xf32>
    %10 = tpu.matmul %9, %8, %cst_9 {dimension_numbers = #tpu.dot_dimension_numbers<[1], [0], [0], [1], [0, 0, 1, 1], [], []>} : vector<576x256xf32>, vector<256x128xf32>, vector<576x128xf32> -> vector<576x128xf32>
    %c0_10 = arith.constant 0 : index
    %c0_11 = arith.constant 0 : index
    %11 = vector.load %arg18[%c0_10, %c0_11] : memref<576x128xf32, #tpu.memory_space<vmem>>, vector<576x128xf32>
    tpu.vector_store %arg18[%c0_10, %c0_11], %10 {strides = array<i32>} : memref<576x128xf32, #tpu.memory_space<vmem>>, vector<576x128xf32>,
    %c0_12 = arith.constant 0 : index
    %c0_13 = arith.constant 0 : index
    %12 = vector.load %arg18[%c0_12, %c0_13] : memref<576x128xf32, #tpu.memory_space<vmem>>, vector<64x128xf32>
    %c0_14 = arith.constant 0 : index
    %c0_15 = arith.constant 0 : index
    %13 = vector.load %arg5[%c0_14, %c0_15] : memref<1152x128xf32, #tpu.memory_space<vmem>>, vector<128x128xf32>
    %cst_16 = arith.constant dense<0.000000e+00> : vector<64x128xf32>
    %14 = tpu.matmul %12, %13, %cst_16 {dimension_numbers = #tpu.dot_dimension_numbers<[1], [0], [0], [1], [0, 0, 1, 1], [], []>} : vector<64x128xf32>, vector<128x128xf32>, vector<64x128xf32> -> vector<64x128xf32>
    %c64 = arith.constant 64 : index
    %c0_17 = arith.constant 0 : index
    %15 = vector.load %arg18[%c64, %c0_17] : memref<576x128xf32, #tpu.memory_space<vmem>>, vector<64x128xf32>
    %c128 = arith.constant 128 : index
    %c0_18 = arith.constant 0 : index
    %16 = vector.load %arg5[%c128, %c0_18] : memref<1152x128xf32, #tpu.memory_space<vmem>>, vector<128x128xf32>
    %cst_19 = arith.constant dense<0.000000e+00> : vector<64x128xf32>
    %17 = tpu.matmul %15, %16, %cst_19 {dimension_numbers = #tpu.dot_dimension_numbers<[1], [0], [0], [1], [0, 0, 1, 1], [], []>} : vector<64x128xf32>, vector<128x128xf32>, vector<64x128xf32> -> vector<64x128xf32>
    %c128_20 = arith.constant 128 : index
    %c0_21 = arith.constant 0 : index
    %18 = vector.load %arg18[%c128_20, %c0_21] : memref<576x128xf32, #tpu.memory_space<vmem>>, vector<64x128xf32>
    %c256 = arith.constant 256 : index
    %c0_22 = arith.constant 0 : index
    %19 = vector.load %arg5[%c256, %c0_22] : memref<1152x128xf32, #tpu.memory_space<vmem>>, vector<128x128xf32>
    %cst_23 = arith.constant dense<0.000000e+00> : vector<64x128xf32>
    %20 = tpu.matmul %18, %19, %cst_23 {dimension_numbers = #tpu.dot_dimension_numbers<[1], [0], [0], [1], [0, 0, 1, 1], [], []>} : vector<64x128xf32>, vector<128x128xf32>, vector<64x128xf32> -> vector<64x128xf32>
    %21 = arith.addf %14, %20 : vector<64x128xf32>
    %c192 = arith.constant 192 : index
    %c0_24 = arith.constant 0 : index
    %22 = vector.load %arg18[%c192, %c0_24] : memref<576x128xf32, #tpu.memory_space<vmem>>, vector<64x128xf32>
    %c384 = arith.constant 384 : index
    %c0_25 = arith.constant 0 : index
    %23 = vector.load %arg5[%c384, %c0_25] : memref<1152x128xf32, #tpu.memory_space<vmem>>, vector<128x128xf32>
    %cst_26 = arith.constant dense<0.000000e+00> : vector<64x128xf32>
    %24 = tpu.matmul %22, %23, %cst_26 {dimension_numbers = #tpu.dot_dimension_numbers<[1], [0], [0], [1], [0, 0, 1, 1], [], []>} : vector<64x128xf32>, vector<128x128xf32>, vector<64x128xf32> -> vector<64x128xf32>
    %25 = arith.addf %17, %24 : vector<64x128xf32>
    %c256_27 = arith.constant 256 : index
    %c0_28 = arith.constant 0 : index
    %26 = vector.load %arg18[%c256_27, %c0_28] : memref<576x128xf32, #tpu.memory_space<vmem>>, vector<64x128xf32>
    %c512 = arith.constant 512 : index
    %c0_29 = arith.constant 0 : index
    %27 = vector.load %arg5[%c512, %c0_29] : memref<1152x128xf32, #tpu.memory_space<vmem>>, vector<128x128xf32>
    %cst_30 = arith.constant dense<0.000000e+00> : vector<64x128xf32>
    %28 = tpu.matmul %26, %27, %cst_30 {dimension_numbers = #tpu.dot_dimension_numbers<[1], [0], [0], [1], [0, 0, 1, 1], [], []>} : vector<64x128xf32>, vector<128x128xf32>, vector<64x128xf32> -> vector<64x128xf32>
    %29 = arith.addf %21, %28 : vector<64x128xf32>
    %c320 = arith.constant 320 : index
    %c0_31 = arith.constant 0 : index
    %30 = vector.load %arg18[%c320, %c0_31] : memref<576x128xf32, #tpu.memory_space<vmem>>, vector<64x128xf32>
    %c640 = arith.constant 640 : index
    %c0_32 = arith.constant 0 : index
    %31 = vector.load %arg5[%c640, %c0_32] : memref<1152x128xf32, #tpu.memory_space<vmem>>, vector<128x128xf32>
    %cst_33 = arith.constant dense<0.000000e+00> : vector<64x128xf32>
    %32 = tpu.matmul %30, %31, %cst_33 {dimension_numbers = #tpu.dot_dimension_numbers<[1], [0], [0], [1], [0, 0, 1, 1], [], []>} : vector<64x128xf32>, vector<128x128xf32>, vector<64x128xf32> -> vector<64x128xf32>
    %33 = arith.addf %25, %32 : vector<64x128xf32>
    %c384_34 = arith.constant 384 : index
    %c0_35 = arith.constant 0 : index
    %34 = vector.load %arg18[%c384_34, %c0_35] : memref<576x128xf32, #tpu.memory_space<vmem>>, vector<64x128xf32>
    %c768 = arith.constant 768 : index
    %c0_36 = arith.constant 0 : index
    %35 = vector.load %arg5[%c768, %c0_36] : memref<1152x128xf32, #tpu.memory_space<vmem>>, vector<128x128xf32>
    %cst_37 = arith.constant dense<0.000000e+00> : vector<64x128xf32>
    %36 = tpu.matmul %34, %35, %cst_37 {dimension_numbers = #tpu.dot_dimension_numbers<[1], [0], [0], [1], [0, 0, 1, 1], [], []>} : vector<64x128xf32>, vector<128x128xf32>, vector<64x128xf32> -> vector<64x128xf32>
    %37 = arith.addf %29, %36 : vector<64x128xf32>
    %c448 = arith.constant 448 : index
    %c0_38 = arith.constant 0 : index
    %38 = vector.load %arg18[%c448, %c0_38] : memref<576x128xf32, #tpu.memory_space<vmem>>, vector<64x128xf32>
    %c896 = arith.constant 896 : index
    %c0_39 = arith.constant 0 : index
    %39 = vector.load %arg5[%c896, %c0_39] : memref<1152x128xf32, #tpu.memory_space<vmem>>, vector<128x128xf32>
    %cst_40 = arith.constant dense<0.000000e+00> : vector<64x128xf32>
    %40 = tpu.matmul %38, %39, %cst_40 {dimension_numbers = #tpu.dot_dimension_numbers<[1], [0], [0], [1], [0, 0, 1, 1], [], []>} : vector<64x128xf32>, vector<128x128xf32>, vector<64x128xf32> -> vector<64x128xf32>
    %41 = arith.addf %33, %40 : vector<64x128xf32>
    %c512_41 = arith.constant 512 : index
    %c0_42 = arith.constant 0 : index
    %42 = vector.load %arg18[%c512_41, %c0_42] : memref<576x128xf32, #tpu.memory_space<vmem>>, vector<64x128xf32>
    %c1024 = arith.constant 1024 : index
    %c0_43 = arith.constant 0 : index
    %43 = vector.load %arg5[%c1024, %c0_43] : memref<1152x128xf32, #tpu.memory_space<vmem>>, vector<128x128xf32>
    %cst_44 = arith.constant dense<0.000000e+00> : vector<64x128xf32>
    %44 = tpu.matmul %42, %43, %cst_44 {dimension_numbers = #tpu.dot_dimension_numbers<[1], [0], [0], [1], [0, 0, 1, 1], [], []>} : vector<64x128xf32>, vector<128x128xf32>, vector<64x128xf32> -> vector<64x128xf32>
    %45 = arith.addf %37, %44 : vector<64x128xf32>
    %46 = arith.addf %45, %41 : vector<64x128xf32>
    %c0_45 = arith.constant 0 : index
    %c0_46 = arith.constant 0 : index
    %47 = vector.load %arg6[%c0_45, %c0_46] : memref<1x128xf32, #tpu.memory_space<vmem>>, vector<1x128xf32>
    %48 = vector.broadcast %47 : vector<1x128xf32> to vector<64x128xf32>
    %49 = arith.addf %46, %48 : vector<64x128xf32>
    %cst_47 = arith.constant 0.000000e+00 : f32
    %50 = vector.broadcast %cst_47 : f32 to vector<64x128xf32>
    %51 = arith.maximumf %49, %50 : vector<64x128xf32>
    %c0_48 = arith.constant 0 : index
    %c0_49 = arith.constant 0 : index
    %52 = vector.load %arg7[%c0_48, %c0_49] : memref<144x64xf32, #tpu.memory_space<vmem>>, vector<144x64xf32>
    %cst_50 = arith.constant dense<0.000000e+00> : vector<144x128xf32>
    %53 = tpu.matmul %52, %51, %cst_50 {dimension_numbers = #tpu.dot_dimension_numbers<[1], [0], [0], [1], [0, 0, 1, 1], [], []>} : vector<144x64xf32>, vector<64x128xf32>, vector<144x128xf32> -> vector<144x128xf32>
    %c0_51 = arith.constant 0 : index
    %c0_52 = arith.constant 0 : index
    %54 = vector.load %arg19[%c0_51, %c0_52] : memref<144x128xf32, #tpu.memory_space<vmem>>, vector<144x128xf32>
    tpu.vector_store %arg19[%c0_51, %c0_52], %53 {strides = array<i32>} : memref<144x128xf32, #tpu.memory_space<vmem>>, vector<144x128xf32>,
    %c0_53 = arith.constant 0 : index
    %c0_54 = arith.constant 0 : index
    %55 = vector.load %arg19[%c0_53, %c0_54] : memref<144x128xf32, #tpu.memory_space<vmem>>, vector<16x128xf32>
    %c0_55 = arith.constant 0 : index
    %c0_56 = arith.constant 0 : index
    %56 = vector.load %arg8[%c0_55, %c0_56] : memref<1152x128xf32, #tpu.memory_space<vmem>>, vector<128x128xf32>
    %cst_57 = arith.constant dense<0.000000e+00> : vector<16x128xf32>
    %57 = tpu.matmul %55, %56, %cst_57 {dimension_numbers = #tpu.dot_dimension_numbers<[1], [0], [0], [1], [0, 0, 1, 1], [], []>} : vector<16x128xf32>, vector<128x128xf32>, vector<16x128xf32> -> vector<16x128xf32>
    %c16 = arith.constant 16 : index
    %c0_58 = arith.constant 0 : index
    %58 = vector.load %arg19[%c16, %c0_58] : memref<144x128xf32, #tpu.memory_space<vmem>>, vector<16x128xf32>
    %c128_59 = arith.constant 128 : index
    %c0_60 = arith.constant 0 : index
    %59 = vector.load %arg8[%c128_59, %c0_60] : memref<1152x128xf32, #tpu.memory_space<vmem>>, vector<128x128xf32>
    %cst_61 = arith.constant dense<0.000000e+00> : vector<16x128xf32>
    %60 = tpu.matmul %58, %59, %cst_61 {dimension_numbers = #tpu.dot_dimension_numbers<[1], [0], [0], [1], [0, 0, 1, 1], [], []>} : vector<16x128xf32>, vector<128x128xf32>, vector<16x128xf32> -> vector<16x128xf32>
    %c32 = arith.constant 32 : index
    %c0_62 = arith.constant 0 : index
    %61 = vector.load %arg19[%c32, %c0_62] : memref<144x128xf32, #tpu.memory_space<vmem>>, vector<16x128xf32>
    %c256_63 = arith.constant 256 : index
    %c0_64 = arith.constant 0 : index
    %62 = vector.load %arg8[%c256_63, %c0_64] : memref<1152x128xf32, #tpu.memory_space<vmem>>, vector<128x128xf32>
    %cst_65 = arith.constant dense<0.000000e+00> : vector<16x128xf32>
    %63 = tpu.matmul %61, %62, %cst_65 {dimension_numbers = #tpu.dot_dimension_numbers<[1], [0], [0], [1], [0, 0, 1, 1], [], []>} : vector<16x128xf32>, vector<128x128xf32>, vector<16x128xf32> -> vector<16x128xf32>
    %64 = arith.addf %57, %63 : vector<16x128xf32>
    %c48 = arith.constant 48 : index
    %c0_66 = arith.constant 0 : index
    %65 = vector.load %arg19[%c48, %c0_66] : memref<144x128xf32, #tpu.memory_space<vmem>>, vector<16x128xf32>
    %c384_67 = arith.constant 384 : index
    %c0_68 = arith.constant 0 : index
    %66 = vector.load %arg8[%c384_67, %c0_68] : memref<1152x128xf32, #tpu.memory_space<vmem>>, vector<128x128xf32>
    %cst_69 = arith.constant dense<0.000000e+00> : vector<16x128xf32>
    %67 = tpu.matmul %65, %66, %cst_69 {dimension_numbers = #tpu.dot_dimension_numbers<[1], [0], [0], [1], [0, 0, 1, 1], [], []>} : vector<16x128xf32>, vector<128x128xf32>, vector<16x128xf32> -> vector<16x128xf32>
    %68 = arith.addf %60, %67 : vector<16x128xf32>
    %c64_70 = arith.constant 64 : index
    %c0_71 = arith.constant 0 : index
    %69 = vector.load %arg19[%c64_70, %c0_71] : memref<144x128xf32, #tpu.memory_space<vmem>>, vector<16x128xf32>
    %c512_72 = arith.constant 512 : index
    %c0_73 = arith.constant 0 : index
    %70 = vector.load %arg8[%c512_72, %c0_73] : memref<1152x128xf32, #tpu.memory_space<vmem>>, vector<128x128xf32>
    %cst_74 = arith.constant dense<0.000000e+00> : vector<16x128xf32>
    %71 = tpu.matmul %69, %70, %cst_74 {dimension_numbers = #tpu.dot_dimension_numbers<[1], [0], [0], [1], [0, 0, 1, 1], [], []>} : vector<16x128xf32>, vector<128x128xf32>, vector<16x128xf32> -> vector<16x128xf32>
    %72 = arith.addf %64, %71 : vector<16x128xf32>
    %c80 = arith.constant 80 : index
    %c0_75 = arith.constant 0 : index
    %73 = vector.load %arg19[%c80, %c0_75] : memref<144x128xf32, #tpu.memory_space<vmem>>, vector<16x128xf32>
    %c640_76 = arith.constant 640 : index
    %c0_77 = arith.constant 0 : index
    %74 = vector.load %arg8[%c640_76, %c0_77] : memref<1152x128xf32, #tpu.memory_space<vmem>>, vector<128x128xf32>
    %cst_78 = arith.constant dense<0.000000e+00> : vector<16x128xf32>
    %75 = tpu.matmul %73, %74, %cst_78 {dimension_numbers = #tpu.dot_dimension_numbers<[1], [0], [0], [1], [0, 0, 1, 1], [], []>} : vector<16x128xf32>, vector<128x128xf32>, vector<16x128xf32> -> vector<16x128xf32>
    %76 = arith.addf %68, %75 : vector<16x128xf32>
    %c96 = arith.constant 96 : index
    %c0_79 = arith.constant 0 : index
    %77 = vector.load %arg19[%c96, %c0_79] : memref<144x128xf32, #tpu.memory_space<vmem>>, vector<16x128xf32>
    %c768_80 = arith.constant 768 : index
    %c0_81 = arith.constant 0 : index
    %78 = vector.load %arg8[%c768_80, %c0_81] : memref<1152x128xf32, #tpu.memory_space<vmem>>, vector<128x128xf32>
    %cst_82 = arith.constant dense<0.000000e+00> : vector<16x128xf32>
    %79 = tpu.matmul %77, %78, %cst_82 {dimension_numbers = #tpu.dot_dimension_numbers<[1], [0], [0], [1], [0, 0, 1, 1], [], []>} : vector<16x128xf32>, vector<128x128xf32>, vector<16x128xf32> -> vector<16x128xf32>
    %80 = arith.addf %72, %79 : vector<16x128xf32>
    %c112 = arith.constant 112 : index
    %c0_83 = arith.constant 0 : index
    %81 = vector.load %arg19[%c112, %c0_83] : memref<144x128xf32, #tpu.memory_space<vmem>>, vector<16x128xf32>
    %c896_84 = arith.constant 896 : index
    %c0_85 = arith.constant 0 : index
    %82 = vector.load %arg8[%c896_84, %c0_85] : memref<1152x128xf32, #tpu.memory_space<vmem>>, vector<128x128xf32>
    %cst_86 = arith.constant dense<0.000000e+00> : vector<16x128xf32>
    %83 = tpu.matmul %81, %82, %cst_86 {dimension_numbers = #tpu.dot_dimension_numbers<[1], [0], [0], [1], [0, 0, 1, 1], [], []>} : vector<16x128xf32>, vector<128x128xf32>, vector<16x128xf32> -> vector<16x128xf32>
    %84 = arith.addf %76, %83 : vector<16x128xf32>
    %c128_87 = arith.constant 128 : index
    %c0_88 = arith.constant 0 : index
    %85 = vector.load %arg19[%c128_87, %c0_88] : memref<144x128xf32, #tpu.memory_space<vmem>>, vector<16x128xf32>
    %c1024_89 = arith.constant 1024 : index
    %c0_90 = arith.constant 0 : index
    %86 = vector.load %arg8[%c1024_89, %c0_90] : memref<1152x128xf32, #tpu.memory_space<vmem>>, vector<128x128xf32>
    %cst_91 = arith.constant dense<0.000000e+00> : vector<16x128xf32>
    %87 = tpu.matmul %85, %86, %cst_91 {dimension_numbers = #tpu.dot_dimension_numbers<[1], [0], [0], [1], [0, 0, 1, 1], [], []>} : vector<16x128xf32>, vector<128x128xf32>, vector<16x128xf32> -> vector<16x128xf32>
    %88 = arith.addf %80, %87 : vector<16x128xf32>
    %89 = arith.addf %88, %84 : vector<16x128xf32>
    %c0_92 = arith.constant 0 : index
    %c0_93 = arith.constant 0 : index
    %90 = vector.load %arg9[%c0_92, %c0_93] : memref<1x128xf32, #tpu.memory_space<vmem>>, vector<1x128xf32>
    %91 = vector.broadcast %90 : vector<1x128xf32> to vector<16x128xf32>
    %92 = arith.addf %89, %91 : vector<16x128xf32>
    %cst_94 = arith.constant 0.000000e+00 : f32
    %93 = vector.broadcast %cst_94 : f32 to vector<16x128xf32>
    %94 = arith.maximumf %92, %93 : vector<16x128xf32>
    %c0_95 = arith.constant 0 : index
    %c0_96 = arith.constant 0 : index
    %95 = vector.load %arg10[%c0_95, %c0_96] : memref<72x16xf32, #tpu.memory_space<vmem>>, vector<72x16xf32>
    %cst_97 = arith.constant dense<0.000000e+00> : vector<72x128xf32>
    %96 = tpu.matmul %95, %94, %cst_97 {dimension_numbers = #tpu.dot_dimension_numbers<[1], [0], [0], [1], [0, 0, 1, 1], [], []>} : vector<72x16xf32>, vector<16x128xf32>, vector<72x128xf32> -> vector<72x128xf32>
    %c0_98 = arith.constant 0 : index
    %c0_99 = arith.constant 0 : index
    %97 = vector.load %arg20[%c0_98, %c0_99] : memref<72x128xf32, #tpu.memory_space<vmem>>, vector<72x128xf32>
    tpu.vector_store %arg20[%c0_98, %c0_99], %96 {strides = array<i32>} : memref<72x128xf32, #tpu.memory_space<vmem>>, vector<72x128xf32>,
    %c0_100 = arith.constant 0 : index
    %c0_101 = arith.constant 0 : index
    %98 = vector.load %arg20[%c0_100, %c0_101] : memref<72x128xf32, #tpu.memory_space<vmem>>, vector<8x128xf32>
    %c0_102 = arith.constant 0 : index
    %c0_103 = arith.constant 0 : index
    %99 = vector.load %arg11[%c0_102, %c0_103] : memref<1152x128xf32, #tpu.memory_space<vmem>>, vector<128x128xf32>
    %cst_104 = arith.constant dense<0.000000e+00> : vector<8x128xf32>
    %100 = tpu.matmul %98, %99, %cst_104 {dimension_numbers = #tpu.dot_dimension_numbers<[1], [0], [0], [1], [0, 0, 1, 1], [], []>} : vector<8x128xf32>, vector<128x128xf32>, vector<8x128xf32> -> vector<8x128xf32>
    %c8 = arith.constant 8 : index
    %c0_105 = arith.constant 0 : index
    %101 = vector.load %arg20[%c8, %c0_105] : memref<72x128xf32, #tpu.memory_space<vmem>>, vector<8x128xf32>
    %c128_106 = arith.constant 128 : index
    %c0_107 = arith.constant 0 : index
    %102 = vector.load %arg11[%c128_106, %c0_107] : memref<1152x128xf32, #tpu.memory_space<vmem>>, vector<128x128xf32>
    %cst_108 = arith.constant dense<0.000000e+00> : vector<8x128xf32>
    %103 = tpu.matmul %101, %102, %cst_108 {dimension_numbers = #tpu.dot_dimension_numbers<[1], [0], [0], [1], [0, 0, 1, 1], [], []>} : vector<8x128xf32>, vector<128x128xf32>, vector<8x128xf32> -> vector<8x128xf32>
    %c16_109 = arith.constant 16 : index
    %c0_110 = arith.constant 0 : index
    %104 = vector.load %arg20[%c16_109, %c0_110] : memref<72x128xf32, #tpu.memory_space<vmem>>, vector<8x128xf32>
    %c256_111 = arith.constant 256 : index
    %c0_112 = arith.constant 0 : index
    %105 = vector.load %arg11[%c256_111, %c0_112] : memref<1152x128xf32, #tpu.memory_space<vmem>>, vector<128x128xf32>
    %cst_113 = arith.constant dense<0.000000e+00> : vector<8x128xf32>
    %106 = tpu.matmul %104, %105, %cst_113 {dimension_numbers = #tpu.dot_dimension_numbers<[1], [0], [0], [1], [0, 0, 1, 1], [], []>} : vector<8x128xf32>, vector<128x128xf32>, vector<8x128xf32> -> vector<8x128xf32>
    %107 = arith.addf %100, %106 : vector<8x128xf32>
    %c24 = arith.constant 24 : index
    %c0_114 = arith.constant 0 : index
    %108 = vector.load %arg20[%c24, %c0_114] : memref<72x128xf32, #tpu.memory_space<vmem>>, vector<8x128xf32>
    %c384_115 = arith.constant 384 : index
    %c0_116 = arith.constant 0 : index
    %109 = vector.load %arg11[%c384_115, %c0_116] : memref<1152x128xf32, #tpu.memory_space<vmem>>, vector<128x128xf32>
    %cst_117 = arith.constant dense<0.000000e+00> : vector<8x128xf32>
    %110 = tpu.matmul %108, %109, %cst_117 {dimension_numbers = #tpu.dot_dimension_numbers<[1], [0], [0], [1], [0, 0, 1, 1], [], []>} : vector<8x128xf32>, vector<128x128xf32>, vector<8x128xf32> -> vector<8x128xf32>
    %111 = arith.addf %103, %110 : vector<8x128xf32>
    %c32_118 = arith.constant 32 : index
    %c0_119 = arith.constant 0 : index
    %112 = vector.load %arg20[%c32_118, %c0_119] : memref<72x128xf32, #tpu.memory_space<vmem>>, vector<8x128xf32>
    %c512_120 = arith.constant 512 : index
    %c0_121 = arith.constant 0 : index
    %113 = vector.load %arg11[%c512_120, %c0_121] : memref<1152x128xf32, #tpu.memory_space<vmem>>, vector<128x128xf32>
    %cst_122 = arith.constant dense<0.000000e+00> : vector<8x128xf32>
    %114 = tpu.matmul %112, %113, %cst_122 {dimension_numbers = #tpu.dot_dimension_numbers<[1], [0], [0], [1], [0, 0, 1, 1], [], []>} : vector<8x128xf32>, vector<128x128xf32>, vector<8x128xf32> -> vector<8x128xf32>
    %115 = arith.addf %107, %114 : vector<8x128xf32>
    %c40 = arith.constant 40 : index
    %c0_123 = arith.constant 0 : index
    %116 = vector.load %arg20[%c40, %c0_123] : memref<72x128xf32, #tpu.memory_space<vmem>>, vector<8x128xf32>
    %c640_124 = arith.constant 640 : index
    %c0_125 = arith.constant 0 : index
    %117 = vector.load %arg11[%c640_124, %c0_125] : memref<1152x128xf32, #tpu.memory_space<vmem>>, vector<128x128xf32>
    %cst_126 = arith.constant dense<0.000000e+00> : vector<8x128xf32>
    %118 = tpu.matmul %116, %117, %cst_126 {dimension_numbers = #tpu.dot_dimension_numbers<[1], [0], [0], [1], [0, 0, 1, 1], [], []>} : vector<8x128xf32>, vector<128x128xf32>, vector<8x128xf32> -> vector<8x128xf32>
    %119 = arith.addf %111, %118 : vector<8x128xf32>
    %c48_127 = arith.constant 48 : index
    %c0_128 = arith.constant 0 : index
    %120 = vector.load %arg20[%c48_127, %c0_128] : memref<72x128xf32, #tpu.memory_space<vmem>>, vector<8x128xf32>
    %c768_129 = arith.constant 768 : index
    %c0_130 = arith.constant 0 : index
    %121 = vector.load %arg11[%c768_129, %c0_130] : memref<1152x128xf32, #tpu.memory_space<vmem>>, vector<128x128xf32>
    %cst_131 = arith.constant dense<0.000000e+00> : vector<8x128xf32>
    %122 = tpu.matmul %120, %121, %cst_131 {dimension_numbers = #tpu.dot_dimension_numbers<[1], [0], [0], [1], [0, 0, 1, 1], [], []>} : vector<8x128xf32>, vector<128x128xf32>, vector<8x128xf32> -> vector<8x128xf32>
    %123 = arith.addf %115, %122 : vector<8x128xf32>
    %c56 = arith.constant 56 : index
    %c0_132 = arith.constant 0 : index
    %124 = vector.load %arg20[%c56, %c0_132] : memref<72x128xf32, #tpu.memory_space<vmem>>, vector<8x128xf32>
    %c896_133 = arith.constant 896 : index
    %c0_134 = arith.constant 0 : index
    %125 = vector.load %arg11[%c896_133, %c0_134] : memref<1152x128xf32, #tpu.memory_space<vmem>>, vector<128x128xf32>
    %cst_135 = arith.constant dense<0.000000e+00> : vector<8x128xf32>
    %126 = tpu.matmul %124, %125, %cst_135 {dimension_numbers = #tpu.dot_dimension_numbers<[1], [0], [0], [1], [0, 0, 1, 1], [], []>} : vector<8x128xf32>, vector<128x128xf32>, vector<8x128xf32> -> vector<8x128xf32>
    %127 = arith.addf %119, %126 : vector<8x128xf32>
    %c64_136 = arith.constant 64 : index
    %c0_137 = arith.constant 0 : index
    %128 = vector.load %arg20[%c64_136, %c0_137] : memref<72x128xf32, #tpu.memory_space<vmem>>, vector<8x128xf32>
    %c1024_138 = arith.constant 1024 : index
    %c0_139 = arith.constant 0 : index
    %129 = vector.load %arg11[%c1024_138, %c0_139] : memref<1152x128xf32, #tpu.memory_space<vmem>>, vector<128x128xf32>
    %cst_140 = arith.constant dense<0.000000e+00> : vector<8x128xf32>
    %130 = tpu.matmul %128, %129, %cst_140 {dimension_numbers = #tpu.dot_dimension_numbers<[1], [0], [0], [1], [0, 0, 1, 1], [], []>} : vector<8x128xf32>, vector<128x128xf32>, vector<8x128xf32> -> vector<8x128xf32>
    %131 = arith.addf %123, %130 : vector<8x128xf32>
    %132 = arith.addf %131, %127 : vector<8x128xf32>
    %c0_141 = arith.constant 0 : index
    %c0_142 = arith.constant 0 : index
    %133 = vector.load %arg12[%c0_141, %c0_142] : memref<1x128xf32, #tpu.memory_space<vmem>>, vector<1x128xf32>
    %134 = vector.broadcast %133 : vector<1x128xf32> to vector<8x128xf32>
    %135 = arith.addf %132, %134 : vector<8x128xf32>
    %cst_143 = arith.constant 0.000000e+00 : f32
    %136 = vector.broadcast %cst_143 : f32 to vector<8x128xf32>
    %137 = arith.maximumf %135, %136 : vector<8x128xf32>
    %138 = vector.extract_strided_slice %137 {offsets = [0, 0], sizes = [1, 64], strides = [1, 1]} : vector<8x128xf32> to vector<1x64xf32>
    %139 = vector.extract_strided_slice %137 {offsets = [1, 0], sizes = [1, 64], strides = [1, 1]} : vector<8x128xf32> to vector<1x64xf32>
    %140 = vector.extract_strided_slice %137 {offsets = [2, 0], sizes = [1, 64], strides = [1, 1]} : vector<8x128xf32> to vector<1x64xf32>
    %141 = vector.extract_strided_slice %137 {offsets = [3, 0], sizes = [1, 64], strides = [1, 1]} : vector<8x128xf32> to vector<1x64xf32>
    %142 = tpu.concatenate %138, %139, %140, %141 in 1 : vector<1x64xf32>, vector<1x64xf32>, vector<1x64xf32>, vector<1x64xf32> -> vector<1x256xf32>
    %143 = vector.extract_strided_slice %137 {offsets = [0, 64], sizes = [1, 64], strides = [1, 1]} : vector<8x128xf32> to vector<1x64xf32>
    %144 = vector.extract_strided_slice %137 {offsets = [1, 64], sizes = [1, 64], strides = [1, 1]} : vector<8x128xf32> to vector<1x64xf32>
    %145 = vector.extract_strided_slice %137 {offsets = [2, 64], sizes = [1, 64], strides = [1, 1]} : vector<8x128xf32> to vector<1x64xf32>
    %146 = vector.extract_strided_slice %137 {offsets = [3, 64], sizes = [1, 64], strides = [1, 1]} : vector<8x128xf32> to vector<1x64xf32>
    %147 = tpu.concatenate %143, %144, %145, %146 in 1 : vector<1x64xf32>, vector<1x64xf32>, vector<1x64xf32>, vector<1x64xf32> -> vector<1x256xf32>
    %148 = tpu.concatenate %142, %147 in 0 : vector<1x256xf32>, vector<1x256xf32> -> vector<2x256xf32>
    %c0_144 = arith.constant 0 : index
    %c0_145 = arith.constant 0 : index
    %149 = vector.load %arg13[%c0_144, %c0_145] : memref<256x1024xf32, #tpu.memory_space<vmem>>, vector<256x1024xf32>
    %cst_146 = arith.constant dense<0.000000e+00> : vector<2x1024xf32>
    %150 = tpu.matmul %148, %149, %cst_146 {dimension_numbers = #tpu.dot_dimension_numbers<[1], [0], [0], [1], [0, 0, 1, 1], [], []>} : vector<2x256xf32>, vector<256x1024xf32>, vector<2x1024xf32> -> vector<2x1024xf32>
    %c0_147 = arith.constant 0 : index
    %c0_148 = arith.constant 0 : index
    %151 = vector.load %arg14[%c0_147, %c0_148] : memref<1x1024xf32, #tpu.memory_space<vmem>>, vector<1x1024xf32>
    %152 = vector.broadcast %151 : vector<1x1024xf32> to vector<2x1024xf32>
    %153 = arith.addf %150, %152 : vector<2x1024xf32>
    %cst_149 = arith.constant 0.000000e+00 : f32
    %154 = vector.broadcast %cst_149 : f32 to vector<2x1024xf32>
    %155 = arith.maximumf %153, %154 : vector<2x1024xf32>
    %c0_150 = arith.constant 0 : index
    %c0_151 = arith.constant 0 : index
    %156 = vector.load %arg15[%c0_150, %c0_151] : memref<1024x2xf32, #tpu.memory_space<vmem>>, vector<1024x2xf32>
    %cst_152 = arith.constant dense<0.000000e+00> : vector<2x2xf32>
    %157 = tpu.matmul %155, %156, %cst_152 {dimension_numbers = #tpu.dot_dimension_numbers<[1], [0], [0], [1], [0, 0, 1, 1], [], []>} : vector<2x1024xf32>, vector<1024x2xf32>, vector<2x2xf32> -> vector<2x2xf32>
    %c0_153 = arith.constant 0 : index
    %c0_154 = arith.constant 0 : index
    %158 = vector.load %arg16[%c0_153, %c0_154] : memref<1x2xf32, #tpu.memory_space<vmem>>, vector<1x2xf32>
    %159 = vector.broadcast %158 : vector<1x2xf32> to vector<2x2xf32>
    %160 = arith.addf %157, %159 : vector<2x2xf32>
    %cst_155 = arith.constant 0.000000e+00 : f32
    %161 = vector.broadcast %cst_155 : f32 to vector<2x2xf32>
    %162 = arith.maximumf %160, %161 : vector<2x2xf32>
    %cst_156 = arith.constant dense<0xFF800000> : vector<2xf32>
    %163 = vector.multi_reduction <maximumf>, %162, %cst_156 [1] : vector<2x2xf32> to vector<2xf32>
    %164 = vector.shape_cast %163 : vector<2xf32> to vector<2x1xf32>
    %165 = vector.broadcast %164 : vector<2x1xf32> to vector<2x2xf32>
    %166 = arith.subf %162, %165 : vector<2x2xf32>
    %167 = math.exp %166 : vector<2x2xf32>
    %cst_157 = arith.constant dense<0.000000e+00> : vector<2xf32>
    %168 = vector.multi_reduction <add>, %167, %cst_157 [1] : vector<2x2xf32> to vector<2xf32>
    %169 = vector.shape_cast %168 : vector<2xf32> to vector<2x1xf32>
    %170 = vector.broadcast %169 : vector<2x1xf32> to vector<2x2xf32>
    %171 = arith.divf %167, %170 : vector<2x2xf32>
    %c0_158 = arith.constant 0 : index
    %c0_159 = arith.constant 0 : index
    %c0_160 = arith.constant 0 : index
    %172 = vector.load %arg17[%c0_158, %c0_159, %c0_160] : memref<1x2x2xf32, #tpu.memory_space<vmem>>, vector<1x2x2xf32>
    %173 = vector.shape_cast %172 : vector<1x2x2xf32> to vector<2x2xf32>
    %174 = vector.shape_cast %171 : vector<2x2xf32> to vector<1x2x2xf32>
    tpu.vector_store %arg17[%c0_158, %c0_159, %c0_160], %174 {strides = array<i32>} : memref<1x2x2xf32, #tpu.memory_space<vmem>>, vector<1x2x2xf32>,
    return
  }
  func.func @transform_0(%arg0: i32) -> (i32, i32, i32) {
    %c0_i32 = arith.constant 0 : i32
    %c0_i32_0 = arith.constant 0 : i32
    %c0_i32_1 = arith.constant 0 : i32
    return %arg0, %c0_i32, %c0_i32_0 : i32, i32, i32
  }
  func.func @transform_1(%arg0: i32) -> (i32, i32) {
    %c0_i32 = arith.constant 0 : i32
    %c0_i32_0 = arith.constant 0 : i32
    %c0_i32_1 = arith.constant 0 : i32
    return %c0_i32, %c0_i32_0 : i32, i32
  }
  func.func @transform_2(%arg0: i32) -> (i32, i32) {
    %c0_i32 = arith.constant 0 : i32
    %c0_i32_0 = arith.constant 0 : i32
    %c0_i32_1 = arith.constant 0 : i32
    return %c0_i32, %c0_i32_0 : i32, i32
  }
  func.func @transform_3(%arg0: i32) -> (i32, i32) {
    %c0_i32 = arith.constant 0 : i32
    %c0_i32_0 = arith.constant 0 : i32
    %c0_i32_1 = arith.constant 0 : i32
    return %c0_i32, %c0_i32_0 : i32, i32
  }
  func.func @transform_4(%arg0: i32) -> (i32, i32) {
    %c0_i32 = arith.constant 0 : i32
    %c0_i32_0 = arith.constant 0 : i32
    %c0_i32_1 = arith.constant 0 : i32
    return %c0_i32, %c0_i32_0 : i32, i32
  }
  func.func @transform_5(%arg0: i32) -> (i32, i32) {
    %c0_i32 = arith.constant 0 : i32
    %c0_i32_0 = arith.constant 0 : i32
    %c0_i32_1 = arith.constant 0 : i32
    return %c0_i32, %c0_i32_0 : i32, i32
  }
  func.func @transform_6(%arg0: i32) -> (i32, i32) {
    %c0_i32 = arith.constant 0 : i32
    %c0_i32_0 = arith.constant 0 : i32
    %c0_i32_1 = arith.constant 0 : i32
    return %c0_i32, %c0_i32_0 : i32, i32
  }
  func.func @transform_7(%arg0: i32) -> (i32, i32) {
    %c0_i32 = arith.constant 0 : i32
    %c0_i32_0 = arith.constant 0 : i32
    %c0_i32_1 = arith.constant 0 : i32
    return %c0_i32, %c0_i32_0 : i32, i32
  }
  func.func @transform_8(%arg0: i32) -> (i32, i32) {
    %c0_i32 = arith.constant 0 : i32
    %c0_i32_0 = arith.constant 0 : i32
    %c0_i32_1 = arith.constant 0 : i32
    return %c0_i32, %c0_i32_0 : i32, i32
  }
  func.func @transform_9(%arg0: i32) -> (i32, i32) {
    %c0_i32 = arith.constant 0 : i32
    %c0_i32_0 = arith.constant 0 : i32
    %c0_i32_1 = arith.constant 0 : i32
    return %c0_i32, %c0_i32_0 : i32, i32
  }
  func.func @transform_10(%arg0: i32) -> (i32, i32) {
    %c0_i32 = arith.constant 0 : i32
    %c0_i32_0 = arith.constant 0 : i32
    %c0_i32_1 = arith.constant 0 : i32
    return %c0_i32, %c0_i32_0 : i32, i32
  }
  func.func @transform_11(%arg0: i32) -> (i32, i32) {
    %c0_i32 = arith.constant 0 : i32
    %c0_i32_0 = arith.constant 0 : i32
    %c0_i32_1 = arith.constant 0 : i32
    return %c0_i32, %c0_i32_0 : i32, i32
  }
  func.func @transform_12(%arg0: i32) -> (i32, i32) {
    %c0_i32 = arith.constant 0 : i32
    %c0_i32_0 = arith.constant 0 : i32
    %c0_i32_1 = arith.constant 0 : i32
    return %c0_i32, %c0_i32_0 : i32, i32
  }
  func.func @transform_13(%arg0: i32) -> (i32, i32) {
    %c0_i32 = arith.constant 0 : i32
    %c0_i32_0 = arith.constant 0 : i32
    %c0_i32_1 = arith.constant 0 : i32
    return %c0_i32, %c0_i32_0 : i32, i32
  }
  func.func @transform_14(%arg0: i32) -> (i32, i32) {
    %c0_i32 = arith.constant 0 : i32
    %c0_i32_0 = arith.constant 0 : i32
    %c0_i32_1 = arith.constant 0 : i32
    return %c0_i32, %c0_i32_0 : i32, i32
  }
  func.func @transform_15(%arg0: i32) -> (i32, i32) {
    %c0_i32 = arith.constant 0 : i32
    %c0_i32_0 = arith.constant 0 : i32
    %c0_i32_1 = arith.constant 0 : i32
    return %c0_i32, %c0_i32_0 : i32, i32
  }
  func.func @transform_16(%arg0: i32) -> (i32, i32, i32) {
    %c0_i32 = arith.constant 0 : i32
    %c0_i32_0 = arith.constant 0 : i32
    %c0_i32_1 = arith.constant 0 : i32
    return %arg0, %c0_i32, %c0_i32_0 : i32, i32, i32
  }
}

</mosaic_0001>

<bundles_post_ra>
// kernel: cave_classifier_forward.1
= control target key start
LH: loop header
LB: loop body
LE: loop exit
PB: predicated region body
PF: predicated region fallthrough
CT: control target
= control target key end

     0   :  { %s12506_s0 = inlined_call_operand.vmem [shape: f32[1,256,64], index: 0, kind: input, shape index: {}]   ;;  %s12507_s1 = inlined_call_operand.vmem [shape: f32[64,128], index: 1, kind: input, shape index: {}]   ;;  %s12508_s2 = inlined_call_operand.vmem [shape: f32[1,128], index: 2, kind: input, shape index: {}]   ;;  %s12509_s3 = inlined_call_operand.vmem [shape: f32[576,256], index: 3, kind: input, shape index: {}]   ;;  %s12510_s4 = inlined_call_operand.vmem [shape: f32[1152,128], index: 4, kind: input, shape index: {}]   ;;  %s12511_s5 = inlined_call_operand.vmem [shape: f32[1,128], index: 5, kind: input, shape index: {}]   ;;  %s12512_s6 = inlined_call_operand.vmem [shape: f32[144,64], index: 6, kind: input, shape index: {}]   ;;  %s12513_s7 = inlined_call_operand.vmem [shape: f32[1152,128], index: 7, kind: input, shape index: {}]   ;;  %s12514_s8 = inlined_call_operand.vmem [shape: f32[1,128], index: 8, kind: input, shape index: {}]   ;;  %s12515_s9 = inlined_call_operand.vmem [shape: f32[72,16], index: 9, kind: input, shape index: {}]   ;;  %s12516_s10 = inlined_call_operand.vmem [shape: f32[1152,128], index: 10, kind: input, shape index: {}]   ;;  %s12517_s11 = inlined_call_operand.vmem [shape: f32[1,128], index: 11, kind: input, shape index: {}]   ;;  %s12518_s12 = inlined_call_operand.vmem [shape: f32[256,1024], index: 12, kind: input, shape index: {}]   ;;  %s12519_s13 = inlined_call_operand.vmem [shape: f32[1,1024], index: 13, kind: input, shape index: {}]   ;;  %s12520_s14 = inlined_call_operand.vmem [shape: f32[1024,2], index: 14, kind: input, shape index: {}]   ;;  %s12521_s15 = inlined_call_operand.vmem [shape: f32[1,2], index: 15, kind: input, shape index: {}]   ;;  %s12522_s16 = inlined_call_operand.hbm [shape: f32[1,2,2], index: 16, kind: output, shape index: {}]  }
   0x1   :  { %12524 = sst [smem:[#allocation8_spill]] %s12506_s0 }
   0x2   :  { %v86_v0 = vld [vmem:[%s12507_s1] sm:$0xff]  ;;  %v87_v1 = vld [vmem:[%s12507_s1 + $0x8] sm:$0xff]  ;;  %v88_v2 = vld [vmem:[%s12507_s1 + $0x10] sm:$0xff]  ;;  %vm101_vm0 = vcmask 523264   ;;  %s12525_s20 = sld [smem:[#allocation8_spill]] }
   0x3   :  { %v7428_v3 = vpack.c.bf16 %v87_v1, %v86_v0  ;;  %v89_v4 = vld [vmem:[%s12507_s1 + $0x18] sm:$0xff]  ;;  %v90_v6 = vld [vmem:[%s12507_s1 + $0x20] sm:$0xff]  ;;  %v91_v7 = vld [vmem:[%s12507_s1 + $0x28] sm:$0xff] }
   0x4   :  { %v7432_v5 = vpack.c.bf16 %v89_v4, %v88_v2  ;;  %v7436_v9 = vpack.c.bf16 %v91_v7, %v90_v6  ;;  %v92_v10 = vld [vmem:[%s12507_s1 + $0x30] sm:$0xff]  ;;  %v93_v11 = vld [vmem:[%s12507_s1 + $0x38] sm:$0xff] }
   0x5   :  { %7429 = vmatprep.subr.bf16.mxu0 %v7428_v3  ;;  %v7440_v12 = vpack.c.bf16 %v93_v11, %v92_v10 }
   0x6   :  { %7431 = vmatpush3.bf16.msra.mxu0 %v7428_v3 }
   0x7   :  { %7433 = vmatprep.subr.bf16.mxu0 %v7432_v5 }
   0x8   :  { %v54_v8 = vld [vmem:[%s12525_s20] sm:$0xff] }
   0x9   :  { %6280 = vmatprep.mubr.msk.f32.mxu0 %vm101_vm0, %v54_v8 }
   0xa   :  { %7435 = vmatpush3.bf16.msra.mxu0 %v7432_v5 }
   0xb   :  { %7437 = vmatprep.subr.bf16.mxu0 %v7436_v9 }
   0xe   :  { %7439 = vmatpush3.bf16.msra.mxu0 %v7436_v9 }
   0xf   :  { %7441 = vmatprep.subr.bf16.mxu0 %v7440_v12 }
  0x10   :  { %21 = vsyncpa [#allocation6], 0  ;;  %v55_v13 = vld [vmem:[%s12525_s20 + $0x8] sm:$0xff]  ;;  %v56_v14 = vld [vmem:[%s12525_s20 + $0x10] sm:$0xff]  ;;  %v8812_v44 = vmov 0.0|0.0   ;;  %vm8813_vm1 = vmmov 0  }
  0x11   :  { %v57_v15 = vld [vmem:[%s12525_s20 + $0x18] sm:$0xff]  ;;  %v58_v16 = vld [vmem:[%s12525_s20 + $0x20] sm:$0xff]  ;;  %v59_v17 = vld [vmem:[%s12525_s20 + $0x28] sm:$0xff]  ;;  %7444 = vmatprep.subr.bf16.mxu1 %v8812_v44  ;;  %vm3442_vm2 = vcmask 130048   ;;  %s8815_s30 = smov 64   ;;  %vm4416_vm3 = vcmask 1040384  }
  0x12   :  { %7443 = vmatpush3.bf16.msra.mxu0 %v7440_v12  ;;  %v60_v18 = vld [vmem:[%s12525_s20 + $0x30] sm:$0xff]  ;;  %v61_v19 = vld [vmem:[%s12525_s20 + $0x38] sm:$0xff]  ;;  %v62_v20 = vld [vmem:[%s12525_s20 + $0x40] sm:$0xff]  ;;  %vm5425_vm4 = vcmask 9216  }
  0x13   :  { %v63_v21 = vld [vmem:[%s12525_s20 + $0x48] sm:$0xff]  ;;  %v64_v22 = vld [vmem:[%s12525_s20 + $0x50] sm:$0xff]  ;;  %v65_v23 = vld [vmem:[%s12525_s20 + $0x58] sm:$0xff] }
  0x14   :  { %v66_v24 = vld [vmem:[%s12525_s20 + $0x60] sm:$0xff]  ;;  %v67_v25 = vld [vmem:[%s12525_s20 + $0x68] sm:$0xff]  ;;  %v68_v26 = vld [vmem:[%s12525_s20 + $0x70] sm:$0xff] }
  0x15   :  { %6281 = vmatmul.mubr.msk.f32.vlgmr.msra.gmra.mrb[0].mxu0 %vm101_vm0, %v55_v13  ;;  %v69_v27 = vld [vmem:[%s12525_s20 + $0x78] sm:$0xff]  ;;  %v70_v28 = vld [vmem:[%s12525_s20 + $0x80] sm:$0xff]  ;;  %v71_v29 = vld [vmem:[%s12525_s20 + $0x88] sm:$0xff] }
  0x16   :  { %6283 = vmatprep.mubr.msk.f32.mxu0 %vm101_vm0, %v56_v14  ;;  %v72_v30 = vld [vmem:[%s12525_s20 + $0x90] sm:$0xff]  ;;  %v73_v31 = vld [vmem:[%s12525_s20 + $0x98] sm:$0xff]  ;;  %v74_v32 = vld [vmem:[%s12525_s20 + $0xa0] sm:$0xff] }
  0x17   :  { %v75_v33 = vld [vmem:[%s12525_s20 + $0xa8] sm:$0xff]  ;;  %v76_v34 = vld [vmem:[%s12525_s20 + $0xb0] sm:$0xff]  ;;  %v77_v35 = vld [vmem:[%s12525_s20 + $0xb8] sm:$0xff] }
  0x18   :  { %v78_v36 = vld [vmem:[%s12525_s20 + $0xc0] sm:$0xff]  ;;  %v79_v37 = vld [vmem:[%s12525_s20 + $0xc8] sm:$0xff]  ;;  %v80_v38 = vld [vmem:[%s12525_s20 + $0xd0] sm:$0xff] }
  0x19   :  { %6284 = vmatmul.mubr.msk.f32.gmra.mrb[2].mxu0 %vm101_vm0, %v57_v15  ;;  %v81_v39 = vld [vmem:[%s12525_s20 + $0xd8] sm:$0xff]  ;;  %v82_v40 = vld [vmem:[%s12525_s20 + $0xe0] sm:$0xff]  ;;  %v83_v41 = vld [vmem:[%s12525_s20 + $0xe8] sm:$0xff] }
  0x1a   :  { %6286 = vmatprep.mubr.msk.f32.mxu0 %vm101_vm0, %v58_v16  ;;  %v84_v42 = vld [vmem:[%s12525_s20 + $0xf0] sm:$0xff]  ;;  %v85_v43 = vld [vmem:[%s12525_s20 + $0xf8] sm:$0xff]  ;;  %v456_v45 = vld [vmem:[%s12509_s3 + $0x8] sm:$0xff] }
  0x1b   :  { %663 = vmatprep.mubr.f32.mxu1 %v456_v45  ;;  %v9061_v46 = vld [vmem:[%s12508_s2] ss:$0 sm:$0xff] }
  0x1d   :  { %6287 = vmatmul.mubr.msk.f32.gmra.mrb[4].mxu0 %vm101_vm0, %v59_v17 }
  0x1e   :  { %6289 = vmatprep.mubr.msk.f32.mxu0 %vm101_vm0, %v60_v18 }
  0x21   :  { %6290 = vmatmul.mubr.msk.f32.gmra.mrb[6].mxu0 %vm101_vm0, %v61_v19 }
  0x22   :  { %6292 = vmatprep.mubr.msk.f32.mxu0 %vm101_vm0, %v62_v20 }
  0x25   :  { %6293 = vmatmul.mubr.msk.f32.gmra.mrb[8].mxu0 %vm101_vm0, %v63_v21 }
  0x26   :  { %6295 = vmatprep.mubr.msk.f32.mxu0 %vm101_vm0, %v64_v22 }
  0x29   :  { %6296 = vmatmul.mubr.msk.f32.gmra.mrb[10].mxu0 %vm101_vm0, %v65_v23 }
  0x2a   :  { %6298 = vmatprep.mubr.msk.f32.mxu0 %vm101_vm0, %v66_v24 }
  0x2d   :  { %6299 = vmatmul.mubr.msk.f32.gmra.mrb[12].mxu0 %vm101_vm0, %v67_v25 }
  0x2e   :  { %6301 = vmatprep.mubr.msk.f32.mxu0 %vm101_vm0, %v68_v26 }
  0x31   :  { %6302 = vmatmul.mubr.msk.f32.gmra.mrb[14].mxu0 %vm101_vm0, %v69_v27 }
  0x32   :  { %6304 = vmatprep.mubr.msk.f32.mxu0 %vm101_vm0, %v70_v28 }
  0x35   :  { %6305 = vmatmul.mubr.msk.f32.gmra.mrb[16].mxu0 %vm101_vm0, %v71_v29 }
  0x36   :  { %6307 = vmatprep.mubr.msk.f32.mxu0 %vm101_vm0, %v72_v30 }
  0x39   :  { %6308 = vmatmul.mubr.msk.f32.gmra.mrb[18].mxu0 %vm101_vm0, %v73_v31 }
  0x3a   :  { %6310 = vmatprep.mubr.msk.f32.mxu0 %vm101_vm0, %v74_v32 }
  0x3d   :  { %6311 = vmatmul.mubr.msk.f32.gmra.mrb[20].mxu0 %vm101_vm0, %v75_v33 }
  0x3e   :  { %6313 = vmatprep.mubr.msk.f32.mxu0 %vm101_vm0, %v76_v34 }
  0x41   :  { %6314 = vmatmul.mubr.msk.f32.gmra.mrb[22].mxu0 %vm101_vm0, %v77_v35 }
  0x42   :  { %6316 = vmatprep.mubr.msk.f32.mxu0 %vm101_vm0, %v78_v36 }
  0x45   :  { %6317 = vmatmul.mubr.msk.f32.gmra.mrb[24].mxu0 %vm101_vm0, %v79_v37 }
  0x46   :  { %6319 = vmatprep.mubr.msk.f32.mxu0 %vm101_vm0, %v80_v38 }
  0x49   :  { %6320 = vmatmul.mubr.msk.f32.gmra.mrb[26].mxu0 %vm101_vm0, %v81_v39 }
  0x4a   :  { %6322 = vmatprep.mubr.msk.f32.mxu0 %vm101_vm0, %v82_v40 }
  0x4d   :  { %6323 = vmatmul.mubr.msk.f32.gmra.mrb[28].mxu0 %vm101_vm0, %v83_v41 }
  0x4e   :  { %6325 = vmatprep.mubr.msk.f32.mxu0 %vm101_vm0, %v84_v42 }
  0x51   :  { %6326 = vmatmul.mubr.msk.f32.gmra.mrb[30].mxu0 %vm101_vm0, %v85_v43 }
  0xe8   :  { %v6282_v47 = vpop.f32.mrb[0].mxu0 }
  0xe9   :  { %v270_v48 = vadd.f32 %v6282_v47, %v9061_v46  ;;  %v264_v49 = vpop.f32.mrb[1].mxu0 }
  0xea   :  { %v265_v50 = vadd.f32 %v9061_v46, %v264_v49 }
  0xeb   :  { %v424_v51 = vmax.f32 %v270_v48, 0.0 }
  0xec   :  { %v423_v52 = vmax.f32 %v265_v50, 0.0  ;;  %v6285_v53 = vpop.f32.mrb[2].mxu0 }
  0xed   :  { %v280_v54 = vadd.f32 %v6285_v53, %v9061_v46  ;;  %v274_v55 = vpop.f32.mrb[3].mxu0 }
  0xee   :  { %v275_v56 = vadd.f32 %v9061_v46, %v274_v55  ;;  %v7445_v57 = vpack.c.bf16 %v424_v51, %v423_v52 }
  0xef   :  { %v426_v58 = vmax.f32 %v280_v54, 0.0 }
  0xf0   :  { %v425_v59 = vmax.f32 %v275_v56, 0.0  ;;  %v6288_v60 = vpop.f32.mrb[4].mxu0  ;;  %7446 = vmatpush1.bf16.msra.mxu1 %v7445_v57 }
  0xf1   :  { %v290_v61 = vadd.f32 %v6288_v60, %v9061_v46  ;;  %v284_v62 = vpop.f32.mrb[5].mxu0  ;;  %7447 = vmatprep.subr.bf16.mxu1 %v8812_v44 }
  0xf2   :  { %v7448_v63 = vpack.c.bf16 %v426_v58, %v425_v59  ;;  %v285_v0 = vadd.f32 %v9061_v46, %v284_v62 }
  0xf3   :  { %v428_v1 = vmax.f32 %v290_v61, 0.0 }
  0xf4   :  { %v427_v2 = vmax.f32 %v285_v0, 0.0  ;;  %v6291_v3 = vpop.f32.mrb[6].mxu0  ;;  %7449 = vmatpush1.bf16.msra.mxu1 %v7448_v63 }
  0xf5   :  { %v300_v4 = vadd.f32 %v6291_v3, %v9061_v46  ;;  %v294_v5 = vpop.f32.mrb[7].mxu0  ;;  %7450 = vmatprep.subr.bf16.mxu1 %v8812_v44 }
  0xf6   :  { %v7451_v6 = vpack.c.bf16 %v428_v1, %v427_v2  ;;  %v295_v7 = vadd.f32 %v9061_v46, %v294_v5 }
  0xf7   :  { %v430_v8 = vmax.f32 %v300_v4, 0.0 }
  0xf8   :  { %v429_v9 = vmax.f32 %v295_v7, 0.0  ;;  %v6294_v10 = vpop.f32.mrb[8].mxu0  ;;  %7452 = vmatpush1.bf16.msra.mxu1 %v7451_v6 }
  0xf9   :  { %v310_v11 = vadd.f32 %v6294_v10, %v9061_v46  ;;  %v304_v12 = vpop.f32.mrb[9].mxu0  ;;  %7453 = vmatprep.subr.bf16.mxu1 %v8812_v44 }
  0xfa   :  { %v7454_v13 = vpack.c.bf16 %v430_v8, %v429_v9  ;;  %v305_v14 = vadd.f32 %v9061_v46, %v304_v12 }
  0xfb   :  { %v432_v15 = vmax.f32 %v310_v11, 0.0 }
  0xfc   :  { %v431_v16 = vmax.f32 %v305_v14, 0.0  ;;  %v6297_v17 = vpop.f32.mrb[10].mxu0  ;;  %7455 = vmatpush1.bf16.msra.mxu1 %v7454_v13 }
  0xfd   :  { %v320_v18 = vadd.f32 %v6297_v17, %v9061_v46  ;;  %v314_v19 = vpop.f32.mrb[11].mxu0  ;;  %7456 = vmatprep.subr.bf16.mxu1 %v8812_v44 }
  0xfe   :  { %v7457_v20 = vpack.c.bf16 %v432_v15, %v431_v16  ;;  %v315_v21 = vadd.f32 %v9061_v46, %v314_v19 }
  0xff   :  { %v434_v22 = vmax.f32 %v320_v18, 0.0 }
 0x100   :  { %v433_v23 = vmax.f32 %v315_v21, 0.0  ;;  %v6300_v24 = vpop.f32.mrb[12].mxu0  ;;  %7458 = vmatpush1.bf16.msra.mxu1 %v7457_v20 }
 0x101   :  { %v330_v25 = vadd.f32 %v6300_v24, %v9061_v46  ;;  %v324_v26 = vpop.f32.mrb[13].mxu0  ;;  %7459 = vmatprep.subr.bf16.mxu1 %v8812_v44 }
 0x102   :  { %v7460_v27 = vpack.c.bf16 %v434_v22, %v433_v23  ;;  %v325_v28 = vadd.f32 %v9061_v46, %v324_v26 }
 0x103   :  { %v436_v29 = vmax.f32 %v330_v25, 0.0 }
 0x104   :  { %v435_v30 = vmax.f32 %v325_v28, 0.0  ;;  %v6303_v31 = vpop.f32.mrb[14].mxu0  ;;  %7461 = vmatpush1.bf16.msra.mxu1 %v7460_v27 }
 0x105   :  { %v340_v32 = vadd.f32 %v6303_v31, %v9061_v46  ;;  %v334_v33 = vpop.f32.mrb[15].mxu0  ;;  %7462 = vmatprep.subr.bf16.mxu1 %v8812_v44 }
 0x106   :  { %v7463_v34 = vpack.c.bf16 %v436_v29, %v435_v30  ;;  %v335_v35 = vadd.f32 %v9061_v46, %v334_v33  ;;  %v455_v33 = vld [vmem:[%s12509_s3] sm:$0xff] }
 0x107   :  { %v438_v36 = vmax.f32 %v340_v32, 0.0 }
 0x108   :  { %v437_v37 = vmax.f32 %v335_v35, 0.0  ;;  %v6306_v38 = vpop.f32.mrb[16].mxu0  ;;  %7464 = vmatpush1.bf16.msra.mxu1 %v7463_v34  ;;  %v458_v34 = vld [vmem:[%s12509_s3 + $0x18] sm:$0xff]  ;;  %v460_v35 = vld [vmem:[%s12509_s3 + $0x28] sm:$0xff] }
 0x109   :  { %v350_v39 = vadd.f32 %v6306_v38, %v9061_v46  ;;  %v344_v40 = vpop.f32.mrb[17].mxu0  ;;  %7465 = vmatprep.subr.bf16.mxu1 %v8812_v44  ;;  %v461_v38 = vld [vmem:[%s12509_s3 + $0x30] sm:$0xff] }
 0x10a   :  { %v7466_v41 = vpack.c.bf16 %v438_v36, %v437_v37  ;;  %v345_v42 = vadd.f32 %v9061_v46, %v344_v40  ;;  %v459_v36 = vld [vmem:[%s12509_s3 + $0x20] sm:$0xff]  ;;  %v462_v37 = vld [vmem:[%s12509_s3 + $0x38] sm:$0xff] }
 0x10b   :  { %v440_v43 = vmax.f32 %v350_v39, 0.0  ;;  %v464_v39 = vld [vmem:[%s12509_s3 + $0x48] sm:$0xff]  ;;  %v463_v40 = vld [vmem:[%s12509_s3 + $0x40] sm:$0xff] }
 0x10c   :  { %v439_v45 = vmax.f32 %v345_v42, 0.0  ;;  %v6309_v47 = vpop.f32.mrb[18].mxu0  ;;  %7467 = vmatpush1.bf16.msra.mxu1 %v7466_v41  ;;  %v466_v41 = vld [vmem:[%s12509_s3 + $0x58] sm:$0xff]  ;;  %v465_v42 = vld [vmem:[%s12509_s3 + $0x50] sm:$0xff] }
 0x10d   :  { %v360_v48 = vadd.f32 %v6309_v47, %v9061_v46  ;;  %v354_v49 = vpop.f32.mrb[19].mxu0  ;;  %7468 = vmatprep.subr.bf16.mxu1 %v8812_v44  ;;  %v470_v47 = vld [vmem:[%s12509_s3 + $0x78] sm:$0xff] }
 0x10e   :  { %v7469_v50 = vpack.c.bf16 %v440_v43, %v439_v45  ;;  %v355_v51 = vadd.f32 %v9061_v46, %v354_v49  ;;  %v468_v43 = vld [vmem:[%s12509_s3 + $0x68] sm:$0xff]  ;;  %v467_v45 = vld [vmem:[%s12509_s3 + $0x60] sm:$0xff] }
 0x10f   :  { %v442_v52 = vmax.f32 %v360_v48, 0.0  ;;  %v469_v48 = vld [vmem:[%s12509_s3 + $0x70] sm:$0xff]  ;;  %v472_v49 = vld [vmem:[%s12509_s3 + $0x88] sm:$0xff] }
 0x110   :  { %v441_v53 = vmax.f32 %v355_v51, 0.0  ;;  %v6312_v54 = vpop.f32.mrb[20].mxu0  ;;  %7470 = vmatpush1.bf16.msra.mxu1 %v7469_v50  ;;  %v471_v50 = vld [vmem:[%s12509_s3 + $0x80] sm:$0xff]  ;;  %v474_v51 = vld [vmem:[%s12509_s3 + $0x98] sm:$0xff] }
 0x111   :  { %v370_v55 = vadd.f32 %v6312_v54, %v9061_v46  ;;  %v364_v56 = vpop.f32.mrb[21].mxu0  ;;  %7471 = vmatprep.subr.bf16.mxu1 %v8812_v44  ;;  %v475_v54 = vld [vmem:[%s12509_s3 + $0xa0] sm:$0xff] }
 0x112   :  { %v7472_v57 = vpack.c.bf16 %v442_v52, %v441_v53  ;;  %v365_v58 = vadd.f32 %v9061_v46, %v364_v56  ;;  %v473_v52 = vld [vmem:[%s12509_s3 + $0x90] sm:$0xff]  ;;  %v476_v53 = vld [vmem:[%s12509_s3 + $0xa8] sm:$0xff] }
 0x113   :  { %v444_v59 = vmax.f32 %v370_v55, 0.0  ;;  %v478_v55 = vld [vmem:[%s12509_s3 + $0xb8] sm:$0xff]  ;;  %v477_v56 = vld [vmem:[%s12509_s3 + $0xb0] sm:$0xff] }
 0x114   :  { %v443_v60 = vmax.f32 %v365_v58, 0.0  ;;  %v6315_v61 = vpop.f32.mrb[22].mxu0  ;;  %7473 = vmatpush1.bf16.msra.mxu1 %v7472_v57  ;;  %v480_v57 = vld [vmem:[%s12509_s3 + $0xc8] sm:$0xff]  ;;  %v479_v58 = vld [vmem:[%s12509_s3 + $0xc0] sm:$0xff] }
 0x115   :  { %v380_v62 = vadd.f32 %v6315_v61, %v9061_v46  ;;  %v374_v63 = vpop.f32.mrb[23].mxu0  ;;  %7474 = vmatprep.subr.bf16.mxu1 %v8812_v44  ;;  %v484_v61 = vld [vmem:[%s12509_s3 + $0xe8] sm:$0xff] }
 0x116   :  { %v7475_v0 = vpack.c.bf16 %v444_v59, %v443_v60  ;;  %v375_v1 = vadd.f32 %v9061_v46, %v374_v63  ;;  %v482_v59 = vld [vmem:[%s12509_s3 + $0xd8] sm:$0xff]  ;;  %v481_v60 = vld [vmem:[%s12509_s3 + $0xd0] sm:$0xff] }
 0x117   :  { %v446_v2 = vmax.f32 %v380_v62, 0.0  ;;  %v483_v62 = vld [vmem:[%s12509_s3 + $0xe0] sm:$0xff]  ;;  %v486_v63 = vld [vmem:[%s12509_s3 + $0xf8] sm:$0xff] }
 0x118   :  { %v445_v3 = vmax.f32 %v375_v1, 0.0  ;;  %v6318_v4 = vpop.f32.mrb[24].mxu0  ;;  %7476 = vmatpush1.bf16.msra.mxu1 %v7475_v0  ;;  %v485_v0 = vld [vmem:[%s12509_s3 + $0xf0] sm:$0xff]  ;;  %v488_v1 = vld [vmem:[%s12509_s3 + $0x108] sm:$0xff] }
 0x119   :  { %v390_v5 = vadd.f32 %v6318_v4, %v9061_v46  ;;  %v384_v6 = vpop.f32.mrb[25].mxu0  ;;  %7477 = vmatprep.subr.bf16.mxu1 %v8812_v44  ;;  %v489_v4 = vld [vmem:[%s12509_s3 + $0x110] sm:$0xff] }
 0x11a   :  { %v7478_v7 = vpack.c.bf16 %v446_v2, %v445_v3  ;;  %v385_v8 = vadd.f32 %v9061_v46, %v384_v6  ;;  %v487_v2 = vld [vmem:[%s12509_s3 + $0x100] sm:$0xff]  ;;  %v490_v3 = vld [vmem:[%s12509_s3 + $0x118] sm:$0xff] }
 0x11b   :  { %v448_v9 = vmax.f32 %v390_v5, 0.0  ;;  %v492_v5 = vld [vmem:[%s12509_s3 + $0x128] sm:$0xff]  ;;  %v491_v6 = vld [vmem:[%s12509_s3 + $0x120] sm:$0xff] }
 0x11c   :  { %v447_v10 = vmax.f32 %v385_v8, 0.0  ;;  %v6321_v11 = vpop.f32.mrb[26].mxu0  ;;  %7479 = vmatpush1.bf16.msra.mxu1 %v7478_v7  ;;  %v494_v7 = vld [vmem:[%s12509_s3 + $0x138] sm:$0xff]  ;;  %v493_v8 = vld [vmem:[%s12509_s3 + $0x130] sm:$0xff] }
 0x11d   :  { %v400_v12 = vadd.f32 %v6321_v11, %v9061_v46  ;;  %v394_v13 = vpop.f32.mrb[27].mxu0  ;;  %7480 = vmatprep.subr.bf16.mxu1 %v8812_v44  ;;  %v498_v11 = vld [vmem:[%s12509_s3 + $0x158] sm:$0xff] }
 0x11e   :  { %v7481_v14 = vpack.c.bf16 %v448_v9, %v447_v10  ;;  %v395_v15 = vadd.f32 %v9061_v46, %v394_v13  ;;  %v496_v9 = vld [vmem:[%s12509_s3 + $0x148] sm:$0xff]  ;;  %v495_v10 = vld [vmem:[%s12509_s3 + $0x140] sm:$0xff] }
 0x11f   :  { %v450_v16 = vmax.f32 %v400_v12, 0.0  ;;  %v497_v12 = vld [vmem:[%s12509_s3 + $0x150] sm:$0xff]  ;;  %v500_v13 = vld [vmem:[%s12509_s3 + $0x168] sm:$0xff] }
 0x120   :  { %v449_v17 = vmax.f32 %v395_v15, 0.0  ;;  %v6324_v18 = vpop.f32.mrb[28].mxu0  ;;  %7482 = vmatpush1.bf16.msra.mxu1 %v7481_v14  ;;  %v499_v14 = vld [vmem:[%s12509_s3 + $0x160] sm:$0xff]  ;;  %v502_v15 = vld [vmem:[%s12509_s3 + $0x178] sm:$0xff] }
 0x121   :  { %v410_v19 = vadd.f32 %v6324_v18, %v9061_v46  ;;  %v404_v20 = vpop.f32.mrb[29].mxu0  ;;  %7483 = vmatprep.subr.bf16.mxu1 %v8812_v44  ;;  %v503_v18 = vld [vmem:[%s12509_s3 + $0x180] sm:$0xff] }
 0x122   :  { %v7484_v21 = vpack.c.bf16 %v450_v16, %v449_v17  ;;  %v405_v22 = vadd.f32 %v9061_v46, %v404_v20  ;;  %v501_v16 = vld [vmem:[%s12509_s3 + $0x170] sm:$0xff]  ;;  %v504_v17 = vld [vmem:[%s12509_s3 + $0x188] sm:$0xff] }
 0x123   :  { %v452_v23 = vmax.f32 %v410_v19, 0.0  ;;  %v506_v19 = vld [vmem:[%s12509_s3 + $0x198] sm:$0xff]  ;;  %v505_v20 = vld [vmem:[%s12509_s3 + $0x190] sm:$0xff] }
 0x124   :  { %v451_v24 = vmax.f32 %v405_v22, 0.0  ;;  %v6327_v25 = vpop.f32.mrb[30].mxu0  ;;  %7485 = vmatpush1.bf16.msra.mxu1 %v7484_v21  ;;  %v508_v21 = vld [vmem:[%s12509_s3 + $0x1a8] sm:$0xff]  ;;  %v507_v22 = vld [vmem:[%s12509_s3 + $0x1a0] sm:$0xff] }
 0x125   :  { %v420_v26 = vadd.f32 %v6327_v25, %v9061_v46  ;;  %v414_v27 = vpop.f32.mrb[31].mxu0  ;;  %7486 = vmatprep.subr.bf16.mxu1 %v8812_v44  ;;  %v512_v25 = vld [vmem:[%s12509_s3 + $0x1c8] sm:$0xff] }
 0x126   :  { %v7487_v28 = vpack.c.bf16 %v452_v23, %v451_v24  ;;  %v415_v29 = vadd.f32 %v9061_v46, %v414_v27  ;;  %v457_v46 = vld [vmem:[%s12509_s3 + $0x10] sm:$0xff]  ;;  %v510_v23 = vld [vmem:[%s12509_s3 + $0x1b8] sm:$0xff] }
 0x127   :  { %v454_v30 = vmax.f32 %v420_v26, 0.0  ;;  %v509_v24 = vld [vmem:[%s12509_s3 + $0x1b0] sm:$0xff]  ;;  %v511_v26 = vld [vmem:[%s12509_s3 + $0x1c0] sm:$0xff]  ;;  %v514_v27 = vld [vmem:[%s12509_s3 + $0x1d8] sm:$0xff] }
 0x128   :  { %v453_v31 = vmax.f32 %v415_v29, 0.0  ;;  %7488 = vmatpush1.bf16.msra.mxu1 %v7487_v28  ;;  %v513_v28 = vld [vmem:[%s12509_s3 + $0x1d0] sm:$0xff]  ;;  %v516_v29 = vld [vmem:[%s12509_s3 + $0x1e8] sm:$0xff] }
 0x129   :  { %7489 = vmatprep.subr.bf16.mxu1 %v8812_v44 }
 0x12a   :  { %v7490_v32 = vpack.c.bf16 %v454_v30, %v453_v31  ;;  %v1152_v30 = vld [vmem:[%s12510_s4 + $0x100] sm:$0xff] }
 0x12b   :  { %v515_v31 = vld [vmem:[%s12509_s3 + $0x1e0] sm:$0xff] }
 0x12c   :  { %7491 = vmatpush1.bf16.msra.mxu1 %v7490_v32  ;;  %v1153_v32 = vld [vmem:[%s12510_s4 + $0x108] sm:$0xff] }
 0x12f   :  { %664 = vmatmul.mubr.f32.vlgmr.msra.gmra.mrb[0].mxu1 %v455_v33  ;;  %v518_v33 = vld [vmem:[%s12509_s3 + $0x1f8] sm:$0xff] }
 0x130   :  { %668 = vmatprep.mubr.f32.mxu1 %v458_v34  ;;  %v7492_v34 = vpack.c.bf16 %v1153_v32, %v1152_v30  ;;  %v551_v30 = vld [vmem:[%s12509_s3 + $0x300] sm:$0xff]  ;;  %v553_v32 = vld [vmem:[%s12509_s3 + $0x310] sm:$0xff] }
 0x132   :  { %7493 = vmatprep.subr.bf16.mxu0 %v7492_v34 }
 0x133   :  { %669 = vmatmul.mubr.f32.gmra.mrb[2].mxu1 %v457_v46  ;;  %v1154_v46 = vld [vmem:[%s12510_s4 + $0x110] sm:$0xff]  ;;  %7495 = vmatpush3.bf16.msra.mxu0 %v7492_v34  ;;  %v555_v34 = vld [vmem:[%s12509_s3 + $0x320] sm:$0xff] }
 0x134   :  { %673 = vmatprep.mubr.f32.mxu1 %v460_v35  ;;  %v517_v35 = vld [vmem:[%s12509_s3 + $0x1f0] sm:$0xff] }
 0x137   :  { %674 = vmatmul.mubr.f32.gmra.mrb[4].mxu1 %v459_v36  ;;  %v1155_v36 = vld [vmem:[%s12510_s4 + $0x118] sm:$0xff] }
 0x138   :  { %678 = vmatprep.mubr.f32.mxu1 %v462_v37  ;;  %v520_v37 = vld [vmem:[%s12509_s3 + $0x208] sm:$0xff] }
 0x13b   :  { %679 = vmatmul.mubr.f32.gmra.mrb[6].mxu1 %v461_v38  ;;  %v7496_v38 = vpack.c.bf16 %v1155_v36, %v1154_v46  ;;  %v558_v46 = vld [vmem:[%s12509_s3 + $0x338] sm:$0xff]  ;;  %v560_v36 = vld [vmem:[%s12509_s3 + $0x348] sm:$0xff] }
 0x13c   :  { %683 = vmatprep.mubr.f32.mxu1 %v464_v39  ;;  %v1156_v39 = vld [vmem:[%s12510_s4 + $0x120] sm:$0xff] }
 0x13d   :  { %7497 = vmatprep.subr.bf16.mxu0 %v7496_v38 }
 0x13e   :  { %7499 = vmatpush3.bf16.msra.mxu0 %v7496_v38  ;;  %v562_v38 = vld [vmem:[%s12509_s3 + $0x358] sm:$0xff] }
 0x13f   :  { %684 = vmatmul.mubr.f32.gmra.mrb[8].mxu1 %v463_v40  ;;  %v519_v40 = vld [vmem:[%s12509_s3 + $0x200] sm:$0xff] }
 0x140   :  { %688 = vmatprep.mubr.f32.mxu1 %v466_v41  ;;  %v1157_v41 = vld [vmem:[%s12510_s4 + $0x128] sm:$0xff] }
 0x143   :  { %689 = vmatmul.mubr.f32.gmra.mrb[10].mxu1 %v465_v42  ;;  %v522_v42 = vld [vmem:[%s12509_s3 + $0x218] sm:$0xff] }
 0x144   :  { %693 = vmatprep.mubr.f32.mxu1 %v468_v43  ;;  %v7500_v43 = vpack.c.bf16 %v1157_v41, %v1156_v39  ;;  %v561_v39 = vld [vmem:[%s12509_s3 + $0x350] sm:$0xff] }
 0x146   :  { %7501 = vmatprep.subr.bf16.mxu0 %v7500_v43 }
 0x147   :  { %694 = vmatmul.mubr.f32.gmra.mrb[12].mxu1 %v467_v45  ;;  %v1158_v45 = vld [vmem:[%s12510_s4 + $0x130] sm:$0xff]  ;;  %7503 = vmatpush3.bf16.msra.mxu0 %v7500_v43  ;;  %v563_v43 = vld [vmem:[%s12509_s3 + $0x360] sm:$0xff] }
 0x148   :  { %698 = vmatprep.mubr.f32.mxu1 %v470_v47  ;;  %v521_v47 = vld [vmem:[%s12509_s3 + $0x210] sm:$0xff] }
 0x14b   :  { %699 = vmatmul.mubr.f32.gmra.mrb[14].mxu1 %v469_v48  ;;  %v1159_v48 = vld [vmem:[%s12510_s4 + $0x138] sm:$0xff] }
 0x14c   :  { %703 = vmatprep.mubr.f32.mxu1 %v472_v49  ;;  %v524_v49 = vld [vmem:[%s12509_s3 + $0x228] sm:$0xff] }
 0x14f   :  { %704 = vmatmul.mubr.f32.gmra.mrb[16].mxu1 %v471_v50  ;;  %v7504_v50 = vpack.c.bf16 %v1159_v48, %v1158_v45  ;;  %v566_v45 = vld [vmem:[%s12509_s3 + $0x378] sm:$0xff] }
 0x150   :  { %708 = vmatprep.mubr.f32.mxu1 %v474_v51  ;;  %v1160_v51 = vld [vmem:[%s12510_s4 + $0x140] sm:$0xff] }
 0x151   :  { %7505 = vmatprep.subr.bf16.mxu0 %v7504_v50 }
 0x152   :  { %7507 = vmatpush3.bf16.msra.mxu0 %v7504_v50  ;;  %v568_v50 = vld [vmem:[%s12509_s3 + $0x388] sm:$0xff] }
 0x153   :  { %709 = vmatmul.mubr.f32.gmra.mrb[18].mxu1 %v473_v52  ;;  %v523_v52 = vld [vmem:[%s12509_s3 + $0x220] sm:$0xff] }
 0x154   :  { %713 = vmatprep.mubr.f32.mxu1 %v476_v53  ;;  %v1161_v53 = vld [vmem:[%s12510_s4 + $0x148] sm:$0xff] }
 0x157   :  { %714 = vmatmul.mubr.f32.gmra.mrb[20].mxu1 %v475_v54  ;;  %v526_v54 = vld [vmem:[%s12509_s3 + $0x238] sm:$0xff] }
 0x158   :  { %718 = vmatprep.mubr.f32.mxu1 %v478_v55  ;;  %v7508_v55 = vpack.c.bf16 %v1161_v53, %v1160_v51  ;;  %v567_v53 = vld [vmem:[%s12509_s3 + $0x380] sm:$0xff] }
 0x15a   :  { %7509 = vmatprep.subr.bf16.mxu0 %v7508_v55 }
 0x15b   :  { %719 = vmatmul.mubr.f32.gmra.mrb[22].mxu1 %v477_v56  ;;  %v1162_v56 = vld [vmem:[%s12510_s4 + $0x150] sm:$0xff]  ;;  %7511 = vmatpush3.bf16.msra.mxu0 %v7508_v55 }
 0x15c   :  { %723 = vmatprep.mubr.f32.mxu1 %v480_v57  ;;  %v525_v57 = vld [vmem:[%s12509_s3 + $0x230] sm:$0xff] }
 0x15f   :  { %724 = vmatmul.mubr.f32.gmra.mrb[24].mxu1 %v479_v58  ;;  %v1163_v58 = vld [vmem:[%s12510_s4 + $0x158] sm:$0xff] }
 0x160   :  { %728 = vmatprep.mubr.f32.mxu1 %v482_v59  ;;  %v528_v59 = vld [vmem:[%s12509_s3 + $0x248] sm:$0xff] }
 0x163   :  { %729 = vmatmul.mubr.f32.gmra.mrb[26].mxu1 %v481_v60  ;;  %v7512_v60 = vpack.c.bf16 %v1163_v58, %v1162_v56  ;;  %v572_v58 = vld [vmem:[%s12509_s3 + $0x3a8] sm:$0xff] }
 0x164   :  { %733 = vmatprep.mubr.f32.mxu1 %v484_v61  ;;  %v1164_v61 = vld [vmem:[%s12510_s4 + $0x160] sm:$0xff] }
 0x165   :  { %7513 = vmatprep.subr.bf16.mxu0 %v7512_v60 }
 0x166   :  { %7515 = vmatpush3.bf16.msra.mxu0 %v7512_v60 }
 0x167   :  { %734 = vmatmul.mubr.f32.gmra.mrb[28].mxu1 %v483_v62  ;;  %v527_v62 = vld [vmem:[%s12509_s3 + $0x240] sm:$0xff] }
 0x168   :  { %738 = vmatprep.mubr.f32.mxu1 %v486_v63  ;;  %v1165_v63 = vld [vmem:[%s12510_s4 + $0x168] sm:$0xff] }
 0x16b   :  { %739 = vmatmul.mubr.f32.gmra.mrb[30].mxu1 %v485_v0  ;;  %v530_v0 = vld [vmem:[%s12509_s3 + $0x258] sm:$0xff] }
 0x16c   :  { %743 = vmatprep.mubr.f32.mxu1 %v488_v1  ;;  %v7516_v1 = vpack.c.bf16 %v1165_v63, %v1164_v61  ;;  %v571_v61 = vld [vmem:[%s12509_s3 + $0x3a0] sm:$0xff] }
 0x16e   :  { %7517 = vmatprep.subr.bf16.mxu0 %v7516_v1 }
 0x16f   :  { %744 = vmatmul.mubr.f32.gmra.mrb[32].mxu1 %v487_v2  ;;  %v1166_v2 = vld [vmem:[%s12510_s4 + $0x170] sm:$0xff]  ;;  %7519 = vmatpush3.bf16.msra.mxu0 %v7516_v1 }
 0x170   :  { %748 = vmatprep.mubr.f32.mxu1 %v490_v3  ;;  %v529_v3 = vld [vmem:[%s12509_s3 + $0x250] sm:$0xff] }
 0x171   :  { %v573_v1 = vld [vmem:[%s12509_s3 + $0x3b0] sm:$0xff] }
 0x173   :  { %749 = vmatmul.mubr.f32.gmra.mrb[34].mxu1 %v489_v4  ;;  %v1167_v4 = vld [vmem:[%s12510_s4 + $0x178] sm:$0xff] }
 0x174   :  { %753 = vmatprep.mubr.f32.mxu1 %v492_v5  ;;  %v532_v5 = vld [vmem:[%s12509_s3 + $0x268] sm:$0xff] }
 0x177   :  { %754 = vmatmul.mubr.f32.gmra.mrb[36].mxu1 %v491_v6  ;;  %v7520_v6 = vpack.c.bf16 %v1167_v4, %v1166_v2  ;;  %v576_v2 = vld [vmem:[%s12509_s3 + $0x3c8] sm:$0xff] }
 0x178   :  { %758 = vmatprep.mubr.f32.mxu1 %v494_v7  ;;  %v1104_v7 = vld [vmem:[%s12510_s4] sm:$0xff] }
 0x179   :  { %7521 = vmatprep.subr.bf16.mxu0 %v7520_v6 }
 0x17a   :  { %7523 = vmatpush3.bf16.msra.mxu0 %v7520_v6  ;;  %v578_v6 = vld [vmem:[%s12509_s3 + $0x3d8] sm:$0xff] }
 0x17b   :  { %759 = vmatmul.mubr.f32.gmra.mrb[38].mxu1 %v493_v8  ;;  %v531_v8 = vld [vmem:[%s12509_s3 + $0x260] sm:$0xff] }
 0x17c   :  { %763 = vmatprep.mubr.f32.mxu1 %v496_v9  ;;  %v1105_v9 = vld [vmem:[%s12510_s4 + $0x8] sm:$0xff] }
 0x17f   :  { %764 = vmatmul.mubr.f32.gmra.mrb[40].mxu1 %v495_v10  ;;  %v534_v10 = vld [vmem:[%s12509_s3 + $0x278] sm:$0xff] }
 0x180   :  { %768 = vmatprep.mubr.f32.mxu1 %v498_v11  ;;  %v9398_v11 = vpack.c.bf16 %v1105_v9, %v1104_v7  ;;  %v577_v9 = vld [vmem:[%s12509_s3 + $0x3d0] sm:$0xff] }
 0x182   :  { %7525 = vmatprep.subr.bf16.mxu0 %v9398_v11 }
 0x183   :  { %769 = vmatmul.mubr.f32.gmra.mrb[42].mxu1 %v497_v12  ;;  %v533_v12 = vld [vmem:[%s12509_s3 + $0x270] sm:$0xff] }
 0x184   :  { %773 = vmatprep.mubr.f32.mxu1 %v500_v13  ;;  %v536_v13 = vld [vmem:[%s12509_s3 + $0x288] sm:$0xff] }
 0x187   :  { %774 = vmatmul.mubr.f32.gmra.mrb[44].mxu1 %v499_v14  ;;  %v535_v14 = vld [vmem:[%s12509_s3 + $0x280] sm:$0xff] }
 0x188   :  { %778 = vmatprep.mubr.f32.mxu1 %v502_v15  ;;  %v538_v15 = vld [vmem:[%s12509_s3 + $0x298] sm:$0xff] }
 0x18b   :  { %779 = vmatmul.mubr.f32.gmra.mrb[46].mxu1 %v501_v16  ;;  %v537_v16 = vld [vmem:[%s12509_s3 + $0x290] sm:$0xff] }
 0x18c   :  { %783 = vmatprep.mubr.f32.mxu1 %v504_v17  ;;  %v540_v17 = vld [vmem:[%s12509_s3 + $0x2a8] sm:$0xff] }
 0x18f   :  { %784 = vmatmul.mubr.f32.gmra.mrb[48].mxu1 %v503_v18  ;;  %v539_v18 = vld [vmem:[%s12509_s3 + $0x2a0] sm:$0xff] }
 0x190   :  { %788 = vmatprep.mubr.f32.mxu1 %v506_v19  ;;  %v542_v19 = vld [vmem:[%s12509_s3 + $0x2b8] sm:$0xff] }
 0x193   :  { %789 = vmatmul.mubr.f32.gmra.mrb[50].mxu1 %v505_v20  ;;  %v541_v20 = vld [vmem:[%s12509_s3 + $0x2b0] sm:$0xff] }
 0x194   :  { %793 = vmatprep.mubr.f32.mxu1 %v508_v21  ;;  %v544_v21 = vld [vmem:[%s12509_s3 + $0x2c8] sm:$0xff] }
 0x197   :  { %794 = vmatmul.mubr.f32.gmra.mrb[52].mxu1 %v507_v22  ;;  %v543_v22 = vld [vmem:[%s12509_s3 + $0x2c0] sm:$0xff] }
 0x198   :  { %798 = vmatprep.mubr.f32.mxu1 %v510_v23  ;;  %v546_v23 = vld [vmem:[%s12509_s3 + $0x2d8] sm:$0xff] }
 0x19b   :  { %799 = vmatmul.mubr.f32.gmra.mrb[54].mxu1 %v509_v24  ;;  %v545_v24 = vld [vmem:[%s12509_s3 + $0x2d0] sm:$0xff] }
 0x19c   :  { %803 = vmatprep.mubr.f32.mxu1 %v512_v25  ;;  %v548_v25 = vld [vmem:[%s12509_s3 + $0x2e8] sm:$0xff] }
 0x19f   :  { %804 = vmatmul.mubr.f32.gmra.mrb[56].mxu1 %v511_v26  ;;  %v547_v26 = vld [vmem:[%s12509_s3 + $0x2e0] sm:$0xff] }
 0x1a0   :  { %808 = vmatprep.mubr.f32.mxu1 %v514_v27  ;;  %v550_v27 = vld [vmem:[%s12509_s3 + $0x2f8] sm:$0xff] }
 0x1a3   :  { %809 = vmatmul.mubr.f32.gmra.mrb[58].mxu1 %v513_v28  ;;  %v549_v28 = vld [vmem:[%s12509_s3 + $0x2f0] sm:$0xff] }
 0x1a4   :  { %813 = vmatprep.mubr.f32.mxu1 %v516_v29  ;;  %v552_v29 = vld [vmem:[%s12509_s3 + $0x308] sm:$0xff] }
 0x1a7   :  { %814 = vmatmul.mubr.f32.gmra.mrb[60].mxu1 %v515_v31  ;;  %v554_v31 = vld [vmem:[%s12509_s3 + $0x318] sm:$0xff] }
 0x1a8   :  { %818 = vmatprep.mubr.f32.mxu1 %v518_v33  ;;  %v556_v33 = vld [vmem:[%s12509_s3 + $0x328] sm:$0xff] }
 0x1ab   :  { %819 = vmatmul.mubr.f32.gmra.mrb[62].mxu1 %v517_v35  ;;  %v557_v35 = vld [vmem:[%s12509_s3 + $0x330] sm:$0xff] }
 0x1ac   :  { %823 = vmatprep.mubr.f32.mxu1 %v520_v37  ;;  %v559_v37 = vld [vmem:[%s12509_s3 + $0x340] sm:$0xff] }
 0x1af   :  { %824 = vmatmul.mubr.f32.gmra.mrb[64].mxu1 %v519_v40  ;;  %v564_v40 = vld [vmem:[%s12509_s3 + $0x368] sm:$0xff] }
 0x1b0   :  { %828 = vmatprep.mubr.f32.mxu1 %v522_v42 }
 0x1b3   :  { %829 = vmatmul.mubr.f32.gmra.mrb[66].mxu1 %v521_v47 }
 0x1b4   :  { %833 = vmatprep.mubr.f32.mxu1 %v524_v49  ;;  %v565_v49 = vld [vmem:[%s12509_s3 + $0x370] sm:$0xff] }
 0x1b7   :  { %834 = vmatmul.mubr.f32.gmra.mrb[68].mxu1 %v523_v52 }
 0x1b8   :  { %838 = vmatprep.mubr.f32.mxu1 %v526_v54  ;;  %v570_v54 = vld [vmem:[%s12509_s3 + $0x398] sm:$0xff] }
 0x1bb   :  { %839 = vmatmul.mubr.f32.gmra.mrb[70].mxu1 %v525_v57  ;;  %v569_v57 = vld [vmem:[%s12509_s3 + $0x390] sm:$0xff] }
 0x1bc   :  { %843 = vmatprep.mubr.f32.mxu1 %v528_v59 }
 0x1bf   :  { %844 = vmatmul.mubr.f32.gmra.mrb[72].mxu1 %v527_v62  ;;  %v574_v62 = vld [vmem:[%s12509_s3 + $0x3b8] sm:$0xff] }
 0x1c0   :  { %848 = vmatprep.mubr.f32.mxu1 %v530_v0 }
 0x1c3   :  { %849 = vmatmul.mubr.f32.gmra.mrb[74].mxu1 %v529_v3 }
 0x1c4   :  { %853 = vmatprep.mubr.f32.mxu1 %v532_v5  ;;  %v575_v5 = vld [vmem:[%s12509_s3 + $0x3c0] sm:$0xff] }
 0x1c7   :  { %854 = vmatmul.mubr.f32.gmra.mrb[76].mxu1 %v531_v8 }
 0x1c8   :  { %858 = vmatprep.mubr.f32.mxu1 %v534_v10  ;;  %v580_v10 = vld [vmem:[%s12509_s3 + $0x3e8] sm:$0xff] }
 0x1cb   :  { %859 = vmatmul.mubr.f32.gmra.mrb[78].mxu1 %v533_v12 }
 0x1cc   :  { %863 = vmatprep.mubr.f32.mxu1 %v536_v13 }
 0x1cf   :  { %864 = vmatmul.mubr.f32.gmra.mrb[80].mxu1 %v535_v14  ;;  %v579_v14 = vld [vmem:[%s12509_s3 + $0x3e0] sm:$0xff] }
 0x1d0   :  { %868 = vmatprep.mubr.f32.mxu1 %v538_v15  ;;  %v582_v15 = vld [vmem:[%s12509_s3 + $0x3f8] sm:$0xff] }
 0x1d3   :  { %869 = vmatmul.mubr.f32.gmra.mrb[82].mxu1 %v537_v16 }
 0x1d4   :  { %873 = vmatprep.mubr.f32.mxu1 %v540_v17 }
 0x1d7   :  { %874 = vmatmul.mubr.f32.gmra.mrb[84].mxu1 %v539_v18  ;;  %v581_v18 = vld [vmem:[%s12509_s3 + $0x3f0] sm:$0xff] }
 0x1d8   :  { %878 = vmatprep.mubr.f32.mxu1 %v542_v19  ;;  %v584_v19 = vld [vmem:[%s12509_s3 + $0x408] sm:$0xff] }
 0x1db   :  { %879 = vmatmul.mubr.f32.gmra.mrb[86].mxu1 %v541_v20 }
 0x1dc   :  { %883 = vmatprep.mubr.f32.mxu1 %v544_v21 }
 0x1df   :  { %884 = vmatmul.mubr.f32.gmra.mrb[88].mxu1 %v543_v22  ;;  %v583_v22 = vld [vmem:[%s12509_s3 + $0x400] sm:$0xff] }
 0x1e0   :  { %888 = vmatprep.mubr.f32.mxu1 %v546_v23  ;;  %v586_v23 = vld [vmem:[%s12509_s3 + $0x418] sm:$0xff] }
 0x1e3   :  { %889 = vmatmul.mubr.f32.gmra.mrb[90].mxu1 %v545_v24 }
 0x1e4   :  { %893 = vmatprep.mubr.f32.mxu1 %v548_v25 }
 0x1e7   :  { %894 = vmatmul.mubr.f32.gmra.mrb[92].mxu1 %v547_v26  ;;  %v585_v26 = vld [vmem:[%s12509_s3 + $0x410] sm:$0xff] }
 0x1e8   :  { %898 = vmatprep.mubr.f32.mxu1 %v550_v27  ;;  %v588_v27 = vld [vmem:[%s12509_s3 + $0x428] sm:$0xff] }
 0x1eb   :  { %899 = vmatmul.mubr.f32.gmra.mrb[94].mxu1 %v549_v28 }
 0x1ec   :  { %903 = vmatprep.mubr.f32.mxu1 %v552_v29 }
 0x1ef   :  { %904 = vmatmul.mubr.f32.gmra.mrb[96].mxu1 %v551_v30  ;;  %v587_v30 = vld [vmem:[%s12509_s3 + $0x420] sm:$0xff] }
 0x1f0   :  { %908 = vmatprep.mubr.f32.mxu1 %v554_v31  ;;  %v590_v31 = vld [vmem:[%s12509_s3 + $0x438] sm:$0xff] }
 0x1f3   :  { %909 = vmatmul.mubr.f32.gmra.mrb[98].mxu1 %v553_v32 }
 0x1f4   :  { %913 = vmatprep.mubr.f32.mxu1 %v556_v33 }
 0x1f7   :  { %914 = vmatmul.mubr.f32.gmra.mrb[100].mxu1 %v555_v34  ;;  %v589_v34 = vld [vmem:[%s12509_s3 + $0x430] sm:$0xff] }
 0x1f8   :  { %918 = vmatprep.mubr.f32.mxu1 %v558_v46  ;;  %v592_v46 = vld [vmem:[%s12509_s3 + $0x448] sm:$0xff] }
 0x1fb   :  { %919 = vmatmul.mubr.f32.gmra.mrb[102].mxu1 %v557_v35 }
 0x1fc   :  { %923 = vmatprep.mubr.f32.mxu1 %v560_v36 }
 0x1ff   :  { %924 = vmatmul.mubr.f32.gmra.mrb[104].mxu1 %v559_v37  ;;  %v591_v37 = vld [vmem:[%s12509_s3 + $0x440] sm:$0xff] }
 0x200   :  { %928 = vmatprep.mubr.f32.mxu1 %v562_v38  ;;  %v594_v38 = vld [vmem:[%s12509_s3 + $0x458] sm:$0xff] }
 0x202   :  { %v9491_v41 = vpop.f32.mrb[0].mxu1 }
 0x203   :  { %v667_v42 = vpop.f32.mrb[1].mxu1  ;;  %929 = vmatmul.mubr.f32.gmra.mrb[106].mxu1 %v561_v39 }
 0x204   :  { %933 = vmatprep.mubr.f32.mxu1 %v564_v40  ;;  %v593_v42 = vld [vmem:[%s12509_s3 + $0x450] sm:$0xff] }
 0x206   :  { %v9499_v47 = vpop.f32.mrb[2].mxu1 }
 0x207   :  { %v672_v48 = vpop.f32.mrb[3].mxu1  ;;  %934 = vmatmul.mubr.f32.gmra.mrb[108].mxu1 %v563_v43  ;;  %v596_v43 = vld [vmem:[%s12509_s3 + $0x468] sm:$0xff] }
 0x208   :  { %938 = vmatprep.mubr.f32.mxu1 %v566_v45  ;;  %v1106_v48 = vld [vmem:[%s12510_s4 + $0x10] sm:$0xff] }
 0x20a   :  { %v9507_v51 = vpop.f32.mrb[4].mxu1 }
 0x20b   :  { %v677_v52 = vpop.f32.mrb[5].mxu1  ;;  %939 = vmatmul.mubr.f32.gmra.mrb[110].mxu1 %v565_v49  ;;  %v1107_v49 = vld [vmem:[%s12510_s4 + $0x18] sm:$0xff] }
 0x20c   :  { %943 = vmatprep.mubr.f32.mxu1 %v568_v50  ;;  %v595_v52 = vld [vmem:[%s12509_s3 + $0x460] sm:$0xff] }
 0x20e   :  { %v9515_v55 = vpop.f32.mrb[6].mxu1 }
 0x20f   :  { %v682_v56 = vpop.f32.mrb[7].mxu1  ;;  %944 = vmatmul.mubr.f32.gmra.mrb[112].mxu1 %v567_v53  ;;  %v7528_v53 = vpack.c.bf16 %v1107_v49, %v1106_v48  ;;  %v1390_v48 = vld [vmem:[%s12510_s4 + $0x1a0] sm:$0xff] }
 0x210   :  { %948 = vmatprep.mubr.f32.mxu1 %v570_v54  ;;  %v598_v54 = vld [vmem:[%s12509_s3 + $0x478] sm:$0xff] }
 0x212   :  { %v9523_v59 = vpop.f32.mrb[8].mxu1 }
 0x213   :  { %v687_v60 = vpop.f32.mrb[9].mxu1  ;;  %949 = vmatmul.mubr.f32.gmra.mrb[114].mxu1 %v569_v57  ;;  %v1108_v57 = vld [vmem:[%s12510_s4 + $0x20] sm:$0xff] }
 0x214   :  { %953 = vmatprep.mubr.f32.mxu1 %v572_v58  ;;  %v1109_v58 = vld [vmem:[%s12510_s4 + $0x28] sm:$0xff] }
 0x216   :  { %v9531_v63 = vpop.f32.mrb[10].mxu1 }
 0x217   :  { %v692_v0 = vpop.f32.mrb[11].mxu1  ;;  %954 = vmatmul.mubr.f32.gmra.mrb[116].mxu1 %v571_v61  ;;  %v597_v61 = vld [vmem:[%s12509_s3 + $0x470] sm:$0xff] }
 0x218   :  { %958 = vmatprep.mubr.f32.mxu1 %v574_v62  ;;  %v7532_v62 = vpack.c.bf16 %v1109_v58, %v1108_v57  ;;  %v1395_v58 = vld [vmem:[%s12510_s4 + $0x1c8] sm:$0xff] }
 0x21a   :  { %v9539_v3 = vpop.f32.mrb[12].mxu1 }
 0x21b   :  { %v697_v4 = vpop.f32.mrb[13].mxu1  ;;  %959 = vmatmul.mubr.f32.gmra.mrb[118].mxu1 %v573_v1  ;;  %v1110_v1 = vld [vmem:[%s12510_s4 + $0x30] sm:$0xff] }
 0x21c   :  { %963 = vmatprep.mubr.f32.mxu1 %v576_v2  ;;  %v1111_v2 = vld [vmem:[%s12510_s4 + $0x38] sm:$0xff] }
 0x21e   :  { %v9547_v7 = vpop.f32.mrb[14].mxu1 }
 0x21f   :  { %v702_v8 = vpop.f32.mrb[15].mxu1  ;;  %964 = vmatmul.mubr.f32.gmra.mrb[120].mxu1 %v575_v5 }
 0x220   :  { %968 = vmatprep.mubr.f32.mxu1 %v578_v6  ;;  %v1112_v6 = vld [vmem:[%s12510_s4 + $0x40] sm:$0xff]  ;;  %v1113_v8 = vld [vmem:[%s12510_s4 + $0x48] sm:$0xff] }
 0x222   :  { %v9555_v12 = vpop.f32.mrb[16].mxu1 }
 0x223   :  { %v707_v13 = vpop.f32.mrb[17].mxu1  ;;  %969 = vmatmul.mubr.f32.gmra.mrb[122].mxu1 %v577_v9 }
 0x224   :  { %973 = vmatprep.mubr.f32.mxu1 %v580_v10  ;;  %v7540_v10 = vpack.c.bf16 %v1113_v8, %v1112_v6  ;;  %v1401_v6 = vld [vmem:[%s12510_s4 + $0x1f8] sm:$0xff] }
 0x226   :  { %v9563_v16 = vpop.f32.mrb[18].mxu1 }
 0x227   :  { %v712_v17 = vpop.f32.mrb[19].mxu1  ;;  %974 = vmatmul.mubr.f32.gmra.mrb[124].mxu1 %v579_v14  ;;  %v1114_v14 = vld [vmem:[%s12510_s4 + $0x50] sm:$0xff] }
 0x228   :  { %978 = vmatprep.mubr.f32.mxu1 %v582_v15  ;;  %v1115_v15 = vld [vmem:[%s12510_s4 + $0x58] sm:$0xff] }
 0x22a   :  { %v9571_v20 = vpop.f32.mrb[20].mxu1 }
 0x22b   :  { %v717_v21 = vpop.f32.mrb[21].mxu1  ;;  %979 = vmatmul.mubr.f32.gmra.mrb[126].mxu1 %v581_v18  ;;  %v7544_v18 = vpack.c.bf16 %v1115_v15, %v1114_v14  ;;  %v1129_v14 = vld [vmem:[%s12510_s4 + $0x88] sm:$0xff] }
 0x22c   :  { %983 = vmatprep.mubr.f32.mxu1 %v584_v19  ;;  %v1116_v21 = vld [vmem:[%s12510_s4 + $0x60] sm:$0xff] }
 0x22e   :  { %v9579_v24 = vpop.f32.mrb[22].mxu1 }
 0x22f   :  { %v722_v25 = vpop.f32.mrb[23].mxu1  ;;  %984 = vmatmul.mubr.f32.gmra.mrb[128].mxu1 %v583_v22  ;;  %v1117_v22 = vld [vmem:[%s12510_s4 + $0x68] sm:$0xff] }
 0x230   :  { %988 = vmatprep.mubr.f32.mxu1 %v586_v23  ;;  %v7548_v25 = vpack.c.bf16 %v1117_v22, %v1116_v21  ;;  %v1131_v21 = vld [vmem:[%s12510_s4 + $0x98] sm:$0xff] }
 0x232   :  { %v9587_v28 = vpop.f32.mrb[24].mxu1 }
 0x233   :  { %v727_v29 = vpop.f32.mrb[25].mxu1  ;;  %989 = vmatmul.mubr.f32.gmra.mrb[130].mxu1 %v585_v26 }
 0x234   :  { %993 = vmatprep.mubr.f32.mxu1 %v588_v27  ;;  %v1118_v27 = vld [vmem:[%s12510_s4 + $0x70] sm:$0xff]  ;;  %v1119_v29 = vld [vmem:[%s12510_s4 + $0x78] sm:$0xff] }
 0x236   :  { %v9595_v32 = vpop.f32.mrb[26].mxu1 }
 0x237   :  { %v732_v33 = vpop.f32.mrb[27].mxu1  ;;  %994 = vmatmul.mubr.f32.gmra.mrb[132].mxu1 %v587_v30 }
 0x238   :  { %998 = vmatprep.mubr.f32.mxu1 %v590_v31  ;;  %v7552_v31 = vpack.c.bf16 %v1119_v29, %v1118_v27  ;;  %v1133_v27 = vld [vmem:[%s12510_s4 + $0xa8] sm:$0xff] }
 0x23a   :  { %v9603_v35 = vpop.f32.mrb[28].mxu1 }
 0x23b   :  { %v737_v36 = vpop.f32.mrb[29].mxu1  ;;  %999 = vmatmul.mubr.f32.gmra.mrb[134].mxu1 %v589_v34  ;;  %v1386_v34 = vld [vmem:[%s12510_s4 + $0x180] sm:$0xff] }
 0x23c   :  { %1003 = vmatprep.mubr.f32.mxu1 %v592_v46  ;;  %v1387_v46 = vld [vmem:[%s12510_s4 + $0x188] sm:$0xff] }
 0x23e   :  { %v9611_v39 = vpop.f32.mrb[30].mxu1 }
 0x23f   :  { %v742_v40 = vpop.f32.mrb[31].mxu1  ;;  %1004 = vmatmul.mubr.f32.gmra.mrb[136].mxu1 %v591_v37  ;;  %v7556_v37 = vpack.c.bf16 %v1387_v46, %v1386_v34  ;;  %v1135_v34 = vld [vmem:[%s12510_s4 + $0xb8] sm:$0xff] }
 0x240   :  { %1008 = vmatprep.mubr.f32.mxu1 %v594_v38  ;;  %v1388_v38 = vld [vmem:[%s12510_s4 + $0x190] sm:$0xff]  ;;  %v1389_v40 = vld [vmem:[%s12510_s4 + $0x198] sm:$0xff] }
 0x242   :  { %v745_v45 = vpop.f32.mrb[32].mxu1 }
 0x243   :  { %v747_v50 = vpop.f32.mrb[33].mxu1  ;;  %6360 = vmatprep.mubr.f32.mxu0 %v745_v45  ;;  %1009 = vmatmul.mubr.f32.gmra.mrb[138].mxu1 %v593_v42  ;;  %v7560_v45 = vpack.c.bf16 %v1389_v40, %v1388_v38  ;;  %v1136_v38 = vld [vmem:[%s12510_s4 + $0xc0] sm:$0xff]  ;;  %v1137_v40 = vld [vmem:[%s12510_s4 + $0xc8] sm:$0xff] }
 0x244   :  { %1013 = vmatprep.mubr.f32.mxu1 %v596_v43 }
 0x246   :  { %v750_v56 = vpop.f32.mrb[34].mxu1 }
 0x247   :  { %v752_v60 = vpop.f32.mrb[35].mxu1  ;;  %6361 = vmatmul.mubr.f32.vlgmr.msra.gmra.mrb[32].mxu0 %v750_v56  ;;  %1014 = vmatmul.mubr.f32.gmra.mrb[140].mxu1 %v595_v52 }
 0x248   :  { %7527 = vmatpush3.bf16.msra.mxu0 %v9398_v11  ;;  %1018 = vmatprep.mubr.f32.mxu1 %v598_v54  ;;  %v7536_v11 = vpack.c.bf16 %v1111_v2, %v1110_v1  ;;  %v1393_v54 = vld [vmem:[%s12510_s4 + $0x1b8] sm:$0xff]  ;;  %v1399_v2 = vld [vmem:[%s12510_s4 + $0x1e8] sm:$0xff] }
 0x249   :  { %7529 = vmatprep.subr.bf16.mxu0 %v7528_v53 }
 0x24a   :  { %v755_v0 = vpop.f32.mrb[36].mxu1 }
 0x24b   :  { %v757_v4 = vpop.f32.mrb[37].mxu1  ;;  %6363 = vmatprep.mubr.f32.mxu0 %v755_v0  ;;  %1019 = vmatmul.mubr.f32.gmra.mrb[142].mxu1 %v597_v61 }
 0x24c   :  { %7531 = vmatpush3.bf16.msra.mxu0 %v7528_v53  ;;  %v1392_v53 = vld [vmem:[%s12510_s4 + $0x1b0] sm:$0xff] }
 0x24d   :  { %7533 = vmatprep.subr.bf16.mxu0 %v7532_v62 }
 0x24e   :  { %v760_v5 = vpop.f32.mrb[38].mxu1 }
 0x24f   :  { %v762_v9 = vpop.f32.mrb[39].mxu1  ;;  %6364 = vmatmul.mubr.f32.gmra.mrb[34].mxu0 %v760_v5 }
 0x250   :  { %7535 = vmatpush3.bf16.msra.mxu0 %v7532_v62  ;;  %v1397_v62 = vld [vmem:[%s12510_s4 + $0x1d8] sm:$0xff] }
 0x251   :  { %7537 = vmatprep.subr.bf16.mxu0 %v7536_v11 }
 0x252   :  { %v765_v13 = vpop.f32.mrb[40].mxu1 }
 0x253   :  { %v767_v17 = vpop.f32.mrb[41].mxu1  ;;  %6366 = vmatprep.mubr.f32.mxu0 %v765_v13  ;;  %v1128_v13 = vld [vmem:[%s12510_s4 + $0x80] sm:$0xff] }
 0x254   :  { %7539 = vmatpush3.bf16.msra.mxu0 %v7536_v11 }
 0x255   :  { %7541 = vmatprep.subr.bf16.mxu0 %v7540_v10 }
 0x256   :  { %v770_v19 = vpop.f32.mrb[42].mxu1 }
 0x257   :  { %v772_v23 = vpop.f32.mrb[43].mxu1  ;;  %6367 = vmatmul.mubr.f32.gmra.mrb[36].mxu0 %v770_v19  ;;  %v1130_v19 = vld [vmem:[%s12510_s4 + $0x90] sm:$0xff] }
 0x258   :  { %7543 = vmatpush3.bf16.msra.mxu0 %v7540_v10 }
 0x259   :  { %7545 = vmatprep.subr.bf16.mxu0 %v7544_v18 }
 0x25a   :  { %v775_v26 = vpop.f32.mrb[44].mxu1 }
 0x25b   :  { %v777_v30 = vpop.f32.mrb[45].mxu1  ;;  %6369 = vmatprep.mubr.f32.mxu0 %v775_v26  ;;  %v1132_v26 = vld [vmem:[%s12510_s4 + $0xa0] sm:$0xff] }
 0x25c   :  { %7547 = vmatpush3.bf16.msra.mxu0 %v7544_v18  ;;  %v7588_v18 = vpack.c.bf16 %v1129_v14, %v1128_v13  ;;  %v1627_v13 = vld [vmem:[%s12510_s4 + $0x238] sm:$0xff] }
 0x25d   :  { %7549 = vmatprep.subr.bf16.mxu0 %v7548_v25 }
 0x25e   :  { %v780_v33 = vpop.f32.mrb[46].mxu1 }
 0x25f   :  { %6370 = vmatmul.mubr.f32.gmra.mrb[38].mxu0 %v780_v33  ;;  %v782_v36 = vpop.f32.mrb[47].mxu1  ;;  %v1134_v33 = vld [vmem:[%s12510_s4 + $0xb0] sm:$0xff] }
 0x260   :  { %7551 = vmatpush3.bf16.msra.mxu0 %v7548_v25  ;;  %6404 = vmatprep.mubr.f32.mxu0 %v9491_v41  ;;  %v1391_v41 = vld [vmem:[%s12510_s4 + $0x1a8] sm:$0xff]  ;;  %v7592_v25 = vpack.c.bf16 %v1131_v21, %v1130_v19  ;;  %v1631_v21 = vld [vmem:[%s12510_s4 + $0x258] sm:$0xff] }
 0x261   :  { %7553 = vmatprep.subr.bf16.mxu0 %v7552_v31  ;;  %v7564_v52 = vpack.c.bf16 %v1391_v41, %v1390_v48  ;;  %v1138_v48 = vld [vmem:[%s12510_s4 + $0xd0] sm:$0xff]  ;;  %v1139_v41 = vld [vmem:[%s12510_s4 + $0xd8] sm:$0xff] }
 0x262   :  { %v785_v42 = vpop.f32.mrb[48].mxu1 }
 0x263   :  { %v787_v43 = vpop.f32.mrb[49].mxu1 }
 0x264   :  { %7555 = vmatpush3.bf16.msra.mxu0 %v7552_v31  ;;  %v7596_v31 = vpack.c.bf16 %v1133_v27, %v1132_v26  ;;  %v1633_v26 = vld [vmem:[%s12510_s4 + $0x268] sm:$0xff] }
 0x265   :  { %7557 = vmatprep.subr.bf16.mxu0 %v7556_v37 }
 0x266   :  { %v9690_v49 = vpop.f32.mrb[50].mxu1 }
 0x267   :  { %6405 = vmatmul.mubr.f32.vlgmr.msra.gmra.mrb[32].mxu0 %v9499_v47  ;;  %v792_v50 = vpop.f32.mrb[51].mxu1  ;;  %v7568_v47 = vpack.c.bf16 %v1393_v54, %v1392_v53  ;;  %v1140_v53 = vld [vmem:[%s12510_s4 + $0xe0] sm:$0xff]  ;;  %v1141_v54 = vld [vmem:[%s12510_s4 + $0xe8] sm:$0xff] }
 0x268   :  { %6407 = vmatprep.mubr.f32.mxu0 %v9507_v51  ;;  %7559 = vmatpush3.bf16.msra.mxu0 %v7556_v37  ;;  %v1394_v51 = vld [vmem:[%s12510_s4 + $0x1c0] sm:$0xff]  ;;  %v7600_v37 = vpack.c.bf16 %v1135_v34, %v1134_v33 }
 0x269   :  { %7561 = vmatprep.subr.bf16.mxu0 %v7560_v45 }
 0x26a   :  { %v795_v56 = vpop.f32.mrb[52].mxu1 }
 0x26b   :  { %6408 = vmatmul.mubr.f32.gmra.mrb[34].mxu0 %v9515_v55  ;;  %v797_v57 = vpop.f32.mrb[53].mxu1  ;;  %v7572_v55 = vpack.c.bf16 %v1395_v58, %v1394_v51  ;;  %v1143_v51 = vld [vmem:[%s12510_s4 + $0xf8] sm:$0xff] }
 0x26c   :  { %6410 = vmatprep.mubr.f32.mxu0 %v9523_v59  ;;  %7563 = vmatpush3.bf16.msra.mxu0 %v7560_v45  ;;  %v1396_v59 = vld [vmem:[%s12510_s4 + $0x1d0] sm:$0xff]  ;;  %v7604_v45 = vpack.c.bf16 %v1137_v40, %v1136_v38  ;;  %v1758_v38 = vld [vmem:[%s12510_s4 + $0x288] sm:$0xff] }
 0x26d   :  { %7565 = vmatprep.subr.bf16.mxu0 %v7564_v52 }
 0x26e   :  { %v800_v60 = vpop.f32.mrb[54].mxu1 }
 0x26f   :  { %6411 = vmatmul.mubr.f32.gmra.mrb[36].mxu0 %v9531_v63  ;;  %v802_v61 = vpop.f32.mrb[55].mxu1  ;;  %v7576_v63 = vpack.c.bf16 %v1397_v62, %v1396_v59  ;;  %v1621_v59 = vld [vmem:[%s12510_s4 + $0x208] sm:$0xff] }
 0x270   :  { %6413 = vmatprep.mubr.f32.mxu0 %v9539_v3  ;;  %7567 = vmatpush3.bf16.msra.mxu0 %v7564_v52  ;;  %v1398_v3 = vld [vmem:[%s12510_s4 + $0x1e0] sm:$0xff]  ;;  %v7608_v52 = vpack.c.bf16 %v1139_v41, %v1138_v48  ;;  %v1759_v48 = vld [vmem:[%s12510_s4 + $0x290] sm:$0xff]  ;;  %v1760_v41 = vld [vmem:[%s12510_s4 + $0x298] sm:$0xff] }
 0x271   :  { %7569 = vmatprep.subr.bf16.mxu0 %v7568_v47  ;;  %v7580_v5 = vpack.c.bf16 %v1399_v2, %v1398_v3  ;;  %v1623_v3 = vld [vmem:[%s12510_s4 + $0x218] sm:$0xff] }
 0x272   :  { %v805_v0 = vpop.f32.mrb[56].mxu1 }
 0x273   :  { %6414 = vmatmul.mubr.f32.gmra.mrb[38].mxu0 %v9547_v7  ;;  %v807_v1 = vpop.f32.mrb[57].mxu1  ;;  %v1400_v7 = vld [vmem:[%s12510_s4 + $0x1f0] sm:$0xff] }
 0x274   :  { %7571 = vmatpush3.bf16.msra.mxu0 %v7568_v47  ;;  %6448 = vmatprep.mubr.f32.mxu0 %v785_v42  ;;  %v7584_v10 = vpack.c.bf16 %v1401_v6, %v1400_v7  ;;  %v7612_v47 = vpack.c.bf16 %v1141_v54, %v1140_v53  ;;  %v1625_v7 = vld [vmem:[%s12510_s4 + $0x228] sm:$0xff]  ;;  %v7656_v53 = vpack.c.bf16 %v1760_v41, %v1759_v48  ;;  %v1761_v54 = vld [vmem:[%s12510_s4 + $0x2a0] sm:$0xff] }
 0x275   :  { %7573 = vmatprep.subr.bf16.mxu0 %v7572_v55  ;;  %v1903_v41 = vld [vmem:[%s12510_s4 + $0x348] sm:$0xff] }
 0x276   :  { %v810_v4 = vpop.f32.mrb[58].mxu1 }
 0x277   :  { %v812_v11 = vpop.f32.mrb[59].mxu1 }
 0x278   :  { %7575 = vmatpush3.bf16.msra.mxu0 %v7572_v55  ;;  %v1620_v55 = vld [vmem:[%s12510_s4 + $0x200] sm:$0xff] }
 0x279   :  { %7577 = vmatprep.subr.bf16.mxu0 %v7576_v63  ;;  %v7620_v1 = vpack.c.bf16 %v1621_v59, %v1620_v55 }
 0x27a   :  { %v815_v8 = vpop.f32.mrb[60].mxu1 }
 0x27b   :  { %v817_v9 = vpop.f32.mrb[61].mxu1 }
 0x27c   :  { %7579 = vmatpush3.bf16.msra.mxu0 %v7576_v63  ;;  %v1622_v63 = vld [vmem:[%s12510_s4 + $0x210] sm:$0xff] }
 0x27d   :  { %7581 = vmatprep.subr.bf16.mxu0 %v7580_v5  ;;  %v7624_v11 = vpack.c.bf16 %v1623_v3, %v1622_v63  ;;  %v1768_v3 = vld [vmem:[%s12510_s4 + $0x2d8] sm:$0xff] }
 0x27e   :  { %v820_v15 = vpop.f32.mrb[62].mxu1 }
 0x27f   :  { %v822_v17 = vpop.f32.mrb[63].mxu1 }
 0x280   :  { %7583 = vmatpush3.bf16.msra.mxu0 %v7580_v5  ;;  %v1624_v5 = vld [vmem:[%s12510_s4 + $0x220] sm:$0xff]  ;;  %v1629_v17 = vld [vmem:[%s12510_s4 + $0x248] sm:$0xff] }
 0x281   :  { %7585 = vmatprep.subr.bf16.mxu0 %v7584_v10  ;;  %v7628_v9 = vpack.c.bf16 %v1625_v7, %v1624_v5 }
 0x282   :  { %v9741_v22 = vpop.f32.mrb[64].mxu1 }
 0x283   :  { %v827_v23 = vpop.f32.mrb[65].mxu1 }
 0x284   :  { %7587 = vmatpush3.bf16.msra.mxu0 %v7584_v10  ;;  %v1626_v10 = vld [vmem:[%s12510_s4 + $0x230] sm:$0xff] }
 0x285   :  { %7589 = vmatprep.subr.bf16.mxu0 %v7588_v18 }
 0x286   :  { %v9749_v29 = vpop.f32.mrb[66].mxu1 }
 0x287   :  { %6449 = vmatmul.mubr.f32.vlgmr.msra.gmra.mrb[32].mxu0 %v9690_v49  ;;  %v832_v30 = vpop.f32.mrb[67].mxu1 }
 0x288   :  { %7591 = vmatpush3.bf16.msra.mxu0 %v7588_v18  ;;  %6451 = vmatprep.mubr.f32.mxu0 %v795_v56 }
 0x289   :  { %7593 = vmatprep.subr.bf16.mxu0 %v7592_v25 }
 0x28a   :  { %v9758_v46 = vpop.f32.mrb[68].mxu1 }
 0x28b   :  { %6452 = vmatmul.mubr.f32.gmra.mrb[34].mxu0 %v800_v60  ;;  %v837_v36 = vpop.f32.mrb[69].mxu1 }
 0x28c   :  { %7595 = vmatpush3.bf16.msra.mxu0 %v7592_v25  ;;  %6454 = vmatprep.mubr.f32.mxu0 %v805_v0 }
 0x28d   :  { %7597 = vmatprep.subr.bf16.mxu0 %v7596_v31 }
 0x28e   :  { %v9766_v42 = vpop.f32.mrb[70].mxu1 }
 0x28f   :  { %6455 = vmatmul.mubr.f32.gmra.mrb[36].mxu0 %v810_v4  ;;  %v842_v43 = vpop.f32.mrb[71].mxu1 }
 0x290   :  { %7599 = vmatpush3.bf16.msra.mxu0 %v7596_v31  ;;  %6457 = vmatprep.mubr.f32.mxu0 %v815_v8  ;;  %v1635_v31 = vld [vmem:[%s12510_s4 + $0x278] sm:$0xff] }
 0x291   :  { %7601 = vmatprep.subr.bf16.mxu0 %v7600_v37 }
 0x292   :  { %v9774_v49 = vpop.f32.mrb[72].mxu1 }
 0x293   :  { %6458 = vmatmul.mubr.f32.gmra.mrb[38].mxu0 %v820_v15  ;;  %v847_v50 = vpop.f32.mrb[73].mxu1 }
 0x294   :  { %7603 = vmatpush3.bf16.msra.mxu0 %v7600_v37  ;;  %6492 = vmatprep.mubr.f32.mxu0 %v9555_v12  ;;  %v1142_v12 = vld [vmem:[%s12510_s4 + $0xf0] sm:$0xff]  ;;  %v1757_v37 = vld [vmem:[%s12510_s4 + $0x280] sm:$0xff] }
 0x295   :  { %7605 = vmatprep.subr.bf16.mxu0 %v7604_v45  ;;  %v7616_v61 = vpack.c.bf16 %v1143_v51, %v1142_v12 }
 0x296   :  { %v9783_v56 = vpop.f32.mrb[74].mxu1 }
 0x297   :  { %v852_v57 = vpop.f32.mrb[75].mxu1 }
 0x298   :  { %7607 = vmatpush3.bf16.msra.mxu0 %v7604_v45  ;;  %v7652_v45 = vpack.c.bf16 %v1758_v38, %v1757_v37  ;;  %v1762_v57 = vld [vmem:[%s12510_s4 + $0x2a8] sm:$0xff]  ;;  %v1900_v38 = vld [vmem:[%s12510_s4 + $0x330] sm:$0xff] }
 0x299   :  { %7609 = vmatprep.subr.bf16.mxu0 %v7608_v52  ;;  %v7660_v51 = vpack.c.bf16 %v1762_v57, %v1761_v54  ;;  %v1905_v54 = vld [vmem:[%s12510_s4 + $0x358] sm:$0xff] }
 0x29a   :  { %v9791_v58 = vpop.f32.mrb[76].mxu1 }
 0x29b   :  { %v857_v60 = vpop.f32.mrb[77].mxu1 }
 0x29c   :  { %7611 = vmatpush3.bf16.msra.mxu0 %v7608_v52  ;;  %v1763_v60 = vld [vmem:[%s12510_s4 + $0x2b0] sm:$0xff] }
 0x29d   :  { %7613 = vmatprep.subr.bf16.mxu0 %v7612_v47 }
 0x29e   :  { %v9799_v62 = vpop.f32.mrb[78].mxu1 }
 0x29f   :  { %v862_v0 = vpop.f32.mrb[79].mxu1 }
 0x2a0   :  { %7615 = vmatpush3.bf16.msra.mxu0 %v7612_v47  ;;  %v1766_v0 = vld [vmem:[%s12510_s4 + $0x2c8] sm:$0xff] }
 0x2a1   :  { %7617 = vmatprep.subr.bf16.mxu0 %v7616_v61 }
 0x2a2   :  { %v9807_v2 = vpop.f32.mrb[80].mxu1 }
 0x2a3   :  { %v867_v4 = vpop.f32.mrb[81].mxu1 }
 0x2a4   :  { %7619 = vmatpush3.bf16.msra.mxu0 %v7616_v61  ;;  %v1764_v61 = vld [vmem:[%s12510_s4 + $0x2b8] sm:$0xff] }
 0x2a5   :  { %7621 = vmatprep.subr.bf16.mxu0 %v7620_v1 }
 0x2a6   :  { %v9815_v6 = vpop.f32.mrb[82].mxu1 }
 0x2a7   :  { %6493 = vmatmul.mubr.f32.vlgmr.msra.gmra.mrb[32].mxu0 %v9563_v16  ;;  %v872_v8 = vpop.f32.mrb[83].mxu1  ;;  %v7632_v16 = vpack.c.bf16 %v1627_v13, %v1626_v10 }
 0x2a8   :  { %6495 = vmatprep.mubr.f32.mxu0 %v9571_v20  ;;  %7623 = vmatpush3.bf16.msra.mxu0 %v7620_v1  ;;  %v1628_v20 = vld [vmem:[%s12510_s4 + $0x240] sm:$0xff] }
 0x2a9   :  { %7625 = vmatprep.subr.bf16.mxu0 %v7624_v11  ;;  %v1769_v8 = vld [vmem:[%s12510_s4 + $0x2e0] sm:$0xff] }
 0x2aa   :  { %v9825_v14 = vpop.f32.mrb[84].mxu1 }
 0x2ab   :  { %6496 = vmatmul.mubr.f32.gmra.mrb[34].mxu0 %v9579_v24  ;;  %v877_v15 = vpop.f32.mrb[85].mxu1  ;;  %v7636_v24 = vpack.c.bf16 %v1629_v17, %v1628_v20 }
 0x2ac   :  { %6498 = vmatprep.mubr.f32.mxu0 %v9587_v28  ;;  %7627 = vmatpush3.bf16.msra.mxu0 %v7624_v11  ;;  %v1630_v28 = vld [vmem:[%s12510_s4 + $0x250] sm:$0xff]  ;;  %v1772_v15 = vld [vmem:[%s12510_s4 + $0x2f8] sm:$0xff] }
 0x2ad   :  { %7629 = vmatprep.subr.bf16.mxu0 %v7628_v9 }
 0x2ae   :  { %v9835_v18 = vpop.f32.mrb[86].mxu1 }
 0x2af   :  { %6499 = vmatmul.mubr.f32.gmra.mrb[36].mxu0 %v9595_v32  ;;  %v882_v19 = vpop.f32.mrb[87].mxu1  ;;  %v7640_v32 = vpack.c.bf16 %v1631_v21, %v1630_v28 }
 0x2b0   :  { %6501 = vmatprep.mubr.f32.mxu0 %v9603_v35  ;;  %7631 = vmatpush3.bf16.msra.mxu0 %v7628_v9  ;;  %v1632_v35 = vld [vmem:[%s12510_s4 + $0x260] sm:$0xff] }
 0x2b1   :  { %7633 = vmatprep.subr.bf16.mxu0 %v7632_v16  ;;  %v1894_v19 = vld [vmem:[%s12510_s4 + $0x300] sm:$0xff] }
 0x2b2   :  { %v9845_v23 = vpop.f32.mrb[88].mxu1 }
 0x2b3   :  { %6502 = vmatmul.mubr.f32.gmra.mrb[38].mxu0 %v9611_v39  ;;  %v887_v25 = vpop.f32.mrb[89].mxu1  ;;  %v7644_v39 = vpack.c.bf16 %v1633_v26, %v1632_v35  ;;  %v1897_v35 = vld [vmem:[%s12510_s4 + $0x318] sm:$0xff] }
 0x2b4   :  { %7635 = vmatpush3.bf16.msra.mxu0 %v7632_v16  ;;  %6536 = vmatprep.mubr.f32.mxu0 %v9741_v22  ;;  %v1634_v22 = vld [vmem:[%s12510_s4 + $0x270] sm:$0xff] }
 0x2b5   :  { %7637 = vmatprep.subr.bf16.mxu0 %v7636_v24  ;;  %v7648_v36 = vpack.c.bf16 %v1635_v31, %v1634_v22  ;;  %v1898_v22 = vld [vmem:[%s12510_s4 + $0x320] sm:$0xff]  ;;  %v1899_v31 = vld [vmem:[%s12510_s4 + $0x328] sm:$0xff] }
 0x2b6   :  { %v9855_v27 = vpop.f32.mrb[90].mxu1  ;;  %v7692_v37 = vpack.c.bf16 %v1899_v31, %v1898_v22  ;;  %v2044_v22 = vld [vmem:[%s12510_s4 + $0x3e8] sm:$0xff] }
 0x2b7   :  { %v892_v30 = vpop.f32.mrb[91].mxu1 }
 0x2b8   :  { %7639 = vmatpush3.bf16.msra.mxu0 %v7636_v24  ;;  %v1895_v24 = vld [vmem:[%s12510_s4 + $0x308] sm:$0xff] }
 0x2b9   :  { %7641 = vmatprep.subr.bf16.mxu0 %v7640_v32  ;;  %v7684_v25 = vpack.c.bf16 %v1895_v24, %v1894_v19 }
 0x2ba   :  { %v9863_v33 = vpop.f32.mrb[92].mxu1 }
 0x2bb   :  { %v897_v34 = vpop.f32.mrb[93].mxu1 }
 0x2bc   :  { %7643 = vmatpush3.bf16.msra.mxu0 %v7640_v32  ;;  %v1896_v32 = vld [vmem:[%s12510_s4 + $0x310] sm:$0xff] }
 0x2bd   :  { %7645 = vmatprep.subr.bf16.mxu0 %v7644_v39 }
 0x2be   :  { %v9871_v40 = vpop.f32.mrb[94].mxu1 }
 0x2bf   :  { %v902_v43 = vpop.f32.mrb[95].mxu1 }
 0x2c0   :  { %7647 = vmatpush3.bf16.msra.mxu0 %v7644_v39  ;;  %v7688_v39 = vpack.c.bf16 %v1897_v35, %v1896_v32  ;;  %v1901_v43 = vld [vmem:[%s12510_s4 + $0x338] sm:$0xff] }
 0x2c1   :  { %7649 = vmatprep.subr.bf16.mxu0 %v7648_v36  ;;  %v2042_v35 = vld [vmem:[%s12510_s4 + $0x3d8] sm:$0xff] }
 0x2c2   :  { %v9879_v50 = vpop.f32.mrb[96].mxu1 }
 0x2c3   :  { %v907_v52 = vpop.f32.mrb[97].mxu1 }
 0x2c4   :  { %7651 = vmatpush3.bf16.msra.mxu0 %v7648_v36 }
 0x2c5   :  { %7653 = vmatprep.subr.bf16.mxu0 %v7652_v45 }
 0x2c6   :  { %v9887_v47 = vpop.f32.mrb[98].mxu1 }
 0x2c7   :  { %6537 = vmatmul.mubr.f32.vlgmr.msra.gmra.mrb[32].mxu0 %v9749_v29  ;;  %v912_v12 = vpop.f32.mrb[99].mxu1  ;;  %v7664_v29 = vpack.c.bf16 %v1764_v61, %v1763_v60 }
 0x2c8   :  { %6539 = vmatprep.mubr.f32.mxu0 %v9758_v46  ;;  %7655 = vmatpush3.bf16.msra.mxu0 %v7652_v45  ;;  %v1765_v46 = vld [vmem:[%s12510_s4 + $0x2c0] sm:$0xff] }
 0x2c9   :  { %7657 = vmatprep.subr.bf16.mxu0 %v7656_v53 }
 0x2ca   :  { %v9897_v55 = vpop.f32.mrb[100].mxu1 }
 0x2cb   :  { %6540 = vmatmul.mubr.f32.gmra.mrb[34].mxu0 %v9766_v42  ;;  %v917_v59 = vpop.f32.mrb[101].mxu1  ;;  %v7668_v42 = vpack.c.bf16 %v1766_v0, %v1765_v46 }
 0x2cc   :  { %6542 = vmatprep.mubr.f32.mxu0 %v9774_v49  ;;  %7659 = vmatpush3.bf16.msra.mxu0 %v7656_v53  ;;  %v1767_v49 = vld [vmem:[%s12510_s4 + $0x2d0] sm:$0xff]  ;;  %v1909_v59 = vld [vmem:[%s12510_s4 + $0x378] sm:$0xff] }
 0x2cd   :  { %7661 = vmatprep.subr.bf16.mxu0 %v7660_v51  ;;  %v7672_v7 = vpack.c.bf16 %v1768_v3, %v1767_v49 }
 0x2ce   :  { %v9907_v1 = vpop.f32.mrb[102].mxu1 }
 0x2cf   :  { %6543 = vmatmul.mubr.f32.gmra.mrb[36].mxu0 %v9783_v56  ;;  %v922_v63 = vpop.f32.mrb[103].mxu1  ;;  %v2611_v56 = vld [vmem:[%s12513_s7 + $0x100] sm:$0xff] }
 0x2d0   :  { %6545 = vmatprep.mubr.f32.mxu0 %v9791_v58  ;;  %7663 = vmatpush3.bf16.msra.mxu0 %v7660_v51  ;;  %v2612_v58 = vld [vmem:[%s12513_s7 + $0x108] sm:$0xff]  ;;  %v2031_v63 = vld [vmem:[%s12510_s4 + $0x380] sm:$0xff] }
 0x2d1   :  { %7665 = vmatprep.subr.bf16.mxu0 %v7664_v29  ;;  %v7796_v5 = vpack.c.bf16 %v2612_v58, %v2611_v56  ;;  %v1907_v51 = vld [vmem:[%s12510_s4 + $0x368] sm:$0xff]  ;;  %v2033_v56 = vld [vmem:[%s12510_s4 + $0x390] sm:$0xff]  ;;  %v2034_v58 = vld [vmem:[%s12510_s4 + $0x398] sm:$0xff] }
 0x2d2   :  { %v9917_v4 = vpop.f32.mrb[104].mxu1 }
 0x2d3   :  { %6546 = vmatmul.mubr.f32.gmra.mrb[38].mxu0 %v9799_v62  ;;  %v927_v11 = vpop.f32.mrb[105].mxu1  ;;  %v1770_v62 = vld [vmem:[%s12510_s4 + $0x2e8] sm:$0xff]  ;;  %7797 = vmatprep.subr.bf16.mxu1 %v7796_v5 }
 0x2d4   :  { %7667 = vmatpush3.bf16.msra.mxu0 %v7664_v29  ;;  %6580 = vmatprep.mubr.f32.mxu0 %v9807_v2  ;;  %v7676_v13 = vpack.c.bf16 %v1770_v62, %v1769_v8  ;;  %v1771_v2 = vld [vmem:[%s12510_s4 + $0x2f0] sm:$0xff]  ;;  %v7720_v8 = vpack.c.bf16 %v2034_v58, %v2033_v56  ;;  %v2035_v62 = vld [vmem:[%s12510_s4 + $0x3a0] sm:$0xff]  ;;  %v2614_v56 = vld [vmem:[%s12513_s7 + $0x118] sm:$0xff] }
 0x2d5   :  { %7669 = vmatprep.subr.bf16.mxu0 %v7668_v42  ;;  %7799 = vmatpush3.bf16.msra.mxu1 %v7796_v5  ;;  %v7680_v17 = vpack.c.bf16 %v1772_v15, %v1771_v2 }
 0x2d6   :  { %v9933_v9 = vpop.f32.mrb[106].mxu1 }
 0x2d7   :  { %v932_v10 = vpop.f32.mrb[107].mxu1 }
 0x2d8   :  { %7671 = vmatpush3.bf16.msra.mxu0 %v7668_v42  ;;  %v2032_v42 = vld [vmem:[%s12510_s4 + $0x388] sm:$0xff] }
 0x2d9   :  { %7673 = vmatprep.subr.bf16.mxu0 %v7672_v7  ;;  %v7716_v11 = vpack.c.bf16 %v2032_v42, %v2031_v63  ;;  %v2036_v10 = vld [vmem:[%s12510_s4 + $0x3a8] sm:$0xff]  ;;  %v2182_v63 = vld [vmem:[%s12510_s4 + $0x470] sm:$0xff]  ;;  %v2183_v42 = vld [vmem:[%s12510_s4 + $0x478] sm:$0xff] }
 0x2da   :  { %v9941_v16 = vpop.f32.mrb[108].mxu1  ;;  %v7724_v15 = vpack.c.bf16 %v2036_v10, %v2035_v62  ;;  %v2617_v62 = vld [vmem:[%s12513_s7 + $0x130] sm:$0xff]  ;;  %v2618_v10 = vld [vmem:[%s12513_s7 + $0x138] sm:$0xff] }
 0x2db   :  { %v937_v20 = vpop.f32.mrb[109].mxu1 }
 0x2dc   :  { %7675 = vmatpush3.bf16.msra.mxu0 %v7672_v7  ;;  %v2037_v20 = vld [vmem:[%s12510_s4 + $0x3b0] sm:$0xff] }
 0x2dd   :  { %7677 = vmatprep.subr.bf16.mxu0 %v7676_v13 }
 0x2de   :  { %v9949_v28 = vpop.f32.mrb[110].mxu1 }
 0x2df   :  { %v942_v21 = vpop.f32.mrb[111].mxu1 }
 0x2e0   :  { %7679 = vmatpush3.bf16.msra.mxu0 %v7676_v13  ;;  %v2040_v21 = vld [vmem:[%s12510_s4 + $0x3c8] sm:$0xff] }
 0x2e1   :  { %7681 = vmatprep.subr.bf16.mxu0 %v7680_v17 }
 0x2e2   :  { %v9957_v26 = vpop.f32.mrb[112].mxu1 }
 0x2e3   :  { %v947_v30 = vpop.f32.mrb[113].mxu1 }
 0x2e4   :  { %7683 = vmatpush3.bf16.msra.mxu0 %v7680_v17  ;;  %v2038_v17 = vld [vmem:[%s12510_s4 + $0x3b8] sm:$0xff] }
 0x2e5   :  { %7685 = vmatprep.subr.bf16.mxu0 %v7684_v25 }
 0x2e6   :  { %v9965_v34 = vpop.f32.mrb[114].mxu1 }
 0x2e7   :  { %6581 = vmatmul.mubr.f32.vlgmr.msra.gmra.mrb[32].mxu0 %v9815_v6  ;;  %v952_v36 = vpop.f32.mrb[115].mxu1  ;;  %v7696_v6 = vpack.c.bf16 %v1901_v43, %v1900_v38 }
 0x2e8   :  { %6583 = vmatprep.mubr.f32.mxu0 %v9825_v14  ;;  %7687 = vmatpush3.bf16.msra.mxu0 %v7684_v25  ;;  %v1902_v14 = vld [vmem:[%s12510_s4 + $0x340] sm:$0xff] }
 0x2e9   :  { %7689 = vmatprep.subr.bf16.mxu0 %v7688_v39 }
 0x2ea   :  { %v9975_v45 = vpop.f32.mrb[116].mxu1 }
 0x2eb   :  { %6584 = vmatmul.mubr.f32.gmra.mrb[34].mxu0 %v9835_v18  ;;  %v957_v48 = vpop.f32.mrb[117].mxu1  ;;  %v7700_v18 = vpack.c.bf16 %v1903_v41, %v1902_v14  ;;  %v2169_v14 = vld [vmem:[%s12510_s4 + $0x408] sm:$0xff] }
 0x2ec   :  { %6586 = vmatprep.mubr.f32.mxu0 %v9845_v23  ;;  %7691 = vmatpush3.bf16.msra.mxu0 %v7688_v39  ;;  %v1904_v23 = vld [vmem:[%s12510_s4 + $0x350] sm:$0xff] }
 0x2ed   :  { %7693 = vmatprep.subr.bf16.mxu0 %v7692_v37 }
 0x2ee   :  { %v9985_v52 = vpop.f32.mrb[118].mxu1 }
 0x2ef   :  { %6587 = vmatmul.mubr.f32.gmra.mrb[36].mxu0 %v9855_v27  ;;  %v962_v53 = vpop.f32.mrb[119].mxu1  ;;  %v7704_v27 = vpack.c.bf16 %v1905_v54, %v1904_v23  ;;  %v2170_v23 = vld [vmem:[%s12510_s4 + $0x410] sm:$0xff]  ;;  %v2171_v54 = vld [vmem:[%s12510_s4 + $0x418] sm:$0xff] }
 0x2f0   :  { %6589 = vmatprep.mubr.f32.mxu0 %v9863_v33  ;;  %7695 = vmatpush3.bf16.msra.mxu0 %v7692_v37  ;;  %v1906_v33 = vld [vmem:[%s12510_s4 + $0x360] sm:$0xff]  ;;  %v2046_v37 = vld [vmem:[%s12510_s4 + $0x3f8] sm:$0xff] }
 0x2f1   :  { %7697 = vmatprep.subr.bf16.mxu0 %v7696_v6 }
 0x2f2   :  { %v9995_v57 = vpop.f32.mrb[120].mxu1 }
 0x2f3   :  { %6590 = vmatmul.mubr.f32.gmra.mrb[38].mxu0 %v9871_v40  ;;  %v967_v12 = vpop.f32.mrb[121].mxu1  ;;  %v7708_v40 = vpack.c.bf16 %v1907_v51, %v1906_v33  ;;  %v2173_v33 = vld [vmem:[%s12510_s4 + $0x428] sm:$0xff] }
 0x2f4   :  { %7699 = vmatpush3.bf16.msra.mxu0 %v7696_v6  ;;  %6624 = vmatprep.mubr.f32.mxu0 %v9879_v50  ;;  %v1908_v50 = vld [vmem:[%s12510_s4 + $0x370] sm:$0xff]  ;;  %v2168_v6 = vld [vmem:[%s12510_s4 + $0x400] sm:$0xff]  ;;  %v7752_v12 = vpack.c.bf16 %v2171_v54, %v2170_v23 }
 0x2f5   :  { %7701 = vmatprep.subr.bf16.mxu0 %v7700_v18  ;;  %v7712_v0 = vpack.c.bf16 %v1909_v59, %v1908_v50  ;;  %v2177_v50 = vld [vmem:[%s12510_s4 + $0x448] sm:$0xff]  ;;  %v2179_v59 = vld [vmem:[%s12510_s4 + $0x458] sm:$0xff] }
 0x2f6   :  { %v10005_v60 = vpop.f32.mrb[122].mxu1 }
 0x2f7   :  { %v972_v61 = vpop.f32.mrb[123].mxu1 }
 0x2f8   :  { %7703 = vmatpush3.bf16.msra.mxu0 %v7700_v18  ;;  %v7748_v18 = vpack.c.bf16 %v2169_v14, %v2168_v6  ;;  %v2174_v61 = vld [vmem:[%s12510_s4 + $0x430] sm:$0xff] }
 0x2f9   :  { %7705 = vmatprep.subr.bf16.mxu0 %v7704_v27 }
 0x2fa   :  { %v10013_v29 = vpop.f32.mrb[124].mxu1 }
 0x2fb   :  { %v977_v46 = vpop.f32.mrb[125].mxu1 }
 0x2fc   :  { %7707 = vmatpush3.bf16.msra.mxu0 %v7704_v27  ;;  %v2172_v27 = vld [vmem:[%s12510_s4 + $0x420] sm:$0xff]  ;;  %v2181_v46 = vld [vmem:[%s12510_s4 + $0x468] sm:$0xff] }
 0x2fd   :  { %7709 = vmatprep.subr.bf16.mxu0 %v7708_v40  ;;  %v7756_v51 = vpack.c.bf16 %v2173_v33, %v2172_v27 }
 0x2fe   :  { %v10021_v49 = vpop.f32.mrb[126].mxu1 }
 0x2ff   :  { %v982_v3 = vpop.f32.mrb[127].mxu1 }
 0x300   :  { %7711 = vmatpush3.bf16.msra.mxu0 %v7708_v40  ;;  %v2175_v40 = vld [vmem:[%s12510_s4 + $0x438] sm:$0xff]  ;;  %v2328_v3 = vld [vmem:[%s12512_s6] sm:$0xff] }
 0x301   :  { %7713 = vmatprep.subr.bf16.mxu0 %v7712_v0 }
 0x302   :  { %v10029_v5 = vpop.f32.mrb[128].mxu1 }
 0x303   :  { %v987_v7 = vpop.f32.mrb[129].mxu1 }
 0x304   :  { %7715 = vmatpush3.bf16.msra.mxu0 %v7712_v0  ;;  %v2616_v7 = vld [vmem:[%s12513_s7 + $0x128] sm:$0xff] }
 0x305   :  { %7717 = vmatprep.subr.bf16.mxu0 %v7716_v11 }
 0x306   :  { %v10037_v13 = vpop.f32.mrb[130].mxu1 }
 0x307   :  { %6625 = vmatmul.mubr.f32.vlgmr.msra.gmra.mrb[32].mxu0 %v9887_v47  ;;  %v992_v2 = vpop.f32.mrb[131].mxu1  ;;  %v7728_v47 = vpack.c.bf16 %v2038_v17, %v2037_v20  ;;  %v2621_v17 = vld [vmem:[%s12513_s7 + $0x150] sm:$0xff] }
 0x308   :  { %6627 = vmatprep.mubr.f32.mxu0 %v9897_v55  ;;  %7719 = vmatpush3.bf16.msra.mxu0 %v7716_v11  ;;  %v2039_v55 = vld [vmem:[%s12510_s4 + $0x3c0] sm:$0xff]  ;;  %v2613_v11 = vld [vmem:[%s12513_s7 + $0x110] sm:$0xff]  ;;  %v7808_v2 = vpack.c.bf16 %v2618_v10, %v2617_v62  ;;  %v2345_v62 = vld [vmem:[%s12512_s6 + $0x88] sm:$0xff] }
 0x309   :  { %7721 = vmatprep.subr.bf16.mxu0 %v7720_v8  ;;  %v7800_v58 = vpack.c.bf16 %v2614_v56, %v2613_v11  ;;  %v2575_v11 = vld [vmem:[%s12513_s7] sm:$0xff]  ;;  %v2576_v56 = vld [vmem:[%s12513_s7 + $0x8] sm:$0xff] }
 0x30a   :  { %v10047_v19 = vpop.f32.mrb[132].mxu1 }
 0x30b   :  { %6628 = vmatmul.mubr.f32.gmra.mrb[34].mxu0 %v9907_v1  ;;  %v997_v24 = vpop.f32.mrb[133].mxu1  ;;  %v7732_v1 = vpack.c.bf16 %v2040_v21, %v2039_v55  ;;  %7801 = vmatprep.subr.bf16.mxu1 %v7800_v58  ;;  %v2624_v55 = vld [vmem:[%s12513_s7 + $0x168] sm:$0xff] }
 0x30c   :  { %6630 = vmatprep.mubr.f32.mxu0 %v9917_v4  ;;  %7723 = vmatpush3.bf16.msra.mxu0 %v7720_v8  ;;  %v2041_v4 = vld [vmem:[%s12510_s4 + $0x3d0] sm:$0xff] }
 0x30d   :  { %7725 = vmatprep.subr.bf16.mxu0 %v7724_v15  ;;  %7803 = vmatpush3.bf16.msra.mxu1 %v7800_v58  ;;  %v7828_v58 = vpack.c.bf16 %v2576_v56, %v2575_v11  ;;  %v2593_v56 = vld [vmem:[%s12513_s7 + $0x80] sm:$0xff] }
 0x30e   :  { %v10057_v25 = vpop.f32.mrb[134].mxu1 }
 0x30f   :  { %6631 = vmatmul.mubr.f32.gmra.mrb[36].mxu0 %v9933_v9  ;;  %v1002_v32 = vpop.f32.mrb[135].mxu1  ;;  %v7736_v9 = vpack.c.bf16 %v2042_v35, %v2041_v4 }
 0x310   :  { %6633 = vmatprep.mubr.f32.mxu0 %v9941_v16  ;;  %7727 = vmatpush3.bf16.msra.mxu0 %v7724_v15  ;;  %v2043_v16 = vld [vmem:[%s12510_s4 + $0x3e0] sm:$0xff]  ;;  %v2620_v15 = vld [vmem:[%s12513_s7 + $0x148] sm:$0xff] }
 0x311   :  { %7729 = vmatprep.subr.bf16.mxu0 %v7728_v47 }
 0x312   :  { %v10067_v30 = vpop.f32.mrb[136].mxu1 }
 0x313   :  { %6634 = vmatmul.mubr.f32.gmra.mrb[38].mxu0 %v9949_v28  ;;  %v1007_v39 = vpop.f32.mrb[137].mxu1  ;;  %v7740_v28 = vpack.c.bf16 %v2044_v22, %v2043_v16 }
 0x314   :  { %7731 = vmatpush3.bf16.msra.mxu0 %v7728_v47  ;;  %6668 = vmatprep.mubr.f32.mxu0 %v9957_v26  ;;  %v2045_v26 = vld [vmem:[%s12510_s4 + $0x3f0] sm:$0xff]  ;;  %v2623_v47 = vld [vmem:[%s12513_s7 + $0x160] sm:$0xff] }
 0x315   :  { %7733 = vmatprep.subr.bf16.mxu0 %v7732_v1  ;;  %v7744_v48 = vpack.c.bf16 %v2046_v37, %v2045_v26  ;;  %v7820_v21 = vpack.c.bf16 %v2624_v55, %v2623_v47  ;;  %v2579_v55 = vld [vmem:[%s12513_s7 + $0x20] sm:$0xff] }
 0x316   :  { %v10077_v31 = vpop.f32.mrb[138].mxu1 }
 0x317   :  { %v1012_v36 = vpop.f32.mrb[139].mxu1 }
 0x318   :  { %7735 = vmatpush3.bf16.msra.mxu0 %v7732_v1 }
 0x319   :  { %7737 = vmatprep.subr.bf16.mxu0 %v7736_v9 }
 0x31a   :  { %v1015_v38 = vpop.f32.mrb[140].mxu1 }
 0x31b   :  { %v1017_v43 = vpop.f32.mrb[141].mxu1 }
 0x31c   :  { %7739 = vmatpush3.bf16.msra.mxu0 %v7736_v9 }
 0x31d   :  { %7741 = vmatprep.subr.bf16.mxu0 %v7740_v28 }
 0x31e   :  { %v1020_v41 = vpop.f32.mrb[142].mxu1 }
 0x31f   :  { %v1022_v53 = vpop.f32.mrb[143].mxu1 }
 0x320   :  { %7743 = vmatpush3.bf16.msra.mxu0 %v7740_v28 }
 0x321   :  { %7745 = vmatprep.subr.bf16.mxu0 %v7744_v48 }
 0x324   :  { %7747 = vmatpush3.bf16.msra.mxu0 %v7744_v48 }
 0x325   :  { %7749 = vmatprep.subr.bf16.mxu0 %v7748_v18 }
 0x327   :  { %6669 = vmatmul.mubr.f32.vlgmr.msra.gmra.mrb[32].mxu0 %v9965_v34  ;;  %v7760_v34 = vpack.c.bf16 %v2175_v40, %v2174_v61  ;;  %v2329_v61 = vld [vmem:[%s12512_s6 + $0x8] sm:$0xff]  ;;  %v2330_v40 = vld [vmem:[%s12512_s6 + $0x10] sm:$0xff] }
 0x328   :  { %6671 = vmatprep.mubr.f32.mxu0 %v9975_v45  ;;  %7751 = vmatpush3.bf16.msra.mxu0 %v7748_v18  ;;  %v2176_v45 = vld [vmem:[%s12510_s4 + $0x440] sm:$0xff] }
 0x329   :  { %7753 = vmatprep.subr.bf16.mxu0 %v7752_v12 }
 0x32b   :  { %6672 = vmatmul.mubr.f32.gmra.mrb[34].mxu0 %v9985_v52  ;;  %v7764_v52 = vpack.c.bf16 %v2177_v50, %v2176_v45  ;;  %v2332_v45 = vld [vmem:[%s12512_s6 + $0x20] sm:$0xff]  ;;  %v2333_v50 = vld [vmem:[%s12512_s6 + $0x28] sm:$0xff] }
 0x32c   :  { %6674 = vmatprep.mubr.f32.mxu0 %v9995_v57  ;;  %7755 = vmatpush3.bf16.msra.mxu0 %v7752_v12  ;;  %v2178_v57 = vld [vmem:[%s12510_s4 + $0x450] sm:$0xff] }
 0x32d   :  { %7757 = vmatprep.subr.bf16.mxu0 %v7756_v51 }
 0x32f   :  { %6675 = vmatmul.mubr.f32.gmra.mrb[36].mxu0 %v10005_v60  ;;  %v7768_v60 = vpack.c.bf16 %v2179_v59, %v2178_v57  ;;  %v2335_v57 = vld [vmem:[%s12512_s6 + $0x38] sm:$0xff]  ;;  %v2336_v59 = vld [vmem:[%s12512_s6 + $0x40] sm:$0xff] }
 0x330   :  { %6677 = vmatprep.mubr.f32.mxu0 %v10013_v29  ;;  %7759 = vmatpush3.bf16.msra.mxu0 %v7756_v51  ;;  %v2180_v29 = vld [vmem:[%s12510_s4 + $0x460] sm:$0xff] }
 0x331   :  { %7761 = vmatprep.subr.bf16.mxu0 %v7760_v34  ;;  %v7772_v0 = vpack.c.bf16 %v2181_v46, %v2180_v29  ;;  %v2338_v29 = vld [vmem:[%s12512_s6 + $0x50] sm:$0xff]  ;;  %v2339_v46 = vld [vmem:[%s12512_s6 + $0x58] sm:$0xff] }
 0x333   :  { %6678 = vmatmul.mubr.f32.gmra.mrb[38].mxu0 %v10021_v49  ;;  %v7776_v49 = vpack.c.bf16 %v2183_v42, %v2182_v63  ;;  %v2341_v63 = vld [vmem:[%s12512_s6 + $0x68] sm:$0xff]  ;;  %v2625_v42 = vld [vmem:[%s12513_s7 + $0x170] sm:$0xff] }
 0x334   :  { %7763 = vmatpush3.bf16.msra.mxu0 %v7760_v34  ;;  %6712 = vmatprep.mubr.f32.mxu0 %v10029_v5  ;;  %v2615_v5 = vld [vmem:[%s12513_s7 + $0x120] sm:$0xff]  ;;  %v2331_v34 = vld [vmem:[%s12512_s6 + $0x18] sm:$0xff] }
 0x335   :  { %7765 = vmatprep.subr.bf16.mxu0 %v7764_v52  ;;  %v7804_v8 = vpack.c.bf16 %v2616_v7, %v2615_v5  ;;  %v2342_v5 = vld [vmem:[%s12512_s6 + $0x70] sm:$0xff]  ;;  %v2343_v7 = vld [vmem:[%s12512_s6 + $0x78] sm:$0xff] }
 0x337   :  { %7805 = vmatprep.subr.bf16.mxu1 %v7804_v8 }
 0x338   :  { %7767 = vmatpush3.bf16.msra.mxu0 %v7764_v52  ;;  %7807 = vmatpush3.bf16.msra.mxu1 %v7804_v8  ;;  %v2334_v52 = vld [vmem:[%s12512_s6 + $0x30] sm:$0xff]  ;;  %v2344_v8 = vld [vmem:[%s12512_s6 + $0x80] sm:$0xff] }
 0x339   :  { %7769 = vmatprep.subr.bf16.mxu0 %v7768_v60  ;;  %7809 = vmatprep.subr.bf16.mxu1 %v7808_v2 }
 0x33c   :  { %7771 = vmatpush3.bf16.msra.mxu0 %v7768_v60  ;;  %7811 = vmatpush3.bf16.msra.mxu1 %v7808_v2  ;;  %v2337_v60 = vld [vmem:[%s12512_s6 + $0x48] sm:$0xff] }
 0x33d   :  { %7773 = vmatprep.subr.bf16.mxu0 %v7772_v0 }
 0x340   :  { %7775 = vmatpush3.bf16.msra.mxu0 %v7772_v0  ;;  %v2340_v0 = vld [vmem:[%s12512_s6 + $0x60] sm:$0xff] }
 0x341   :  { %7777 = vmatprep.subr.bf16.mxu0 %v7776_v49 }
 0x344   :  { %7779 = vmatpush3.bf16.msra.mxu0 %v7776_v49  ;;  %v2626_v49 = vld [vmem:[%s12513_s7 + $0x178] sm:$0xff] }
 0x347   :  { %6713 = vmatmul.mubr.f32.vlgmr.msra.gmra.mrb[32].mxu0 %v10037_v13  ;;  %v2619_v13 = vld [vmem:[%s12513_s7 + $0x140] sm:$0xff] }
 0x348   :  { %6715 = vmatprep.mubr.f32.mxu0 %v10047_v19  ;;  %v7812_v20 = vpack.c.bf16 %v2620_v15, %v2619_v13  ;;  %v2622_v19 = vld [vmem:[%s12513_s7 + $0x158] sm:$0xff] }
 0x349   :  { %v7816_v24 = vpack.c.bf16 %v2622_v19, %v2621_v17  ;;  %v2578_v17 = vld [vmem:[%s12513_s7 + $0x18] sm:$0xff] }
 0x34a   :  { %7813 = vmatprep.subr.bf16.mxu1 %v7812_v20 }
 0x34b   :  { %6716 = vmatmul.mubr.f32.gmra.mrb[34].mxu0 %v10057_v25  ;;  %7815 = vmatpush3.bf16.msra.mxu1 %v7812_v20  ;;  %v5485_v25 = vld [vmem:[%s12511_s5] ss:$0 sm:$0xff]  ;;  %v2577_v20 = vld [vmem:[%s12513_s7 + $0x10] sm:$0xff] }
 0x34c   :  { %6718 = vmatprep.mubr.f32.mxu0 %v10067_v30  ;;  %7817 = vmatprep.subr.bf16.mxu1 %v7816_v24  ;;  %v7832_v47 = vpack.c.bf16 %v2578_v17, %v2577_v20  ;;  %v2597_v20 = vld [vmem:[%s12513_s7 + $0xa0] sm:$0xff]  ;;  %v2598_v17 = vld [vmem:[%s12513_s7 + $0xa8] sm:$0xff] }
 0x34f   :  { %6719 = vmatmul.mubr.f32.gmra.mrb[36].mxu0 %v10077_v31  ;;  %7819 = vmatpush3.bf16.msra.mxu1 %v7816_v24 }
 0x350   :  { %6721 = vmatprep.mubr.f32.mxu0 %v1015_v38  ;;  %7821 = vmatprep.subr.bf16.mxu1 %v7820_v21 }
 0x353   :  { %6722 = vmatmul.mubr.f32.gmra.mrb[38].mxu0 %v1020_v41  ;;  %7823 = vmatpush3.bf16.msra.mxu1 %v7820_v21  ;;  %v2580_v21 = vld [vmem:[%s12513_s7 + $0x28] sm:$0xff] }
 0x354   :  { %6740 = vmatprep.mubr.msk.f32.mxu0 %vm101_vm0, %v2328_v3  ;;  %v7824_v3 = vpack.c.bf16 %v2626_v49, %v2625_v42  ;;  %v2793_v49 = vld [vmem:[%s12513_s7 + $0x1f0] sm:$0xff] }
 0x356   :  { %7825 = vmatprep.subr.bf16.mxu1 %v7824_v3 }
 0x357   :  { %7827 = vmatpush3.bf16.msra.mxu1 %v7824_v3  ;;  %v2794_v3 = vld [vmem:[%s12513_s7 + $0x1f8] sm:$0xff] }
 0x358   :  { %7829 = vmatprep.subr.bf16.mxu1 %v7828_v58  ;;  %v7888_v11 = vpack.c.bf16 %v2794_v3, %v2793_v49  ;;  %v3045_v49 = vld [vmem:[%s12513_s7 + $0x298] sm:$0xff] }
 0x41a   :  { %v6714_v32 = vpop.f32.mrb[32].mxu0 }
 0x41b   :  { %v2313_v1 = vadd.f32 %v6714_v32, %v5485_v25  ;;  %v2250_v4 = vpop.f32.mrb[33].mxu0  ;;  %v7836_v32 = vpack.c.bf16 %v2580_v21, %v2579_v55  ;;  %v2601_v21 = vld [vmem:[%s12513_s7 + $0xc0] sm:$0xff] }
 0x41c   :  { %v2312_v35 = vadd.f32 %v5485_v25, %v2250_v4  ;;  %v2581_v4 = vld [vmem:[%s12513_s7 + $0x30] sm:$0xff] }
 0x41d   :  { %v2321_v30 = vmax.f32 %v2313_v1, 0.0 }
 0x41e   :  { %v2320_v39 = vmax.f32 %v2312_v35, 0.0  ;;  %v6717_v9 = vpop.f32.mrb[34].mxu0  ;;  %v2582_v35 = vld [vmem:[%s12513_s7 + $0x38] sm:$0xff] }
 0x41f   :  { %v2315_v16 = vadd.f32 %v6717_v9, %v5485_v25  ;;  %v2260_v22 = vpop.f32.mrb[35].mxu0 }
 0x420   :  { %v7780_v31 = vpack.c.bf16 %v2321_v30, %v2320_v39  ;;  %v2314_v36 = vadd.f32 %v5485_v25, %v2260_v22  ;;  %v7840_v39 = vpack.c.bf16 %v2582_v35, %v2581_v4  ;;  %v2584_v22 = vld [vmem:[%s12513_s7 + $0x48] sm:$0xff]  ;;  %v2605_v35 = vld [vmem:[%s12513_s7 + $0xe0] sm:$0xff] }
 0x421   :  { %v2323_v28 = vmax.f32 %v2315_v16, 0.0  ;;  %v2583_v16 = vld [vmem:[%s12513_s7 + $0x40] sm:$0xff] }
 0x422   :  { %v2322_v26 = vmax.f32 %v2314_v36, 0.0  ;;  %v6720_v37 = vpop.f32.mrb[36].mxu0  ;;  %7781 = vmatprep.subr.bf16.mxu0 %v7780_v31  ;;  %v2585_v36 = vld [vmem:[%s12513_s7 + $0x50] sm:$0xff] }
 0x423   :  { %v2317_v38 = vadd.f32 %v6720_v37, %v5485_v25  ;;  %v2270_v43 = vpop.f32.mrb[37].mxu0  ;;  %7783 = vmatpush3.bf16.msra.mxu0 %v7780_v31  ;;  %v7844_v31 = vpack.c.bf16 %v2584_v22, %v2583_v16  ;;  %v2587_v37 = vld [vmem:[%s12513_s7 + $0x60] sm:$0xff]  ;;  %v2607_v22 = vld [vmem:[%s12513_s7 + $0xf0] sm:$0xff] }
 0x424   :  { %v7784_v48 = vpack.c.bf16 %v2323_v28, %v2322_v26  ;;  %v2316_v6 = vadd.f32 %v5485_v25, %v2270_v43  ;;  %v2586_v28 = vld [vmem:[%s12513_s7 + $0x58] sm:$0xff] }
 0x425   :  { %v2325_v14 = vmax.f32 %v2317_v38, 0.0  ;;  %v7848_v26 = vpack.c.bf16 %v2586_v28, %v2585_v36  ;;  %v2588_v38 = vld [vmem:[%s12513_s7 + $0x68] sm:$0xff]  ;;  %v2947_v28 = vld [vmem:[%s12513_s7 + $0x200] sm:$0xff] }
 0x426   :  { %v2324_v41 = vmax.f32 %v2316_v6, 0.0  ;;  %v6723_v53 = vpop.f32.mrb[38].mxu0  ;;  %7785 = vmatprep.subr.bf16.mxu0 %v7784_v48  ;;  %v7852_v43 = vpack.c.bf16 %v2588_v38, %v2587_v37  ;;  %v2590_v6 = vld [vmem:[%s12513_s7 + $0x78] sm:$0xff]  ;;  %v2949_v38 = vld [vmem:[%s12513_s7 + $0x210] sm:$0xff] }
 0x427   :  { %v2319_v18 = vadd.f32 %v6723_v53, %v5485_v25  ;;  %v2280_v23 = vpop.f32.mrb[39].mxu0  ;;  %7787 = vmatpush3.bf16.msra.mxu0 %v7784_v48  ;;  %v2589_v48 = vld [vmem:[%s12513_s7 + $0x70] sm:$0xff]  ;;  %v2780_v53 = vld [vmem:[%s12513_s7 + $0x188] sm:$0xff] }
 0x428   :  { %v7788_v54 = vpack.c.bf16 %v2325_v14, %v2324_v41  ;;  %v2318_v12 = vadd.f32 %v5485_v25, %v2280_v23  ;;  %v7856_v14 = vpack.c.bf16 %v2590_v6, %v2589_v48  ;;  %v2779_v41 = vld [vmem:[%s12513_s7 + $0x180] sm:$0xff] }
 0x429   :  { %v2327_v27 = vmax.f32 %v2319_v18, 0.0  ;;  %v7860_v18 = vpack.c.bf16 %v2780_v53, %v2779_v41  ;;  %v2951_v41 = vld [vmem:[%s12513_s7 + $0x220] sm:$0xff]  ;;  %v2952_v53 = vld [vmem:[%s12513_s7 + $0x228] sm:$0xff] }
 0x42a   :  { %v2326_v33 = vmax.f32 %v2318_v12, 0.0  ;;  %7789 = vmatprep.subr.bf16.mxu0 %v7788_v54  ;;  %v2782_v12 = vld [vmem:[%s12513_s7 + $0x198] sm:$0xff] }
 0x42b   :  { %7791 = vmatpush3.bf16.msra.mxu0 %v7788_v54  ;;  %v2781_v54 = vld [vmem:[%s12513_s7 + $0x190] sm:$0xff] }
 0x42c   :  { %v7792_v51 = vpack.c.bf16 %v2327_v27, %v2326_v33  ;;  %v7864_v33 = vpack.c.bf16 %v2782_v12, %v2781_v54  ;;  %v2953_v54 = vld [vmem:[%s12513_s7 + $0x230] sm:$0xff]  ;;  %v2954_v12 = vld [vmem:[%s12513_s7 + $0x238] sm:$0xff] }
 0x42e   :  { %7793 = vmatprep.subr.bf16.mxu0 %v7792_v51 }
 0x42f   :  { %7795 = vmatpush3.bf16.msra.mxu0 %v7792_v51  ;;  %v2783_v51 = vld [vmem:[%s12513_s7 + $0x1a0] sm:$0xff] }
 0x430   :  { %8084 = vmatprep.subr.bf16.mxu0 %v8812_v44 }
 0x432   :  { %6741 = vmatmul.mubr.msk.f32.vlgmr.msra.gmra.mrb[40].mxu0 %vm101_vm0, %v2329_v61  ;;  %v2784_v61 = vld [vmem:[%s12513_s7 + $0x1a8] sm:$0xff] }
 0x433   :  { %6743 = vmatprep.mubr.msk.f32.mxu0 %vm101_vm0, %v2330_v40  ;;  %v7868_v40 = vpack.c.bf16 %v2784_v61, %v2783_v51  ;;  %v2957_v61 = vld [vmem:[%s12513_s7 + $0x250] sm:$0xff] }
 0x436   :  { %6744 = vmatmul.mubr.msk.f32.gmra.mrb[42].mxu0 %vm101_vm0, %v2331_v34  ;;  %v2785_v34 = vld [vmem:[%s12513_s7 + $0x1b0] sm:$0xff] }
 0x437   :  { %6746 = vmatprep.mubr.msk.f32.mxu0 %vm101_vm0, %v2332_v45  ;;  %v2786_v45 = vld [vmem:[%s12513_s7 + $0x1b8] sm:$0xff] }
 0x43a   :  { %6747 = vmatmul.mubr.msk.f32.gmra.mrb[44].mxu0 %vm101_vm0, %v2333_v50  ;;  %v7872_v50 = vpack.c.bf16 %v2786_v45, %v2785_v34  ;;  %v2959_v45 = vld [vmem:[%s12513_s7 + $0x260] sm:$0xff] }
 0x43b   :  { %6749 = vmatprep.mubr.msk.f32.mxu0 %vm101_vm0, %v2334_v52  ;;  %v2787_v52 = vld [vmem:[%s12513_s7 + $0x1c0] sm:$0xff] }
 0x43e   :  { %6750 = vmatmul.mubr.msk.f32.gmra.mrb[46].mxu0 %vm101_vm0, %v2335_v57  ;;  %v2788_v57 = vld [vmem:[%s12513_s7 + $0x1c8] sm:$0xff] }
 0x43f   :  { %6752 = vmatprep.mubr.msk.f32.mxu0 %vm101_vm0, %v2336_v59  ;;  %v7876_v59 = vpack.c.bf16 %v2788_v57, %v2787_v52  ;;  %v2961_v57 = vld [vmem:[%s12513_s7 + $0x270] sm:$0xff] }
 0x442   :  { %6753 = vmatmul.mubr.msk.f32.gmra.mrb[48].mxu0 %vm101_vm0, %v2337_v60  ;;  %v2789_v60 = vld [vmem:[%s12513_s7 + $0x1d0] sm:$0xff] }
 0x443   :  { %6755 = vmatprep.mubr.msk.f32.mxu0 %vm101_vm0, %v2338_v29  ;;  %v2790_v29 = vld [vmem:[%s12513_s7 + $0x1d8] sm:$0xff] }
 0x446   :  { %6756 = vmatmul.mubr.msk.f32.gmra.mrb[50].mxu0 %vm101_vm0, %v2339_v46  ;;  %v7880_v46 = vpack.c.bf16 %v2790_v29, %v2789_v60  ;;  %v3042_v29 = vld [vmem:[%s12513_s7 + $0x280] sm:$0xff] }
 0x447   :  { %6758 = vmatprep.mubr.msk.f32.mxu0 %vm101_vm0, %v2340_v0  ;;  %v2791_v0 = vld [vmem:[%s12513_s7 + $0x1e0] sm:$0xff] }
 0x44a   :  { %6759 = vmatmul.mubr.msk.f32.gmra.mrb[52].mxu0 %vm101_vm0, %v2341_v63  ;;  %v2792_v63 = vld [vmem:[%s12513_s7 + $0x1e8] sm:$0xff] }
 0x44b   :  { %6761 = vmatprep.mubr.msk.f32.mxu0 %vm101_vm0, %v2342_v5  ;;  %v7884_v42 = vpack.c.bf16 %v2792_v63, %v2791_v0 }
 0x44e   :  { %6762 = vmatmul.mubr.msk.f32.gmra.mrb[54].mxu0 %vm101_vm0, %v2343_v7 }
 0x44f   :  { %6764 = vmatprep.mubr.msk.f32.mxu0 %vm101_vm0, %v2344_v8  ;;  %v2595_v8 = vld [vmem:[%s12513_s7 + $0x90] sm:$0xff] }
 0x452   :  { %6765 = vmatmul.mubr.msk.f32.gmra.mrb[56].mxu0 %vm101_vm0, %v2345_v62  ;;  %v2596_v62 = vld [vmem:[%s12513_s7 + $0x98] sm:$0xff] }
 0x505   :  { %v6742_v10 = vpop.f32.mrb[40].mxu0 }
 0x506   :  { %v2466_v13 = vpop.f32.mrb[41].mxu0 }
 0x509   :  { %v10270_v2 = vpop.f32.mrb[42].mxu0 }
 0x50a   :  { %v10272_v15 = vpop.f32.mrb[43].mxu0 }
 0x50d   :  { %v6748_v19 = vpop.f32.mrb[44].mxu0 }
 0x50e   :  { %v2486_v24 = vpop.f32.mrb[45].mxu0 }
 0x50f   :  { %6799 = vmatprep.mubr.f32.mxu1 %v2486_v24  ;;  %v2599_v24 = vld [vmem:[%s12513_s7 + $0xb0] sm:$0xff] }
 0x510   :  { %6800 = vmatmul.mubr.f32.vlgmr.msra.gmra.mrb[144].mxu1 %v6748_v19  ;;  %v7900_v19 = vpack.c.bf16 %v2598_v17, %v2597_v20  ;;  %v3052_v17 = vld [vmem:[%s12513_s7 + $0x2d0] sm:$0xff] }
 0x511   :  { %7831 = vmatpush3.bf16.msra.mxu1 %v7828_v58  ;;  %6834 = vmatprep.mubr.f32.mxu1 %v2466_v13  ;;  %v10286_v25 = vpop.f32.mrb[46].mxu0  ;;  %v2594_v58 = vld [vmem:[%s12513_s7 + $0x88] sm:$0xff]  ;;  %v7896_v13 = vpack.c.bf16 %v2596_v62, %v2595_v8  ;;  %v3048_v8 = vld [vmem:[%s12513_s7 + $0x2b0] sm:$0xff]  ;;  %v3049_v62 = vld [vmem:[%s12513_s7 + $0x2b8] sm:$0xff] }
 0x512   :  { %7833 = vmatprep.subr.bf16.mxu1 %v7832_v47  ;;  %v2496_v1 = vpop.f32.mrb[47].mxu0  ;;  %v7892_v5 = vpack.c.bf16 %v2594_v58, %v2593_v56  ;;  %v3046_v56 = vld [vmem:[%s12513_s7 + $0x2a0] sm:$0xff]  ;;  %v3047_v58 = vld [vmem:[%s12513_s7 + $0x2a8] sm:$0xff] }
 0x515   :  { %7835 = vmatpush3.bf16.msra.mxu1 %v7832_v47  ;;  %v10294_v30 = vpop.f32.mrb[48].mxu0  ;;  %v2600_v47 = vld [vmem:[%s12513_s7 + $0xb8] sm:$0xff] }
 0x516   :  { %7837 = vmatprep.subr.bf16.mxu1 %v7836_v32  ;;  %v10296_v9 = vpop.f32.mrb[49].mxu0  ;;  %v7904_v55 = vpack.c.bf16 %v2600_v47, %v2599_v24  ;;  %v3054_v47 = vld [vmem:[%s12513_s7 + $0x2e0] sm:$0xff] }
 0x519   :  { %7839 = vmatpush3.bf16.msra.mxu1 %v7836_v32  ;;  %v10328_v23 = vpop.f32.mrb[50].mxu0  ;;  %v2603_v32 = vld [vmem:[%s12513_s7 + $0xd0] sm:$0xff] }
 0x51a   :  { %7841 = vmatprep.subr.bf16.mxu1 %v7840_v39  ;;  %v10336_v27 = vpop.f32.mrb[51].mxu0 }
 0x51d   :  { %7843 = vmatpush3.bf16.msra.mxu1 %v7840_v39  ;;  %v10380_v7 = vpop.f32.mrb[52].mxu0  ;;  %v2606_v39 = vld [vmem:[%s12513_s7 + $0xe8] sm:$0xff] }
 0x51e   :  { %7845 = vmatprep.subr.bf16.mxu1 %v7844_v31  ;;  %v7916_v16 = vpack.c.bf16 %v2606_v39, %v2605_v35  ;;  %v3139_v39 = vld [vmem:[%s12513_s7 + $0x310] sm:$0xff] }
 0x521   :  { %7847 = vmatpush3.bf16.msra.mxu1 %v7844_v31  ;;  %v2608_v31 = vld [vmem:[%s12513_s7 + $0xf8] sm:$0xff] }
 0x522   :  { %7849 = vmatprep.subr.bf16.mxu1 %v7848_v26  ;;  %v7920_v36 = vpack.c.bf16 %v2608_v31, %v2607_v22  ;;  %v3141_v31 = vld [vmem:[%s12513_s7 + $0x320] sm:$0xff] }
 0x525   :  { %7851 = vmatpush3.bf16.msra.mxu1 %v7848_v26  ;;  %v2948_v26 = vld [vmem:[%s12513_s7 + $0x208] sm:$0xff] }
 0x526   :  { %7853 = vmatprep.subr.bf16.mxu1 %v7852_v43  ;;  %v7924_v37 = vpack.c.bf16 %v2948_v26, %v2947_v28  ;;  %v3143_v26 = vld [vmem:[%s12513_s7 + $0x330] sm:$0xff] }
 0x529   :  { %7855 = vmatpush3.bf16.msra.mxu1 %v7852_v43  ;;  %v2950_v43 = vld [vmem:[%s12513_s7 + $0x218] sm:$0xff] }
 0x52a   :  { %7857 = vmatprep.subr.bf16.mxu1 %v7856_v14  ;;  %v7928_v6 = vpack.c.bf16 %v2950_v43, %v2949_v38 }
 0x52d   :  { %7859 = vmatpush3.bf16.msra.mxu1 %v7856_v14 }
 0x52e   :  { %7861 = vmatprep.subr.bf16.mxu1 %v7860_v18 }
 0x530   :  { %6835 = vmatmul.mubr.f32.vlgmr.msra.gmra.mrb[144].mxu1 %v6742_v10  ;;  %v10388_v10 = vpop.f32.mrb[53].mxu0 }
 0x531   :  { %7863 = vmatpush3.bf16.msra.mxu1 %v7860_v18  ;;  %6869 = vmatprep.mubr.f32.mxu1 %v2496_v1  ;;  %v2604_v1 = vld [vmem:[%s12513_s7 + $0xd8] sm:$0xff]  ;;  %v10440_v48 = vpop.f32.mrb[54].mxu0  ;;  %v7932_v18 = vpack.c.bf16 %v2952_v53, %v2951_v41 }
 0x532   :  { %7865 = vmatprep.subr.bf16.mxu1 %v7864_v33  ;;  %v7912_v4 = vpack.c.bf16 %v2604_v1, %v2603_v32  ;;  %v10442_v14 = vpop.f32.mrb[55].mxu0  ;;  %v3137_v1 = vld [vmem:[%s12513_s7 + $0x300] sm:$0xff]  ;;  %v3148_v41 = vld [vmem:[%s12513_s7 + $0x358] sm:$0xff] }
 0x533   :  { %v10488_v63 = vpop.f32.mrb[56].mxu0 }
 0x534   :  { %v10496_v3 = vpop.f32.mrb[57].mxu0 }
 0x535   :  { %7867 = vmatpush3.bf16.msra.mxu1 %v7864_v33  ;;  %v7936_v33 = vpack.c.bf16 %v2954_v12, %v2953_v54  ;;  %v3150_v54 = vld [vmem:[%s12513_s7 + $0x368] sm:$0xff] }
 0x536   :  { %7869 = vmatprep.subr.bf16.mxu1 %v7868_v40 }
 0x539   :  { %7871 = vmatpush3.bf16.msra.mxu1 %v7868_v40  ;;  %v2958_v40 = vld [vmem:[%s12513_s7 + $0x258] sm:$0xff] }
 0x53a   :  { %7873 = vmatprep.subr.bf16.mxu1 %v7872_v50  ;;  %v7944_v34 = vpack.c.bf16 %v2958_v40, %v2957_v61  ;;  %v3233_v61 = vld [vmem:[%s12513_s7 + $0x388] sm:$0xff] }
 0x53d   :  { %7875 = vmatpush3.bf16.msra.mxu1 %v7872_v50  ;;  %v2960_v50 = vld [vmem:[%s12513_s7 + $0x268] sm:$0xff] }
 0x53e   :  { %7877 = vmatprep.subr.bf16.mxu1 %v7876_v59  ;;  %v7948_v52 = vpack.c.bf16 %v2960_v50, %v2959_v45  ;;  %v3235_v45 = vld [vmem:[%s12513_s7 + $0x398] sm:$0xff] }
 0x541   :  { %7879 = vmatpush3.bf16.msra.mxu1 %v7876_v59  ;;  %v2962_v59 = vld [vmem:[%s12513_s7 + $0x278] sm:$0xff] }
 0x542   :  { %7881 = vmatprep.subr.bf16.mxu1 %v7880_v46  ;;  %v7952_v60 = vpack.c.bf16 %v2962_v59, %v2961_v57  ;;  %v3237_v57 = vld [vmem:[%s12513_s7 + $0x3a8] sm:$0xff] }
 0x545   :  { %7883 = vmatpush3.bf16.msra.mxu1 %v7880_v46  ;;  %v3043_v46 = vld [vmem:[%s12513_s7 + $0x288] sm:$0xff] }
 0x546   :  { %7885 = vmatprep.subr.bf16.mxu1 %v7884_v42  ;;  %v7956_v0 = vpack.c.bf16 %v3043_v46, %v3042_v29  ;;  %v3239_v29 = vld [vmem:[%s12513_s7 + $0x3b8] sm:$0xff] }
 0x549   :  { %7887 = vmatpush3.bf16.msra.mxu1 %v7884_v42  ;;  %v3044_v42 = vld [vmem:[%s12513_s7 + $0x290] sm:$0xff] }
 0x54a   :  { %7889 = vmatprep.subr.bf16.mxu1 %v7888_v11 }
 0x54d   :  { %7891 = vmatpush3.bf16.msra.mxu1 %v7888_v11  ;;  %v7960_v11 = vpack.c.bf16 %v3045_v49, %v3044_v42  ;;  %v3242_v42 = vld [vmem:[%s12513_s7 + $0x3d0] sm:$0xff]  ;;  %v3243_v49 = vld [vmem:[%s12513_s7 + $0x3d8] sm:$0xff] }
 0x54e   :  { %7893 = vmatprep.subr.bf16.mxu1 %v7892_v5 }
 0x550   :  { %6870 = vmatmul.mubr.f32.vlgmr.msra.gmra.mrb[144].mxu1 %v10286_v25 }
 0x551   :  { %7895 = vmatpush3.bf16.msra.mxu1 %v7892_v5  ;;  %6904 = vmatprep.mubr.f32.mxu1 %v10272_v15  ;;  %v2602_v15 = vld [vmem:[%s12513_s7 + $0xc8] sm:$0xff]  ;;  %v7964_v5 = vpack.c.bf16 %v3047_v58, %v3046_v56  ;;  %v3244_v56 = vld [vmem:[%s12513_s7 + $0x3e0] sm:$0xff] }
 0x552   :  { %7897 = vmatprep.subr.bf16.mxu1 %v7896_v13  ;;  %v7908_v25 = vpack.c.bf16 %v2602_v15, %v2601_v21  ;;  %v3056_v15 = vld [vmem:[%s12513_s7 + $0x2f0] sm:$0xff]  ;;  %v3245_v58 = vld [vmem:[%s12513_s7 + $0x3e8] sm:$0xff] }
 0x555   :  { %7899 = vmatpush3.bf16.msra.mxu1 %v7896_v13  ;;  %v7968_v13 = vpack.c.bf16 %v3049_v62, %v3048_v8  ;;  %v3246_v8 = vld [vmem:[%s12513_s7 + $0x3f0] sm:$0xff]  ;;  %v3247_v62 = vld [vmem:[%s12513_s7 + $0x3f8] sm:$0xff] }
 0x556   :  { %7901 = vmatprep.subr.bf16.mxu1 %v7900_v19 }
 0x559   :  { %7903 = vmatpush3.bf16.msra.mxu1 %v7900_v19  ;;  %v3053_v19 = vld [vmem:[%s12513_s7 + $0x2d8] sm:$0xff] }
 0x55a   :  { %7905 = vmatprep.subr.bf16.mxu1 %v7904_v55  ;;  %v7976_v24 = vpack.c.bf16 %v3053_v19, %v3052_v17  ;;  %v3329_v17 = vld [vmem:[%s12513_s7 + $0x410] sm:$0xff]  ;;  %v3330_v19 = vld [vmem:[%s12513_s7 + $0x418] sm:$0xff] }
 0x55d   :  { %7907 = vmatpush3.bf16.msra.mxu1 %v7904_v55  ;;  %v3055_v55 = vld [vmem:[%s12513_s7 + $0x2e8] sm:$0xff] }
 0x55e   :  { %7909 = vmatprep.subr.bf16.mxu1 %v7908_v25  ;;  %v7980_v21 = vpack.c.bf16 %v3055_v55, %v3054_v47  ;;  %v3331_v47 = vld [vmem:[%s12513_s7 + $0x420] sm:$0xff]  ;;  %v3332_v55 = vld [vmem:[%s12513_s7 + $0x428] sm:$0xff] }
 0x561   :  { %7911 = vmatpush3.bf16.msra.mxu1 %v7908_v25  ;;  %v3057_v25 = vld [vmem:[%s12513_s7 + $0x2f8] sm:$0xff] }
 0x562   :  { %7913 = vmatprep.subr.bf16.mxu1 %v7912_v4  ;;  %v7984_v32 = vpack.c.bf16 %v3057_v25, %v3056_v15  ;;  %v3333_v15 = vld [vmem:[%s12513_s7 + $0x430] sm:$0xff]  ;;  %v3334_v25 = vld [vmem:[%s12513_s7 + $0x438] sm:$0xff] }
 0x565   :  { %7915 = vmatpush3.bf16.msra.mxu1 %v7912_v4  ;;  %v3138_v4 = vld [vmem:[%s12513_s7 + $0x308] sm:$0xff] }
 0x566   :  { %7917 = vmatprep.subr.bf16.mxu1 %v7916_v16  ;;  %v7988_v35 = vpack.c.bf16 %v3138_v4, %v3137_v1  ;;  %v3337_v4 = vld [vmem:[%s12513_s7 + $0x450] sm:$0xff] }
 0x569   :  { %7919 = vmatpush3.bf16.msra.mxu1 %v7916_v16  ;;  %v3140_v16 = vld [vmem:[%s12513_s7 + $0x318] sm:$0xff] }
 0x56a   :  { %7921 = vmatprep.subr.bf16.mxu1 %v7920_v36  ;;  %v7992_v22 = vpack.c.bf16 %v3140_v16, %v3139_v39  ;;  %v3339_v16 = vld [vmem:[%s12513_s7 + $0x460] sm:$0xff] }
 0x56d   :  { %7923 = vmatpush3.bf16.msra.mxu1 %v7920_v36  ;;  %v3142_v36 = vld [vmem:[%s12513_s7 + $0x328] sm:$0xff] }
 0x56e   :  { %7925 = vmatprep.subr.bf16.mxu1 %v7924_v37  ;;  %v7996_v28 = vpack.c.bf16 %v3142_v36, %v3141_v31  ;;  %v3341_v36 = vld [vmem:[%s12513_s7 + $0x470] sm:$0xff] }
 0x570   :  { %6905 = vmatmul.mubr.f32.vlgmr.msra.gmra.mrb[144].mxu1 %v10270_v2  ;;  %v2955_v2 = vld [vmem:[%s12513_s7 + $0x240] sm:$0xff] }
 0x571   :  { %7927 = vmatpush3.bf16.msra.mxu1 %v7924_v37  ;;  %6939 = vmatprep.mubr.f32.mxu1 %v10296_v9  ;;  %v2956_v9 = vld [vmem:[%s12513_s7 + $0x248] sm:$0xff]  ;;  %v3144_v37 = vld [vmem:[%s12513_s7 + $0x338] sm:$0xff] }
 0x572   :  { %7929 = vmatprep.subr.bf16.mxu1 %v7928_v6  ;;  %v7940_v51 = vpack.c.bf16 %v2956_v9, %v2955_v2  ;;  %v8000_v38 = vpack.c.bf16 %v3144_v37, %v3143_v26  ;;  %v3152_v2 = vld [vmem:[%s12513_s7 + $0x378] sm:$0xff]  ;;  %v8814_v37 = vmov 0.0  }
 0x573   :  { %7086 = vmatprep.mubr.msk.f32.mxu0 %vm8813_vm1, %v8814_v37 }
 0x575   :  { %7931 = vmatpush3.bf16.msra.mxu1 %v7928_v6  ;;  %v3147_v6 = vld [vmem:[%s12513_s7 + $0x350] sm:$0xff] }
 0x576   :  { %7933 = vmatprep.subr.bf16.mxu1 %v7932_v18  ;;  %v8008_v53 = vpack.c.bf16 %v3148_v41, %v3147_v6 }
 0x579   :  { %7935 = vmatpush3.bf16.msra.mxu1 %v7932_v18  ;;  %v3149_v18 = vld [vmem:[%s12513_s7 + $0x360] sm:$0xff] }
 0x57a   :  { %7937 = vmatprep.subr.bf16.mxu1 %v7936_v33  ;;  %v8012_v12 = vpack.c.bf16 %v3150_v54, %v3149_v18  ;;  %v3625_v18 = vld [vmem:[%s12516_s10 + $0x108] sm:$0xff] }
 0x57d   :  { %7939 = vmatpush3.bf16.msra.mxu1 %v7936_v33  ;;  %v3151_v33 = vld [vmem:[%s12513_s7 + $0x370] sm:$0xff] }
 0x57e   :  { %7941 = vmatprep.subr.bf16.mxu1 %v7940_v51  ;;  %v8016_v9 = vpack.c.bf16 %v3152_v2, %v3151_v33  ;;  %v3626_v2 = vld [vmem:[%s12516_s10 + $0x110] sm:$0xff] }
 0x581   :  { %7943 = vmatpush3.bf16.msra.mxu1 %v7940_v51  ;;  %v3232_v51 = vld [vmem:[%s12513_s7 + $0x380] sm:$0xff] }
 0x582   :  { %7945 = vmatprep.subr.bf16.mxu1 %v7944_v34  ;;  %v8020_v40 = vpack.c.bf16 %v3233_v61, %v3232_v51  ;;  %v3434_v51 = vld [vmem:[%s12515_s9 + $0x8] sm:$0xff] }
 0x585   :  { %7947 = vmatpush3.bf16.msra.mxu1 %v7944_v34  ;;  %v3234_v34 = vld [vmem:[%s12513_s7 + $0x390] sm:$0xff] }
 0x586   :  { %7949 = vmatprep.subr.bf16.mxu1 %v7948_v52  ;;  %v8024_v50 = vpack.c.bf16 %v3235_v45, %v3234_v34  ;;  %v3629_v34 = vld [vmem:[%s12516_s10 + $0x128] sm:$0xff]  ;;  %v3435_v45 = vld [vmem:[%s12515_s9 + $0x10] sm:$0xff] }
 0x589   :  { %7951 = vmatpush3.bf16.msra.mxu1 %v7948_v52  ;;  %v3236_v52 = vld [vmem:[%s12513_s7 + $0x3a0] sm:$0xff] }
 0x58a   :  { %7953 = vmatprep.subr.bf16.mxu1 %v7952_v60  ;;  %v8028_v59 = vpack.c.bf16 %v3237_v57, %v3236_v52  ;;  %v3630_v52 = vld [vmem:[%s12516_s10 + $0x130] sm:$0xff]  ;;  %v3631_v57 = vld [vmem:[%s12516_s10 + $0x138] sm:$0xff] }
 0x58d   :  { %7955 = vmatpush3.bf16.msra.mxu1 %v7952_v60  ;;  %v3238_v60 = vld [vmem:[%s12513_s7 + $0x3b0] sm:$0xff] }
 0x58e   :  { %7957 = vmatprep.subr.bf16.mxu1 %v7956_v0  ;;  %v8032_v46 = vpack.c.bf16 %v3239_v29, %v3238_v60  ;;  %v8097_v60 = vpack.c.bf16 %v3631_v57, %v3630_v52  ;;  %v3632_v29 = vld [vmem:[%s12516_s10 + $0x140] sm:$0xff] }
 0x590   :  { %6940 = vmatmul.mubr.f32.vlgmr.msra.gmra.mrb[144].mxu1 %v10294_v30  ;;  %v3050_v30 = vld [vmem:[%s12513_s7 + $0x2c0] sm:$0xff] }
 0x591   :  { %7959 = vmatpush3.bf16.msra.mxu1 %v7956_v0  ;;  %6974 = vmatprep.mubr.f32.mxu1 %v10336_v27  ;;  %v3051_v27 = vld [vmem:[%s12513_s7 + $0x2c8] sm:$0xff] }
 0x592   :  { %7961 = vmatprep.subr.bf16.mxu1 %v7960_v11  ;;  %v7972_v20 = vpack.c.bf16 %v3051_v27, %v3050_v30  ;;  %v3327_v30 = vld [vmem:[%s12513_s7 + $0x400] sm:$0xff]  ;;  %v3328_v27 = vld [vmem:[%s12513_s7 + $0x408] sm:$0xff] }
 0x595   :  { %7963 = vmatpush3.bf16.msra.mxu1 %v7960_v11  ;;  %v8040_v11 = vpack.c.bf16 %v3243_v49, %v3242_v42  ;;  %v3635_v42 = vld [vmem:[%s12516_s10 + $0x158] sm:$0xff]  ;;  %v3438_v49 = vld [vmem:[%s12515_s9 + $0x28] sm:$0xff] }
 0x596   :  { %7965 = vmatprep.subr.bf16.mxu1 %v7964_v5 }
 0x599   :  { %7967 = vmatpush3.bf16.msra.mxu1 %v7964_v5  ;;  %v8044_v5 = vpack.c.bf16 %v3245_v58, %v3244_v56  ;;  %v3636_v56 = vld [vmem:[%s12516_s10 + $0x160] sm:$0xff]  ;;  %v3637_v58 = vld [vmem:[%s12516_s10 + $0x168] sm:$0xff] }
 0x59a   :  { %7969 = vmatprep.subr.bf16.mxu1 %v7968_v13 }
 0x59d   :  { %7971 = vmatpush3.bf16.msra.mxu1 %v7968_v13  ;;  %v8048_v13 = vpack.c.bf16 %v3247_v62, %v3246_v8  ;;  %v8106_v8 = vpack.c.bf16 %v3637_v58, %v3636_v56  ;;  %v3440_v62 = vld [vmem:[%s12515_s9 + $0x38] sm:$0xff] }
 0x59e   :  { %7973 = vmatprep.subr.bf16.mxu1 %v7972_v20 }
 0x5a1   :  { %7975 = vmatpush3.bf16.msra.mxu1 %v7972_v20  ;;  %v8052_v20 = vpack.c.bf16 %v3328_v27, %v3327_v30  ;;  %v3639_v30 = vld [vmem:[%s12516_s10 + $0x178] sm:$0xff] }
 0x5a2   :  { %7977 = vmatprep.subr.bf16.mxu1 %v7976_v24 }
 0x5a5   :  { %7979 = vmatpush3.bf16.msra.mxu1 %v7976_v24  ;;  %v8056_v24 = vpack.c.bf16 %v3330_v19, %v3329_v17 }
 0x5a6   :  { %7981 = vmatprep.subr.bf16.mxu1 %v7980_v21 }
 0x5a9   :  { %7983 = vmatpush3.bf16.msra.mxu1 %v7980_v21  ;;  %v8060_v21 = vpack.c.bf16 %v3332_v55, %v3331_v47  ;;  %v3591_v47 = vld [vmem:[%s12516_s10 + $0x8] sm:$0xff] }
 0x5aa   :  { %7985 = vmatprep.subr.bf16.mxu1 %v7984_v32 }
 0x5ad   :  { %7987 = vmatpush3.bf16.msra.mxu1 %v7984_v32  ;;  %v8064_v32 = vpack.c.bf16 %v3334_v25, %v3333_v15  ;;  %v3592_v25 = vld [vmem:[%s12516_s10 + $0x10] sm:$0xff] }
 0x5ae   :  { %7989 = vmatprep.subr.bf16.mxu1 %v7988_v35 }
 0x5b0   :  { %6975 = vmatmul.mubr.f32.vlgmr.msra.gmra.mrb[144].mxu1 %v10328_v23  ;;  %v3145_v23 = vld [vmem:[%s12513_s7 + $0x340] sm:$0xff] }
 0x5b1   :  { %7991 = vmatpush3.bf16.msra.mxu1 %v7988_v35  ;;  %7009 = vmatprep.mubr.f32.mxu1 %v10388_v10  ;;  %v3146_v10 = vld [vmem:[%s12513_s7 + $0x348] sm:$0xff]  ;;  %v3338_v35 = vld [vmem:[%s12513_s7 + $0x458] sm:$0xff] }
 0x5b2   :  { %7993 = vmatprep.subr.bf16.mxu1 %v7992_v22  ;;  %v8004_v43 = vpack.c.bf16 %v3146_v10, %v3145_v23  ;;  %v8072_v39 = vpack.c.bf16 %v3338_v35, %v3337_v4  ;;  %v4203_v4 = vld [vmem:[%s12516_s10 + $0x388] sm:$0xff] }
 0x5b5   :  { %7995 = vmatpush3.bf16.msra.mxu1 %v7992_v22  ;;  %v3340_v22 = vld [vmem:[%s12513_s7 + $0x468] sm:$0xff] }
 0x5b6   :  { %7997 = vmatprep.subr.bf16.mxu1 %v7996_v28  ;;  %v8076_v31 = vpack.c.bf16 %v3340_v22, %v3339_v16  ;;  %v3594_v16 = vld [vmem:[%s12516_s10 + $0x20] sm:$0xff]  ;;  %v3595_v22 = vld [vmem:[%s12516_s10 + $0x28] sm:$0xff] }
 0x5b9   :  { %7999 = vmatpush3.bf16.msra.mxu1 %v7996_v28  ;;  %v3342_v28 = vld [vmem:[%s12513_s7 + $0x478] sm:$0xff] }
 0x5ba   :  { %8001 = vmatprep.subr.bf16.mxu1 %v8000_v38  ;;  %v8080_v26 = vpack.c.bf16 %v3342_v28, %v3341_v36  ;;  %v4204_v28 = vld [vmem:[%s12516_s10 + $0x390] sm:$0xff] }
 0x5bd   :  { %8003 = vmatpush3.bf16.msra.mxu1 %v8000_v38  ;;  %v5504_v38 = vld [vmem:[%s12514_s8] ss:$0 sm:$0xff] }
 0x5be   :  { %8005 = vmatprep.subr.bf16.mxu1 %v8004_v43 }
 0x5c1   :  { %8007 = vmatpush3.bf16.msra.mxu1 %v8004_v43 }
 0x5c2   :  { %8009 = vmatprep.subr.bf16.mxu1 %v8008_v53 }
 0x5c5   :  { %8011 = vmatpush3.bf16.msra.mxu1 %v8008_v53 }
 0x5c6   :  { %8013 = vmatprep.subr.bf16.mxu1 %v8012_v12 }
 0x5c9   :  { %8015 = vmatpush3.bf16.msra.mxu1 %v8012_v12  ;;  %v3433_v12 = vld [vmem:[%s12515_s9] sm:$0xff] }
 0x5ca   :  { %8017 = vmatprep.subr.bf16.mxu1 %v8016_v9 }
 0x5cd   :  { %8019 = vmatpush3.bf16.msra.mxu1 %v8016_v9  ;;  %v3627_v9 = vld [vmem:[%s12516_s10 + $0x118] sm:$0xff] }
 0x5ce   :  { %8021 = vmatprep.subr.bf16.mxu1 %v8020_v40  ;;  %v8091_v61 = vpack.c.bf16 %v3627_v9, %v3626_v2  ;;  %v4208_v2 = vld [vmem:[%s12516_s10 + $0x3b0] sm:$0xff]  ;;  %v4209_v9 = vld [vmem:[%s12516_s10 + $0x3b8] sm:$0xff] }
 0x5d0   :  { %7010 = vmatmul.mubr.f32.vlgmr.msra.gmra.mrb[144].mxu1 %v10380_v7  ;;  %v3240_v7 = vld [vmem:[%s12513_s7 + $0x3c0] sm:$0xff] }
 0x5d1   :  { %8023 = vmatpush3.bf16.msra.mxu1 %v8020_v40  ;;  %7044 = vmatprep.mubr.f32.mxu1 %v10442_v14  ;;  %v3241_v14 = vld [vmem:[%s12513_s7 + $0x3c8] sm:$0xff]  ;;  %v3628_v40 = vld [vmem:[%s12516_s10 + $0x120] sm:$0xff] }
 0x5d2   :  { %8025 = vmatprep.subr.bf16.mxu1 %v8024_v50  ;;  %v8036_v0 = vpack.c.bf16 %v3241_v14, %v3240_v7  ;;  %v3437_v7 = vld [vmem:[%s12515_s9 + $0x20] sm:$0xff] }
 0x5d5   :  { %8027 = vmatpush3.bf16.msra.mxu1 %v8024_v50  ;;  %v8094_v50 = vpack.c.bf16 %v3629_v34, %v3628_v40  ;;  %v3600_v40 = vld [vmem:[%s12516_s10 + $0x50] sm:$0xff]  ;;  %v3601_v34 = vld [vmem:[%s12516_s10 + $0x58] sm:$0xff] }
 0x5d6   :  { %8029 = vmatprep.subr.bf16.mxu1 %v8028_v59  ;;  %v8127_v52 = vpack.c.bf16 %v3601_v34, %v3600_v40  ;;  %v3614_v34 = vld [vmem:[%s12516_s10 + $0xb8] sm:$0xff] }
 0x5d9   :  { %8031 = vmatpush3.bf16.msra.mxu1 %v8028_v59  ;;  %v3436_v59 = vld [vmem:[%s12515_s9 + $0x18] sm:$0xff] }
 0x5da   :  { %8033 = vmatprep.subr.bf16.mxu1 %v8032_v46 }
 0x5dd   :  { %8035 = vmatpush3.bf16.msra.mxu1 %v8032_v46  ;;  %v3633_v46 = vld [vmem:[%s12516_s10 + $0x148] sm:$0xff] }
 0x5de   :  { %8037 = vmatprep.subr.bf16.mxu1 %v8036_v0  ;;  %v8100_v14 = vpack.c.bf16 %v3633_v46, %v3632_v29  ;;  %v4212_v29 = vld [vmem:[%s12516_s10 + $0x3d0] sm:$0xff]  ;;  %v4213_v46 = vld [vmem:[%s12516_s10 + $0x3d8] sm:$0xff] }
 0x5e1   :  { %8039 = vmatpush3.bf16.msra.mxu1 %v8036_v0  ;;  %v3634_v0 = vld [vmem:[%s12516_s10 + $0x150] sm:$0xff] }
 0x5e2   :  { %8041 = vmatprep.subr.bf16.mxu1 %v8040_v11 }
 0x5e5   :  { %8043 = vmatpush3.bf16.msra.mxu1 %v8040_v11  ;;  %v8103_v11 = vpack.c.bf16 %v3635_v42, %v3634_v0  ;;  %v3604_v0 = vld [vmem:[%s12516_s10 + $0x70] sm:$0xff]  ;;  %v3605_v42 = vld [vmem:[%s12516_s10 + $0x78] sm:$0xff] }
 0x5e6   :  { %8045 = vmatprep.subr.bf16.mxu1 %v8044_v5  ;;  %v8133_v56 = vpack.c.bf16 %v3605_v42, %v3604_v0  ;;  %v3621_v0 = vld [vmem:[%s12516_s10 + $0xf0] sm:$0xff]  ;;  %v3622_v42 = vld [vmem:[%s12516_s10 + $0xf8] sm:$0xff] }
 0x5e9   :  { %8047 = vmatpush3.bf16.msra.mxu1 %v8044_v5  ;;  %v3439_v5 = vld [vmem:[%s12515_s9 + $0x30] sm:$0xff] }
 0x5ea   :  { %8049 = vmatprep.subr.bf16.mxu1 %v8048_v13 }
 0x5ed   :  { %8051 = vmatpush3.bf16.msra.mxu1 %v8048_v13  ;;  %v3638_v13 = vld [vmem:[%s12516_s10 + $0x170] sm:$0xff] }
 0x5ee   :  { %8053 = vmatprep.subr.bf16.mxu1 %v8052_v20  ;;  %v8109_v27 = vpack.c.bf16 %v3639_v30, %v3638_v13  ;;  %v4216_v30 = vld [vmem:[%s12516_s10 + $0x3f0] sm:$0xff] }
 0x5f0   :  { %7045 = vmatmul.mubr.f32.vlgmr.msra.gmra.mrb[144].mxu1 %v10440_v48  ;;  %v3335_v48 = vld [vmem:[%s12513_s7 + $0x440] sm:$0xff] }
 0x5f1   :  { %8055 = vmatpush3.bf16.msra.mxu1 %v8052_v20  ;;  %7079 = vmatprep.mubr.f32.mxu1 %v10496_v3  ;;  %v3336_v3 = vld [vmem:[%s12513_s7 + $0x448] sm:$0xff]  ;;  %v3441_v20 = vld [vmem:[%s12515_s9 + $0x40] sm:$0xff] }
 0x5f2   :  { %8057 = vmatprep.subr.bf16.mxu1 %v8056_v24  ;;  %v8068_v1 = vpack.c.bf16 %v3336_v3, %v3335_v48 }
 0x5f5   :  { %8059 = vmatpush3.bf16.msra.mxu1 %v8056_v24  ;;  %v3590_v24 = vld [vmem:[%s12516_s10] sm:$0xff] }
 0x5f6   :  { %8061 = vmatprep.subr.bf16.mxu1 %v8060_v21  ;;  %v8112_v15 = vpack.c.bf16 %v3591_v47, %v3590_v24  ;;  %v3783_v47 = vld [vmem:[%s12516_s10 + $0x190] sm:$0xff] }
 0x5f9   :  { %8063 = vmatpush3.bf16.msra.mxu1 %v8060_v21 }
 0x5fa   :  { %8065 = vmatprep.subr.bf16.mxu1 %v8064_v32 }
 0x5fd   :  { %8067 = vmatpush3.bf16.msra.mxu1 %v8064_v32  ;;  %v3593_v32 = vld [vmem:[%s12516_s10 + $0x18] sm:$0xff] }
 0x5fe   :  { %8069 = vmatprep.subr.bf16.mxu1 %v8068_v1  ;;  %v8115_v35 = vpack.c.bf16 %v3593_v32, %v3592_v25 }
 0x601   :  { %8071 = vmatpush3.bf16.msra.mxu1 %v8068_v1  ;;  %v4202_v1 = vld [vmem:[%s12516_s10 + $0x380] sm:$0xff] }
 0x602   :  { %8073 = vmatprep.subr.bf16.mxu1 %v8072_v39 }
 0x605   :  { %8075 = vmatpush3.bf16.msra.mxu1 %v8072_v39  ;;  %v8256_v39 = vpack.c.bf16 %v4203_v4, %v4202_v1  ;;  %v3786_v1 = vld [vmem:[%s12516_s10 + $0x1a8] sm:$0xff]  ;;  %v3787_v4 = vld [vmem:[%s12516_s10 + $0x1b0] sm:$0xff] }
 0x606   :  { %8077 = vmatprep.subr.bf16.mxu1 %v8076_v31 }
 0x609   :  { %8079 = vmatpush3.bf16.msra.mxu1 %v8076_v31 }
 0x60a   :  { %8081 = vmatprep.subr.bf16.mxu1 %v8080_v26 }
 0x60d   :  { %8083 = vmatpush3.bf16.msra.mxu1 %v8080_v26  ;;  %v4205_v26 = vld [vmem:[%s12516_s10 + $0x398] sm:$0xff] }
 0x60e   :  { %8687 = vmatprep.subr.bf16.mxu1 %v8812_v44 }
 0x610   :  { %7080 = vmatmul.mubr.f32.vlgmr.msra.gmra.mrb[144].mxu1 %v10488_v63  ;;  %v3624_v63 = vld [vmem:[%s12516_s10 + $0x100] sm:$0xff] }
 0x611   :  { %7110 = vmatprep.mubr.msk.f32.mxu1 %vm8813_vm1, %v8814_v37  ;;  %v8088_v33 = vpack.c.bf16 %v3625_v18, %v3624_v63 }
 0x6e3   :  { %v7081_v23 = vpop.f32.mrb[144].mxu1 }
 0x6e4   :  { %v3430_v10 = vadd.f32 %v7081_v23, %v5504_v38  ;;  %v3409_v43 = vpop.f32.mrb[145].mxu1  ;;  %v8259_v23 = vpack.c.bf16 %v4205_v26, %v4204_v28  ;;  %v3791_v28 = vld [vmem:[%s12516_s10 + $0x1d0] sm:$0xff]  ;;  %v3792_v26 = vld [vmem:[%s12516_s10 + $0x1d8] sm:$0xff] }
 0x6e5   :  { %v3429_v6 = vadd.f32 %v5504_v38, %v3409_v43  ;;  %v8118_v38 = vpack.c.bf16 %v3595_v22, %v3594_v16  ;;  %v3597_v43 = vld [vmem:[%s12516_s10 + $0x38] sm:$0xff]  ;;  %v3789_v16 = vld [vmem:[%s12516_s10 + $0x1c0] sm:$0xff]  ;;  %v3790_v22 = vld [vmem:[%s12516_s10 + $0x1c8] sm:$0xff] }
 0x6e6   :  { %v3432_v41 = vmax.f32 %v3430_v10, 0.0  ;;  %v3596_v10 = vld [vmem:[%s12516_s10 + $0x30] sm:$0xff] }
 0x6e7   :  { %v3431_v53 = vmax.f32 %v3429_v6, 0.0  ;;  %v8121_v18 = vpack.c.bf16 %v3597_v43, %v3596_v10  ;;  %v3794_v10 = vld [vmem:[%s12516_s10 + $0x1e8] sm:$0xff] }
 0x6e9   :  { %v8085_v54 = vpack.c.bf16 %v3432_v41, %v3431_v53  ;;  %v4206_v41 = vld [vmem:[%s12516_s10 + $0x3a0] sm:$0xff]  ;;  %v4207_v53 = vld [vmem:[%s12516_s10 + $0x3a8] sm:$0xff] }
 0x6eb   :  { %8086 = vmatpush3.bf16.msra.mxu0 %v8085_v54  ;;  %8688 = vmatpush3.bf16.msra.mxu1 %v8085_v54  ;;  %v8262_v54 = vpack.c.bf16 %v4207_v53, %v4206_v41  ;;  %v3795_v41 = vld [vmem:[%s12516_s10 + $0x1f0] sm:$0xff]  ;;  %v3796_v53 = vld [vmem:[%s12516_s10 + $0x1f8] sm:$0xff] }
 0x6ec   :  { %8087 = vmatprep.subr.bf16.mxu0 %v8812_v44  ;;  %8255 = vmatprep.subr.bf16.mxu1 %v8812_v44 }
 0x6ee   :  { %7087 = vmatmul.mubr.msk.f32.vlgmr.msra.gmra.mrb[58].mxu0 %vm3442_vm2, %v3433_v12  ;;  %7111 = vmatmul.mubr.msk.f32.vlgmr.msra.gmra.mrb[146].mxu1 %vm3442_vm2, %v3441_v20  ;;  %v3598_v12 = vld [vmem:[%s12516_s10 + $0x40] sm:$0xff] }
 0x6ef   :  { %7089 = vmatprep.mubr.msk.f32.mxu0 %vm8813_vm1, %v8814_v37  ;;  %8089 = vmatpush3.bf16.msra.mxu0 %v8088_v33  ;;  %v3599_v33 = vld [vmem:[%s12516_s10 + $0x48] sm:$0xff] }
 0x6f0   :  { %8090 = vmatprep.subr.bf16.mxu0 %v8812_v44  ;;  %7390 = vmatprep.mubr.msk.f32.mxu1 %vm8813_vm1, %v8814_v37 }
 0x6f1   :  { %8257 = vmatpush3.bf16.msra.mxu1 %v8256_v39 }
 0x6f2   :  { %7090 = vmatmul.mubr.msk.f32.gmra.mrb[60].mxu0 %vm3442_vm2, %v3434_v51  ;;  %8258 = vmatprep.subr.bf16.mxu1 %v8812_v44  ;;  %v8124_v51 = vpack.c.bf16 %v3599_v33, %v3598_v12  ;;  %v3609_v33 = vld [vmem:[%s12516_s10 + $0x90] sm:$0xff] }
 0x6f3   :  { %7092 = vmatprep.mubr.msk.f32.mxu0 %vm8813_vm1, %v8814_v37  ;;  %8092 = vmatpush3.bf16.msra.mxu0 %v8091_v61  ;;  %v8265_v61 = vpack.c.bf16 %v4209_v9, %v4208_v2  ;;  %v3610_v2 = vld [vmem:[%s12516_s10 + $0x98] sm:$0xff] }
 0x6f4   :  { %8093 = vmatprep.subr.bf16.mxu0 %v8812_v44  ;;  %v8163_v9 = vpack.c.bf16 %v3610_v2, %v3609_v33  ;;  %v4035_v33 = vld [vmem:[%s12516_s10 + $0x2c8] sm:$0xff] }
 0x6f5   :  { %8260 = vmatpush3.bf16.msra.mxu1 %v8259_v23  ;;  %v3793_v23 = vld [vmem:[%s12516_s10 + $0x1e0] sm:$0xff] }
 0x6f6   :  { %7093 = vmatmul.mubr.msk.f32.gmra.mrb[62].mxu0 %vm3442_vm2, %v3435_v45  ;;  %8261 = vmatprep.subr.bf16.mxu1 %v8812_v44  ;;  %v4210_v45 = vld [vmem:[%s12516_s10 + $0x3c0] sm:$0xff]  ;;  %v8154_v43 = vpack.c.bf16 %v3794_v10, %v3793_v23  ;;  %v4028_v23 = vld [vmem:[%s12516_s10 + $0x290] sm:$0xff]  ;;  %v4029_v10 = vld [vmem:[%s12516_s10 + $0x298] sm:$0xff] }
 0x6f7   :  { %7095 = vmatprep.mubr.msk.f32.mxu0 %vm8813_vm1, %v8814_v37  ;;  %8095 = vmatpush3.bf16.msra.mxu0 %v8094_v50  ;;  %v4211_v50 = vld [vmem:[%s12516_s10 + $0x3c8] sm:$0xff] }
 0x6f8   :  { %8096 = vmatprep.subr.bf16.mxu0 %v8812_v44  ;;  %v8268_v57 = vpack.c.bf16 %v4211_v50, %v4210_v45  ;;  %v3615_v50 = vld [vmem:[%s12516_s10 + $0xc0] sm:$0xff] }
 0x6f9   :  { %8263 = vmatpush3.bf16.msra.mxu1 %v8262_v54  ;;  %v3608_v54 = vld [vmem:[%s12516_s10 + $0x88] sm:$0xff] }
 0x6fa   :  { %7096 = vmatmul.mubr.msk.f32.gmra.mrb[64].mxu0 %vm3442_vm2, %v3436_v59  ;;  %8264 = vmatprep.subr.bf16.mxu1 %v8812_v44  ;;  %v3602_v59 = vld [vmem:[%s12516_s10 + $0x60] sm:$0xff] }
 0x6fb   :  { %7098 = vmatprep.mubr.msk.f32.mxu0 %vm8813_vm1, %v8814_v37  ;;  %8098 = vmatpush3.bf16.msra.mxu0 %v8097_v60  ;;  %v3603_v60 = vld [vmem:[%s12516_s10 + $0x68] sm:$0xff] }
 0x6fc   :  { %8099 = vmatprep.subr.bf16.mxu0 %v8812_v44 }
 0x6fd   :  { %8266 = vmatpush3.bf16.msra.mxu1 %v8265_v61  ;;  %v3612_v61 = vld [vmem:[%s12516_s10 + $0xa8] sm:$0xff] }
 0x6fe   :  { %7099 = vmatmul.mubr.msk.f32.gmra.mrb[66].mxu0 %vm3442_vm2, %v3437_v7  ;;  %8267 = vmatprep.subr.bf16.mxu1 %v8812_v44  ;;  %v8130_v7 = vpack.c.bf16 %v3603_v60, %v3602_v59  ;;  %v3617_v59 = vld [vmem:[%s12516_s10 + $0xd0] sm:$0xff]  ;;  %v3618_v60 = vld [vmem:[%s12516_s10 + $0xd8] sm:$0xff] }
 0x6ff   :  { %7101 = vmatprep.mubr.msk.f32.mxu0 %vm8813_vm1, %v8814_v37  ;;  %8101 = vmatpush3.bf16.msra.mxu0 %v8100_v14  ;;  %v8271_v14 = vpack.c.bf16 %v4213_v46, %v4212_v29  ;;  %v8175_v29 = vpack.c.bf16 %v3618_v60, %v3617_v59  ;;  %v3619_v46 = vld [vmem:[%s12516_s10 + $0xe0] sm:$0xff]  ;;  %v4115_v59 = vld [vmem:[%s12516_s10 + $0x308] sm:$0xff] }
 0x700   :  { %8102 = vmatprep.subr.bf16.mxu0 %v8812_v44 }
 0x701   :  { %8269 = vmatpush3.bf16.msra.mxu1 %v8268_v57 }
 0x702   :  { %7102 = vmatmul.mubr.msk.f32.gmra.mrb[68].mxu0 %vm3442_vm2, %v3438_v49  ;;  %8270 = vmatprep.subr.bf16.mxu1 %v8812_v44  ;;  %v4214_v49 = vld [vmem:[%s12516_s10 + $0x3e0] sm:$0xff] }
 0x703   :  { %7104 = vmatprep.mubr.msk.f32.mxu0 %vm8813_vm1, %v8814_v37  ;;  %8104 = vmatpush3.bf16.msra.mxu0 %v8103_v11  ;;  %v4215_v11 = vld [vmem:[%s12516_s10 + $0x3e8] sm:$0xff] }
 0x704   :  { %8105 = vmatprep.subr.bf16.mxu0 %v8812_v44  ;;  %v8274_v58 = vpack.c.bf16 %v4215_v11, %v4214_v49  ;;  %v8181_v49 = vpack.c.bf16 %v3622_v42, %v3621_v0  ;;  %v3938_v11 = vld [vmem:[%s12516_s10 + $0x200] sm:$0xff]  ;;  %v4119_v0 = vld [vmem:[%s12516_s10 + $0x328] sm:$0xff] }
 0x705   :  { %8272 = vmatpush3.bf16.msra.mxu1 %v8271_v14 }
 0x706   :  { %7105 = vmatmul.mubr.msk.f32.gmra.mrb[70].mxu0 %vm3442_vm2, %v3439_v5  ;;  %8273 = vmatprep.subr.bf16.mxu1 %v8812_v44  ;;  %v3781_v5 = vld [vmem:[%s12516_s10 + $0x180] sm:$0xff] }
 0x707   :  { %7107 = vmatprep.mubr.msk.f32.mxu0 %vm8813_vm1, %v8814_v37  ;;  %8107 = vmatpush3.bf16.msra.mxu0 %v8106_v8  ;;  %v3782_v8 = vld [vmem:[%s12516_s10 + $0x188] sm:$0xff] }
 0x708   :  { %8108 = vmatprep.subr.bf16.mxu0 %v8812_v44  ;;  %v8136_v20 = vpack.c.bf16 %v3782_v8, %v3781_v5  ;;  %v3940_v8 = vld [vmem:[%s12516_s10 + $0x210] sm:$0xff] }
 0x709   :  { %8275 = vmatpush3.bf16.msra.mxu1 %v8274_v58 }
 0x70a   :  { %7108 = vmatmul.mubr.msk.f32.gmra.mrb[72].mxu0 %vm3442_vm2, %v3440_v62  ;;  %8276 = vmatprep.subr.bf16.mxu1 %v8812_v44 }
 0x70b   :  { %7145 = vmatprep.mubr.msk.f32.mxu0 %vm8813_vm1, %v8814_v37  ;;  %8110 = vmatpush3.bf16.msra.mxu0 %v8109_v27  ;;  %v4217_v27 = vld [vmem:[%s12516_s10 + $0x3f8] sm:$0xff] }
 0x70c   :  { %8111 = vmatprep.subr.bf16.mxu0 %v8812_v44  ;;  %v8277_v24 = vpack.c.bf16 %v4217_v27, %v4216_v30 }
 0x70e   :  { %8278 = vmatpush3.bf16.msra.mxu1 %v8277_v24  ;;  %v3943_v24 = vld [vmem:[%s12516_s10 + $0x228] sm:$0xff] }
 0x7c1   :  { %v10807_v17 = vpop.f32.mrb[58].mxu0  ;;  %v11055_v5 = vpop.f32.mrb[146].mxu1 }
 0x7c2   :  { %v7088_v19 = vpop.f32.mrb[59].mxu0  ;;  %v7112_v30 = vpop.f32.mrb[147].mxu1 }
 0x7c3   :  { %v4125_v30 = vld [vmem:[%s12516_s10 + $0x358] sm:$0xff] }
 0x7c5   :  { %v10815_v55 = vpop.f32.mrb[60].mxu0 }
 0x7c6   :  { %v7091_v21 = vpop.f32.mrb[61].mxu0 }
 0x7c7   :  { %v3784_v21 = vld [vmem:[%s12516_s10 + $0x198] sm:$0xff] }
 0x7c8   :  { %v8139_v32 = vpack.c.bf16 %v3784_v21, %v3783_v47  ;;  %v3945_v21 = vld [vmem:[%s12516_s10 + $0x238] sm:$0xff] }
 0x7c9   :  { %v3546_v48 = vpop.f32.mrb[62].mxu0 }
 0x7ca   :  { %7146 = vmatmul.mubr.f32.vlgmr.msra.gmra.mrb[74].mxu0 %v3546_v48  ;;  %v7094_v3 = vpop.f32.mrb[63].mxu0 }
 0x7cb   :  { %8113 = vmatpush3.bf16.msra.mxu0 %v8112_v15  ;;  %7180 = vmatprep.mubr.msk.f32.mxu0 %vm8813_vm1, %v8814_v37  ;;  %v3785_v3 = vld [vmem:[%s12516_s10 + $0x1a0] sm:$0xff] }
 0x7cc   :  { %8114 = vmatprep.subr.bf16.mxu0 %v8812_v44 }
 0x7cd   :  { %v10838_v31 = vpop.f32.mrb[64].mxu0 }
 0x7ce   :  { %v7097_v36 = vpop.f32.mrb[65].mxu0 }
 0x7cf   :  { %8116 = vmatpush3.bf16.msra.mxu0 %v8115_v35  ;;  %v3788_v35 = vld [vmem:[%s12516_s10 + $0x1b8] sm:$0xff]  ;;  %v8148_v36 = vpack.c.bf16 %v3790_v22, %v3789_v16  ;;  %v3952_v16 = vld [vmem:[%s12516_s10 + $0x270] sm:$0xff] }
 0x7d0   :  { %8117 = vmatprep.subr.bf16.mxu0 %v8812_v44  ;;  %v8145_v39 = vpack.c.bf16 %v3788_v35, %v3787_v4  ;;  %v3950_v4 = vld [vmem:[%s12516_s10 + $0x260] sm:$0xff]  ;;  %v3951_v35 = vld [vmem:[%s12516_s10 + $0x268] sm:$0xff]  ;;  %v3953_v22 = vld [vmem:[%s12516_s10 + $0x278] sm:$0xff] }
 0x7d1   :  { %v10854_v6 = vpop.f32.mrb[66].mxu0 }
 0x7d2   :  { %v7100_v63 = vpop.f32.mrb[67].mxu0 }
 0x7d3   :  { %8119 = vmatpush3.bf16.msra.mxu0 %v8118_v38  ;;  %v8151_v38 = vpack.c.bf16 %v3792_v26, %v3791_v28  ;;  %v8157_v63 = vpack.c.bf16 %v3796_v53, %v3795_v41  ;;  %v4026_v28 = vld [vmem:[%s12516_s10 + $0x280] sm:$0xff]  ;;  %v4027_v26 = vld [vmem:[%s12516_s10 + $0x288] sm:$0xff] }
 0x7d4   :  { %8120 = vmatprep.subr.bf16.mxu0 %v8812_v44  ;;  %v4030_v41 = vld [vmem:[%s12516_s10 + $0x2a0] sm:$0xff]  ;;  %v4031_v53 = vld [vmem:[%s12516_s10 + $0x2a8] sm:$0xff] }
 0x7d5   :  { %v10926_v62 = vpop.f32.mrb[68].mxu0 }
 0x7d6   :  { %v7103_v13 = vpop.f32.mrb[69].mxu0 }
 0x7d7   :  { %8122 = vmatpush3.bf16.msra.mxu0 %v8121_v18  ;;  %v3607_v18 = vld [vmem:[%s12516_s10 + $0x80] sm:$0xff]  ;;  %v3941_v13 = vld [vmem:[%s12516_s10 + $0x218] sm:$0xff] }
 0x7d8   :  { %8123 = vmatprep.subr.bf16.mxu0 %v8812_v44  ;;  %v8160_v12 = vpack.c.bf16 %v3608_v54, %v3607_v18  ;;  %v8187_v27 = vpack.c.bf16 %v3941_v13, %v3940_v8  ;;  %v4033_v18 = vld [vmem:[%s12516_s10 + $0x2b8] sm:$0xff]  ;;  %v4124_v13 = vld [vmem:[%s12516_s10 + $0x350] sm:$0xff] }
 0x7d9   :  { %v10935_v19 = vpop.f32.mrb[70].mxu0 }
 0x7da   :  { %v7106_v15 = vpop.f32.mrb[71].mxu0 }
 0x7db   :  { %8125 = vmatpush3.bf16.msra.mxu0 %v8124_v51  ;;  %v3611_v51 = vld [vmem:[%s12516_s10 + $0xa0] sm:$0xff] }
 0x7dc   :  { %8126 = vmatprep.subr.bf16.mxu0 %v8812_v44  ;;  %v8166_v40 = vpack.c.bf16 %v3612_v61, %v3611_v51  ;;  %v4037_v51 = vld [vmem:[%s12516_s10 + $0x2d8] sm:$0xff] }
 0x7dd   :  { %v3571_v25 = vpop.f32.mrb[72].mxu0 }
 0x7de   :  { %v7109_v48 = vpop.f32.mrb[73].mxu0  ;;  %7391 = vmatmul.mubr.f32.vlgmr.msra.gmra.mrb[148].mxu1 %v3571_v25  ;;  %v3946_v25 = vld [vmem:[%s12516_s10 + $0x240] sm:$0xff] }
 0x7df   :  { %8128 = vmatpush3.bf16.msra.mxu0 %v8127_v52  ;;  %v3616_v52 = vld [vmem:[%s12516_s10 + $0xc8] sm:$0xff] }
 0x7e0   :  { %8129 = vmatprep.subr.bf16.mxu0 %v8812_v44  ;;  %v8172_v57 = vpack.c.bf16 %v3616_v52, %v3615_v50  ;;  %v4041_v50 = vld [vmem:[%s12516_s10 + $0x2f8] sm:$0xff] }
 0x7e3   :  { %8131 = vmatpush3.bf16.msra.mxu0 %v8130_v7  ;;  %v3620_v7 = vld [vmem:[%s12516_s10 + $0xe8] sm:$0xff] }
 0x7e4   :  { %8132 = vmatprep.subr.bf16.mxu0 %v8812_v44  ;;  %v8178_v14 = vpack.c.bf16 %v3620_v7, %v3619_v46  ;;  %v4117_v46 = vld [vmem:[%s12516_s10 + $0x318] sm:$0xff] }
 0x7e7   :  { %8134 = vmatpush3.bf16.msra.mxu0 %v8133_v56  ;;  %v3939_v56 = vld [vmem:[%s12516_s10 + $0x208] sm:$0xff] }
 0x7e8   :  { %8135 = vmatprep.subr.bf16.mxu0 %v8812_v44  ;;  %v8184_v58 = vpack.c.bf16 %v3939_v56, %v3938_v11  ;;  %v4122_v56 = vld [vmem:[%s12516_s10 + $0x340] sm:$0xff] }
 0x7ea   :  { %7181 = vmatmul.mubr.f32.vlgmr.msra.gmra.mrb[76].mxu0 %v10807_v17  ;;  %v8142_v17 = vpack.c.bf16 %v3786_v1, %v3785_v3  ;;  %v3948_v3 = vld [vmem:[%s12516_s10 + $0x250] sm:$0xff]  ;;  %v3949_v1 = vld [vmem:[%s12516_s10 + $0x258] sm:$0xff] }
 0x7eb   :  { %8137 = vmatpush3.bf16.msra.mxu0 %v8136_v20  ;;  %7215 = vmatprep.mubr.msk.f32.mxu0 %vm8813_vm1, %v8814_v37  ;;  %v3942_v20 = vld [vmem:[%s12516_s10 + $0x220] sm:$0xff] }
 0x7ec   :  { %8138 = vmatprep.subr.bf16.mxu0 %v8812_v44  ;;  %v8190_v47 = vpack.c.bf16 %v3943_v24, %v3942_v20  ;;  %v4126_v20 = vld [vmem:[%s12516_s10 + $0x360] sm:$0xff]  ;;  %v4127_v24 = vld [vmem:[%s12516_s10 + $0x368] sm:$0xff] }
 0x7ef   :  { %8140 = vmatpush3.bf16.msra.mxu0 %v8139_v32  ;;  %v3947_v32 = vld [vmem:[%s12516_s10 + $0x248] sm:$0xff] }
 0x7f0   :  { %8141 = vmatprep.subr.bf16.mxu0 %v8812_v44  ;;  %v8196_v48 = vpack.c.bf16 %v3947_v32, %v3946_v25  ;;  %v4290_v25 = vld [vmem:[%s12516_s10 + $0x400] sm:$0xff]  ;;  %v4291_v32 = vld [vmem:[%s12516_s10 + $0x408] sm:$0xff] }
 0x7f3   :  { %8143 = vmatpush3.bf16.msra.mxu0 %v8142_v17  ;;  %v8199_v17 = vpack.c.bf16 %v3949_v1, %v3948_v3  ;;  %v4292_v3 = vld [vmem:[%s12516_s10 + $0x410] sm:$0xff]  ;;  %v4293_v1 = vld [vmem:[%s12516_s10 + $0x418] sm:$0xff] }
 0x7f4   :  { %8144 = vmatprep.subr.bf16.mxu0 %v8812_v44 }
 0x7f7   :  { %8146 = vmatpush3.bf16.msra.mxu0 %v8145_v39  ;;  %v8202_v39 = vpack.c.bf16 %v3951_v35, %v3950_v4  ;;  %v4294_v4 = vld [vmem:[%s12516_s10 + $0x420] sm:$0xff]  ;;  %v4295_v35 = vld [vmem:[%s12516_s10 + $0x428] sm:$0xff] }
 0x7f8   :  { %8147 = vmatprep.subr.bf16.mxu0 %v8812_v44 }
 0x7fb   :  { %8149 = vmatpush3.bf16.msra.mxu0 %v8148_v36  ;;  %v8205_v36 = vpack.c.bf16 %v3953_v22, %v3952_v16  ;;  %v4298_v22 = vld [vmem:[%s12516_s10 + $0x440] sm:$0xff] }
 0x7fc   :  { %8150 = vmatprep.subr.bf16.mxu0 %v8812_v44 }
 0x7ff   :  { %8152 = vmatpush3.bf16.msra.mxu0 %v8151_v38  ;;  %v8208_v38 = vpack.c.bf16 %v4027_v26, %v4026_v28  ;;  %v4300_v26 = vld [vmem:[%s12516_s10 + $0x450] sm:$0xff] }
 0x800   :  { %8153 = vmatprep.subr.bf16.mxu0 %v8812_v44 }
 0x803   :  { %8155 = vmatpush3.bf16.msra.mxu0 %v8154_v43  ;;  %v8211_v43 = vpack.c.bf16 %v4029_v10, %v4028_v23  ;;  %v4302_v10 = vld [vmem:[%s12516_s10 + $0x460] sm:$0xff] }
 0x804   :  { %8156 = vmatprep.subr.bf16.mxu0 %v8812_v44 }
 0x807   :  { %8158 = vmatpush3.bf16.msra.mxu0 %v8157_v63  ;;  %v8214_v63 = vpack.c.bf16 %v4031_v53, %v4030_v41 }
 0x808   :  { %8159 = vmatprep.subr.bf16.mxu0 %v8812_v44 }
 0x80a   :  { %7216 = vmatmul.mubr.f32.vlgmr.msra.gmra.mrb[78].mxu0 %v10838_v31  ;;  %v3613_v31 = vld [vmem:[%s12516_s10 + $0xb0] sm:$0xff] }
 0x80b   :  { %8161 = vmatpush3.bf16.msra.mxu0 %v8160_v12  ;;  %7250 = vmatprep.mubr.msk.f32.mxu0 %vm8813_vm1, %v8814_v37  ;;  %v8169_v45 = vpack.c.bf16 %v3614_v34, %v3613_v31  ;;  %v4034_v12 = vld [vmem:[%s12516_s10 + $0x2c0] sm:$0xff]  ;;  %v4039_v31 = vld [vmem:[%s12516_s10 + $0x2e8] sm:$0xff] }
 0x80c   :  { %8162 = vmatprep.subr.bf16.mxu0 %v8812_v44  ;;  %v8220_v2 = vpack.c.bf16 %v4035_v33, %v4034_v12 }
 0x80f   :  { %8164 = vmatpush3.bf16.msra.mxu0 %v8163_v9  ;;  %v4036_v9 = vld [vmem:[%s12516_s10 + $0x2d0] sm:$0xff] }
 0x810   :  { %8165 = vmatprep.subr.bf16.mxu0 %v8812_v44  ;;  %v8223_v61 = vpack.c.bf16 %v4037_v51, %v4036_v9 }
 0x813   :  { %8167 = vmatpush3.bf16.msra.mxu0 %v8166_v40  ;;  %v4038_v40 = vld [vmem:[%s12516_s10 + $0x2e0] sm:$0xff] }
 0x814   :  { %8168 = vmatprep.subr.bf16.mxu0 %v8812_v44  ;;  %v8226_v34 = vpack.c.bf16 %v4039_v31, %v4038_v40 }
 0x817   :  { %8170 = vmatpush3.bf16.msra.mxu0 %v8169_v45  ;;  %v4040_v45 = vld [vmem:[%s12516_s10 + $0x2f0] sm:$0xff] }
 0x818   :  { %8171 = vmatprep.subr.bf16.mxu0 %v8812_v44  ;;  %v8229_v52 = vpack.c.bf16 %v4041_v50, %v4040_v45  ;;  %v4422_v50 = vld [vmem:[%s12518_s12 + $0x18] sm:$0xff] }
 0x81b   :  { %8173 = vmatpush3.bf16.msra.mxu0 %v8172_v57  ;;  %v4114_v57 = vld [vmem:[%s12516_s10 + $0x300] sm:$0xff] }
 0x81c   :  { %8174 = vmatprep.subr.bf16.mxu0 %v8812_v44  ;;  %v8232_v60 = vpack.c.bf16 %v4115_v59, %v4114_v57  ;;  %v4430_v57 = vld [vmem:[%s12518_s12 + $0x58] sm:$0xff]  ;;  %v4419_v59 = vld [vmem:[%s12518_s12] sm:$0xff] }
 0x81f   :  { %8176 = vmatpush3.bf16.msra.mxu0 %v8175_v29  ;;  %v4116_v29 = vld [vmem:[%s12516_s10 + $0x310] sm:$0xff] }
 0x820   :  { %8177 = vmatprep.subr.bf16.mxu0 %v8812_v44  ;;  %v8235_v7 = vpack.c.bf16 %v4117_v46, %v4116_v29  ;;  %v8367_v29 = vpack.c.bf16 %v4430_v57, %v4422_v50 }
 0x823   :  { %8179 = vmatpush3.bf16.msra.mxu0 %v8178_v14  ;;  %v4118_v14 = vld [vmem:[%s12516_s10 + $0x320] sm:$0xff] }
 0x824   :  { %8180 = vmatprep.subr.bf16.mxu0 %v8812_v44  ;;  %v8238_v42 = vpack.c.bf16 %v4119_v0, %v4118_v14  ;;  %v4429_v14 = vld [vmem:[%s12518_s12 + $0x50] sm:$0xff]  ;;  %v4436_v0 = vld [vmem:[%s12518_s12 + $0x88] sm:$0xff] }
 0x827   :  { %8182 = vmatpush3.bf16.msra.mxu0 %v8181_v49  ;;  %v4121_v49 = vld [vmem:[%s12516_s10 + $0x338] sm:$0xff] }
 0x828   :  { %8183 = vmatprep.subr.bf16.mxu0 %v8812_v44 }
 0x82a   :  { %7251 = vmatmul.mubr.f32.vlgmr.msra.gmra.mrb[80].mxu0 %v10815_v55  ;;  %v3944_v55 = vld [vmem:[%s12516_s10 + $0x230] sm:$0xff] }
 0x82b   :  { %8185 = vmatpush3.bf16.msra.mxu0 %v8184_v58  ;;  %7285 = vmatprep.mubr.msk.f32.mxu0 %vm8813_vm1, %v8814_v37  ;;  %v8193_v15 = vpack.c.bf16 %v3945_v21, %v3944_v55  ;;  %v4123_v58 = vld [vmem:[%s12516_s10 + $0x348] sm:$0xff]  ;;  %v4128_v55 = vld [vmem:[%s12516_s10 + $0x370] sm:$0xff]  ;;  %v4129_v21 = vld [vmem:[%s12516_s10 + $0x378] sm:$0xff] }
 0x82c   :  { %8186 = vmatprep.subr.bf16.mxu0 %v8812_v44  ;;  %v8244_v8 = vpack.c.bf16 %v4123_v58, %v4122_v56 }
 0x82f   :  { %8188 = vmatpush3.bf16.msra.mxu0 %v8187_v27  ;;  %v8247_v27 = vpack.c.bf16 %v4125_v30, %v4124_v13  ;;  %v4443_v13 = vld [vmem:[%s12518_s12 + $0xc0] sm:$0xff]  ;;  %v4437_v30 = vld [vmem:[%s12518_s12 + $0x90] sm:$0xff] }
 0x830   :  { %8189 = vmatprep.subr.bf16.mxu0 %v8812_v44 }
 0x833   :  { %8191 = vmatpush3.bf16.msra.mxu0 %v8190_v47  ;;  %v8250_v47 = vpack.c.bf16 %v4127_v24, %v4126_v20  ;;  %v4445_v20 = vld [vmem:[%s12518_s12 + $0xd0] sm:$0xff]  ;;  %v4452_v24 = vld [vmem:[%s12518_s12 + $0x108] sm:$0xff] }
 0x834   :  { %8192 = vmatprep.subr.bf16.mxu0 %v8812_v44 }
 0x837   :  { %8194 = vmatpush3.bf16.msra.mxu0 %v8193_v15  ;;  %v8253_v15 = vpack.c.bf16 %v4129_v21, %v4128_v55  ;;  %v8373_v55 = vpack.c.bf16 %v4445_v20, %v4437_v30  ;;  %v4517_v30 = vld [vmem:[%s12518_s12 + $0x310] sm:$0xff] }
 0x838   :  { %8195 = vmatprep.subr.bf16.mxu0 %v8812_v44  ;;  %v4525_v20 = vld [vmem:[%s12518_s12 + $0x350] sm:$0xff] }
 0x83b   :  { %8197 = vmatpush3.bf16.msra.mxu0 %v8196_v48  ;;  %v8280_v48 = vpack.c.bf16 %v4291_v32, %v4290_v25  ;;  %v4462_v25 = vld [vmem:[%s12518_s12 + $0x158] sm:$0xff]  ;;  %v4451_v32 = vld [vmem:[%s12518_s12 + $0x100] sm:$0xff] }
 0x83c   :  { %8198 = vmatprep.subr.bf16.mxu0 %v8812_v44 }
 0x83f   :  { %8200 = vmatpush3.bf16.msra.mxu0 %v8199_v17  ;;  %v8283_v17 = vpack.c.bf16 %v4293_v1, %v4292_v3  ;;  %v4459_v3 = vld [vmem:[%s12518_s12 + $0x140] sm:$0xff]  ;;  %v4453_v1 = vld [vmem:[%s12518_s12 + $0x110] sm:$0xff] }
 0x840   :  { %8201 = vmatprep.subr.bf16.mxu0 %v8812_v44 }
 0x843   :  { %8203 = vmatpush3.bf16.msra.mxu0 %v8202_v39  ;;  %v8286_v39 = vpack.c.bf16 %v4295_v35, %v4294_v4  ;;  %v8313_v4 = vpack.c.bf16 %v4459_v3, %v4451_v32  ;;  %v4468_v35 = vld [vmem:[%s12518_s12 + $0x188] sm:$0xff]  ;;  %v4539_v3 = vld [vmem:[%s12518_s12 + $0x3c0] sm:$0xff] }
 0x844   :  { %8204 = vmatprep.subr.bf16.mxu0 %v8812_v44 }
 0x847   :  { %8206 = vmatpush3.bf16.msra.mxu0 %v8205_v36  ;;  %v4299_v36 = vld [vmem:[%s12516_s10 + $0x448] sm:$0xff] }
 0x848   :  { %8207 = vmatprep.subr.bf16.mxu0 %v8812_v44  ;;  %v8292_v28 = vpack.c.bf16 %v4299_v36, %v4298_v22  ;;  %v4478_v22 = vld [vmem:[%s12518_s12 + $0x1d8] sm:$0xff]  ;;  %v4467_v36 = vld [vmem:[%s12518_s12 + $0x180] sm:$0xff] }
 0x84a   :  { %7286 = vmatmul.mubr.f32.vlgmr.msra.gmra.mrb[82].mxu0 %v10854_v6  ;;  %v4032_v6 = vld [vmem:[%s12516_s10 + $0x2b0] sm:$0xff] }
 0x84b   :  { %8209 = vmatpush3.bf16.msra.mxu0 %v8208_v38  ;;  %7320 = vmatprep.mubr.msk.f32.mxu0 %vm8813_vm1, %v8814_v37  ;;  %v8217_v54 = vpack.c.bf16 %v4033_v18, %v4032_v6  ;;  %v4301_v38 = vld [vmem:[%s12516_s10 + $0x458] sm:$0xff]  ;;  %v4304_v6 = vld [vmem:[%s12516_s10 + $0x470] sm:$0xff] }
 0x84c   :  { %8210 = vmatprep.subr.bf16.mxu0 %v8812_v44  ;;  %v8295_v23 = vpack.c.bf16 %v4301_v38, %v4300_v26  ;;  %v4305_v18 = vld [vmem:[%s12516_s10 + $0x478] sm:$0xff]  ;;  %v4469_v38 = vld [vmem:[%s12518_s12 + $0x190] sm:$0xff] }
 0x84f   :  { %8212 = vmatpush3.bf16.msra.mxu0 %v8211_v43  ;;  %v4303_v43 = vld [vmem:[%s12516_s10 + $0x468] sm:$0xff] }
 0x850   :  { %8213 = vmatprep.subr.bf16.mxu0 %v8812_v44 }
 0x853   :  { %8215 = vmatpush3.bf16.msra.mxu0 %v8214_v63  ;;  %v8298_v63 = vpack.c.bf16 %v4303_v43, %v4302_v10  ;;  %v4484_v10 = vld [vmem:[%s12518_s12 + $0x208] sm:$0xff] }
 0x854   :  { %8216 = vmatprep.subr.bf16.mxu0 %v8812_v44  ;;  %v4492_v43 = vld [vmem:[%s12518_s12 + $0x248] sm:$0xff] }
 0x857   :  { %8218 = vmatpush3.bf16.msra.mxu0 %v8217_v54  ;;  %v8301_v54 = vpack.c.bf16 %v4305_v18, %v4304_v6  ;;  %v8319_v18 = vpack.c.bf16 %v4492_v43, %v4484_v10  ;;  %v4557_v10 = vld [vmem:[%s12518_s12 + $0x450] sm:$0xff]  ;;  %v4564_v43 = vld [vmem:[%s12518_s12 + $0x488] sm:$0xff] }
 0x858   :  { %8219 = vmatprep.subr.bf16.mxu0 %v8812_v44 }
 0x85b   :  { %8221 = vmatpush3.bf16.msra.mxu0 %v8220_v2 }
 0x85c   :  { %8222 = vmatprep.subr.bf16.mxu0 %v8812_v44 }
 0x85f   :  { %8224 = vmatpush3.bf16.msra.mxu0 %v8223_v61 }
 0x860   :  { %8225 = vmatprep.subr.bf16.mxu0 %v8812_v44 }
 0x863   :  { %8227 = vmatpush3.bf16.msra.mxu0 %v8226_v34 }
 0x864   :  { %8228 = vmatprep.subr.bf16.mxu0 %v8812_v44 }
 0x867   :  { %8230 = vmatpush3.bf16.msra.mxu0 %v8229_v52 }
 0x868   :  { %8231 = vmatprep.subr.bf16.mxu0 %v8812_v44 }
 0x86a   :  { %7321 = vmatmul.mubr.f32.vlgmr.msra.gmra.mrb[84].mxu0 %v10926_v62  ;;  %v4120_v62 = vld [vmem:[%s12516_s10 + $0x330] sm:$0xff] }
 0x86b   :  { %8233 = vmatpush3.bf16.msra.mxu0 %v8232_v60  ;;  %7355 = vmatprep.mubr.msk.f32.mxu0 %vm8813_vm1, %v8814_v37  ;;  %v8241_v11 = vpack.c.bf16 %v4121_v49, %v4120_v62  ;;  %v4427_v60 = vld [vmem:[%s12518_s12 + $0x40] sm:$0xff]  ;;  %v4444_v62 = vld [vmem:[%s12518_s12 + $0xc8] sm:$0xff]  ;;  %v4438_v49 = vld [vmem:[%s12518_s12 + $0x98] sm:$0xff] }
 0x86c   :  { %8234 = vmatprep.subr.bf16.mxu0 %v8812_v44  ;;  %v8305_v46 = vpack.c.bf16 %v4427_v60, %v4419_v59  ;;  %v8307_v56 = vpack.c.bf16 %v4444_v62, %v4436_v0  ;;  %v4516_v0 = vld [vmem:[%s12518_s12 + $0x308] sm:$0xff]  ;;  %v4518_v62 = vld [vmem:[%s12518_s12 + $0x318] sm:$0xff] }
 0x86f   :  { %8236 = vmatpush3.bf16.msra.mxu0 %v8235_v7  ;;  %v4421_v7 = vld [vmem:[%s12518_s12 + $0x10] sm:$0xff] }
 0x870   :  { %8237 = vmatprep.subr.bf16.mxu0 %v8812_v44 }
 0x873   :  { %8239 = vmatpush3.bf16.msra.mxu0 %v8238_v42  ;;  %v8369_v42 = vpack.c.bf16 %v4429_v14, %v4421_v7  ;;  %v4509_v14 = vld [vmem:[%s12518_s12 + $0x2d0] sm:$0xff] }
 0x874   :  { %8240 = vmatprep.subr.bf16.mxu0 %v8812_v44 }
 0x877   :  { %8242 = vmatpush3.bf16.msra.mxu0 %v8241_v11  ;;  %v4446_v11 = vld [vmem:[%s12518_s12 + $0xd8] sm:$0xff] }
 0x878   :  { %8243 = vmatprep.subr.bf16.mxu0 %v8812_v44  ;;  %v8371_v58 = vpack.c.bf16 %v4446_v11, %v4438_v49  ;;  %v4526_v49 = vld [vmem:[%s12518_s12 + $0x358] sm:$0xff] }
 0x87b   :  { %8245 = vmatpush3.bf16.msra.mxu0 %v8244_v8  ;;  %v4435_v8 = vld [vmem:[%s12518_s12 + $0x80] sm:$0xff] }
 0x87c   :  { %8246 = vmatprep.subr.bf16.mxu0 %v8812_v44 }
 0x87f   :  { %8248 = vmatpush3.bf16.msra.mxu0 %v8247_v27  ;;  %v8309_v27 = vpack.c.bf16 %v4443_v13, %v4435_v8  ;;  %v4515_v8 = vld [vmem:[%s12518_s12 + $0x300] sm:$0xff] }
 0x880   :  { %8249 = vmatprep.subr.bf16.mxu0 %v8812_v44  ;;  %v4523_v13 = vld [vmem:[%s12518_s12 + $0x340] sm:$0xff] }
 0x883   :  { %8251 = vmatpush3.bf16.msra.mxu0 %v8250_v47  ;;  %v4460_v47 = vld [vmem:[%s12518_s12 + $0x148] sm:$0xff] }
 0x884   :  { %8252 = vmatprep.subr.bf16.mxu0 %v8812_v44  ;;  %v8311_v21 = vpack.c.bf16 %v4460_v47, %v4452_v24  ;;  %v4532_v24 = vld [vmem:[%s12518_s12 + $0x388] sm:$0xff] }
 0x885   :  { %v4540_v47 = vld [vmem:[%s12518_s12 + $0x3c8] sm:$0xff] }
 0x886   :  { %v8331_v32 = vpack.c.bf16 %v4540_v47, %v4532_v24  ;;  %v4620_v24 = vld [vmem:[%s12518_s12 + $0x648] sm:$0xff]  ;;  %v4614_v47 = vld [vmem:[%s12518_s12 + $0x618] sm:$0xff] }
 0x887   :  { %8254 = vmatpush3.bf16.msra.mxu0 %v8253_v15  ;;  %v4454_v15 = vld [vmem:[%s12518_s12 + $0x118] sm:$0xff] }
 0x888   :  { %8279 = vmatprep.subr.bf16.mxu0 %v8812_v44 }
 0x88a   :  { %7356 = vmatmul.mubr.f32.vlgmr.msra.gmra.mrb[86].mxu0 %v10935_v19  ;;  %v4296_v19 = vld [vmem:[%s12516_s10 + $0x430] sm:$0xff] }
 0x88b   :  { %8281 = vmatpush3.bf16.msra.mxu0 %v8280_v48  ;;  %7425 = vmatprep.mubr.msk.f32.mxu0 %vm8813_vm1, %v8814_v37  ;;  %v4297_v37 = vld [vmem:[%s12516_s10 + $0x438] sm:$0xff]  ;;  %v8375_v48 = vpack.c.bf16 %v4462_v25, %v4454_v15  ;;  %v8329_v15 = vpack.c.bf16 %v4523_v13, %v4515_v8  ;;  %v8393_v25 = vpack.c.bf16 %v4525_v20, %v4517_v30  ;;  %v4603_v8 = vld [vmem:[%s12518_s12 + $0x5c0] sm:$0xff]  ;;  %v4597_v13 = vld [vmem:[%s12518_s12 + $0x590] sm:$0xff] }
 0x88c   :  { %8282 = vmatprep.subr.bf16.mxu0 %v8812_v44  ;;  %v8289_v16 = vpack.c.bf16 %v4297_v37, %v4296_v19  ;;  %v4470_v19 = vld [vmem:[%s12518_s12 + $0x198] sm:$0xff]  ;;  %v4612_v20 = vld [vmem:[%s12518_s12 + $0x608] sm:$0xff] }
 0x88d   :  { %v8379_v26 = vpack.c.bf16 %v4478_v22, %v4470_v19  ;;  %v4550_v19 = vld [vmem:[%s12518_s12 + $0x418] sm:$0xff] }
 0x88f   :  { %8284 = vmatpush3.bf16.msra.mxu0 %v8283_v17  ;;  %v4461_v17 = vld [vmem:[%s12518_s12 + $0x150] sm:$0xff] }
 0x890   :  { %8285 = vmatprep.subr.bf16.mxu0 %v8812_v44  ;;  %v8377_v37 = vpack.c.bf16 %v4461_v17, %v4453_v1  ;;  %v4533_v1 = vld [vmem:[%s12518_s12 + $0x390] sm:$0xff] }
 0x893   :  { %8287 = vmatpush3.bf16.msra.mxu0 %v8286_v39  ;;  %v4476_v39 = vld [vmem:[%s12518_s12 + $0x1c8] sm:$0xff] }
 0x894   :  { %8288 = vmatprep.subr.bf16.mxu0 %v8812_v44 }
 0x897   :  { %8290 = vmatpush3.bf16.msra.mxu0 %v8289_v16  ;;  %v8315_v16 = vpack.c.bf16 %v4476_v39, %v4468_v35  ;;  %v4548_v35 = vld [vmem:[%s12518_s12 + $0x408] sm:$0xff] }
 0x898   :  { %8291 = vmatprep.subr.bf16.mxu0 %v8812_v44  ;;  %v4556_v39 = vld [vmem:[%s12518_s12 + $0x448] sm:$0xff] }
 0x89b   :  { %8293 = vmatpush3.bf16.msra.mxu0 %v8292_v28  ;;  %v4475_v28 = vld [vmem:[%s12518_s12 + $0x1c0] sm:$0xff] }
 0x89c   :  { %8294 = vmatprep.subr.bf16.mxu0 %v8812_v44 }
 0x89d   :  { %v3706_v41 = vpop.f32.mrb[74].mxu0 }
 0x89e   :  { %v7147_v53 = vpop.f32.mrb[75].mxu0 }
 0x89f   :  { %8296 = vmatpush3.bf16.msra.mxu0 %v8295_v23  ;;  %v4477_v23 = vld [vmem:[%s12518_s12 + $0x1d0] sm:$0xff]  ;;  %v4494_v53 = vld [vmem:[%s12518_s12 + $0x258] sm:$0xff] }
 0x8a0   :  { %8297 = vmatprep.subr.bf16.mxu0 %v8812_v44  ;;  %v8381_v6 = vpack.c.bf16 %v4477_v23, %v4469_v38  ;;  %v4549_v38 = vld [vmem:[%s12518_s12 + $0x410] sm:$0xff] }
 0x8a3   :  { %8299 = vmatpush3.bf16.msra.mxu0 %v8298_v63  ;;  %v8317_v63 = vpack.c.bf16 %v4475_v28, %v4467_v36  ;;  %v8335_v36 = vpack.c.bf16 %v4556_v39, %v4548_v35  ;;  %v4547_v28 = vld [vmem:[%s12518_s12 + $0x400] sm:$0xff]  ;;  %v4636_v35 = vld [vmem:[%s12518_s12 + $0x6c8] sm:$0xff] }
 0x8a4   :  { %8300 = vmatprep.subr.bf16.mxu0 %v8812_v44  ;;  %v4420_v44 = vld [vmem:[%s12518_s12 + $0x8] sm:$0xff] }
 0x8a7   :  { %8302 = vmatpush3.bf16.msra.mxu0 %v8301_v54  ;;  %v4483_v54 = vld [vmem:[%s12518_s12 + $0x200] sm:$0xff] }
 0x8a8   :  { %8368 = vmatprep.subr.bf16.mxu0 %v8367_v29  ;;  %v4499_v29 = vld [vmem:[%s12518_s12 + $0x280] sm:$0xff] }
 0x8aa   :  { %7426 = vmatmul.mubr.f32.vlgmr.msra.gmra.mrb[88].mxu0 %v11055_v5  ;;  %v4428_v5 = vld [vmem:[%s12518_s12 + $0x48] sm:$0xff] }
 0x8ab   :  { %v8303_v52 = vpack.c.bf16 %v4428_v5, %v4420_v44  ;;  %8370 = vmatpush1.bf16.msra.mxu0 %v8369_v42  ;;  %v4502_v44 = vld [vmem:[%s12518_s12 + $0x298] sm:$0xff]  ;;  %v4524_v42 = vld [vmem:[%s12518_s12 + $0x348] sm:$0xff] }
 0x8ac   :  { %8372 = vmatprep.subr.bf16.mxu0 %v8371_v58  ;;  %v4510_v5 = vld [vmem:[%s12518_s12 + $0x2d8] sm:$0xff]  ;;  %v8327_v58 = vpack.c.bf16 %v4524_v42, %v4516_v0  ;;  %v4604_v0 = vld [vmem:[%s12518_s12 + $0x5c8] sm:$0xff] }
 0x8ad   :  { %8304 = vmatprep.subr.bf16.mxu1 %v8303_v52  ;;  %v8387_v7 = vpack.c.bf16 %v4510_v5, %v4502_v44  ;;  %v4582_v44 = vld [vmem:[%s12518_s12 + $0x518] sm:$0xff] }
 0x8ae   :  { %8306 = vmatpush1.bf16.msra.mxu1 %v8305_v46  ;;  %v4507_v46 = vld [vmem:[%s12518_s12 + $0x2c0] sm:$0xff]  ;;  %v4590_v5 = vld [vmem:[%s12518_s12 + $0x558] sm:$0xff] }
 0x8af   :  { %8308 = vmatprep.subr.bf16.mxu1 %v8307_v56  ;;  %8374 = vmatpush1.bf16.msra.mxu0 %v8373_v55  ;;  %v8325_v11 = vpack.c.bf16 %v4507_v46, %v4499_v29  ;;  %v4534_v55 = vld [vmem:[%s12518_s12 + $0x398] sm:$0xff]  ;;  %v4587_v29 = vld [vmem:[%s12518_s12 + $0x540] sm:$0xff]  ;;  %v4581_v46 = vld [vmem:[%s12518_s12 + $0x510] sm:$0xff] }
 0x8b0   :  { %8376 = vmatprep.subr.bf16.mxu0 %v8375_v48  ;;  %v4531_v48 = vld [vmem:[%s12518_s12 + $0x380] sm:$0xff]  ;;  %v4598_v42 = vld [vmem:[%s12518_s12 + $0x598] sm:$0xff] }
 0x8b1   :  { %v11290_v9 = vpop.f32.mrb[148].mxu1 }
 0x8b2   :  { %v7392_v51 = vpop.f32.mrb[149].mxu1  ;;  %8310 = vmatpush1.bf16.msra.mxu1 %v8309_v27  ;;  %v8391_v27 = vpack.c.bf16 %v4526_v49, %v4518_v62  ;;  %v4606_v62 = vld [vmem:[%s12518_s12 + $0x5d8] sm:$0xff] }
 0x8b3   :  { %8312 = vmatprep.subr.bf16.mxu1 %v8311_v21  ;;  %8378 = vmatpush1.bf16.msra.mxu0 %v8377_v37  ;;  %v4542_v21 = vld [vmem:[%s12518_s12 + $0x3d8] sm:$0xff]  ;;  %v8411_v30 = vpack.c.bf16 %v4606_v62, %v4598_v42  ;;  %v4659_v42 = vld [vmem:[%s12518_s12 + $0x780] sm:$0xff] }
 0x8b4   :  { %8380 = vmatprep.subr.bf16.mxu0 %v8379_v26  ;;  %v8395_v17 = vpack.c.bf16 %v4542_v21, %v4534_v55  ;;  %v4558_v37 = vld [vmem:[%s12518_s12 + $0x458] sm:$0xff]  ;;  %v4555_v26 = vld [vmem:[%s12518_s12 + $0x440] sm:$0xff] }
 0x8b5   :  { %v8399_v23 = vpack.c.bf16 %v4558_v37, %v4550_v19  ;;  %v4622_v55 = vld [vmem:[%s12518_s12 + $0x658] sm:$0xff]  ;;  %v4667_v62 = vld [vmem:[%s12518_s12 + $0x7c0] sm:$0xff] }
 0x8b6   :  { %8314 = vmatpush1.bf16.msra.mxu1 %v8313_v4  ;;  %v4541_v4 = vld [vmem:[%s12518_s12 + $0x3d0] sm:$0xff]  ;;  %v4630_v19 = vld [vmem:[%s12518_s12 + $0x698] sm:$0xff] }
 0x8b7   :  { %8316 = vmatprep.subr.bf16.mxu1 %v8315_v16  ;;  %8382 = vmatpush1.bf16.msra.mxu0 %v8381_v6  ;;  %v8333_v16 = vpack.c.bf16 %v4539_v3, %v4531_v48  ;;  %v8397_v22 = vpack.c.bf16 %v4541_v4, %v4533_v1  ;;  %v8337_v6 = vpack.c.bf16 %v4555_v26, %v4547_v28  ;;  %v4619_v48 = vld [vmem:[%s12518_s12 + $0x640] sm:$0xff]  ;;  %v4613_v3 = vld [vmem:[%s12518_s12 + $0x610] sm:$0xff]  ;;  %v4628_v4 = vld [vmem:[%s12518_s12 + $0x688] sm:$0xff] }
 0x8b8   :  { %v8415_v1 = vpack.c.bf16 %v4622_v55, %v4614_v47  ;;  %v4638_v37 = vld [vmem:[%s12518_s12 + $0x6d8] sm:$0xff]  ;;  %v8355_v26 = vpack.c.bf16 %v4636_v35, %v4628_v4 }
 0x8b9   :  { %v4434_v55 = vld [vmem:[%s12518_s12 + $0x78] sm:$0xff] }
 0x8ba   :  { %8318 = vmatpush1.bf16.msra.mxu1 %v8317_v63  ;;  %v4574_v63 = vld [vmem:[%s12518_s12 + $0x4d8] sm:$0xff] }
 0x8bb   :  { %8320 = vmatprep.subr.bf16.mxu1 %v8319_v18  ;;  %v8401_v18 = vpack.c.bf16 %v4557_v10, %v4549_v38  ;;  %v4627_v38 = vld [vmem:[%s12518_s12 + $0x680] sm:$0xff] }
 0x8bd   :  { %v3776_v12 = vpop.f32.mrb[76].mxu0 }
 0x8be   :  { %v11288_v33 = vadd.f32 %v3776_v12, %v3706_v41  ;;  %v7182_v2 = vpop.f32.mrb[77].mxu0  ;;  %v4486_v41 = vld [vmem:[%s12518_s12 + $0x218] sm:$0xff]  ;;  %v4491_v12 = vld [vmem:[%s12518_s12 + $0x240] sm:$0xff] }
 0x8bf   :  { %v4485_v2 = vld [vmem:[%s12518_s12 + $0x210] sm:$0xff]  ;;  %v8383_v51 = vpack.c.bf16 %v4494_v53, %v4486_v41  ;;  %v8321_v57 = vpack.c.bf16 %v4491_v12, %v4483_v54  ;;  %v4572_v41 = vld [vmem:[%s12518_s12 + $0x4c8] sm:$0xff]  ;;  %v4566_v53 = vld [vmem:[%s12518_s12 + $0x498] sm:$0xff] }
 0x8c0   :  { %v8339_v54 = vpack.c.bf16 %v4572_v41, %v4564_v43  ;;  %v4563_v12 = vld [vmem:[%s12518_s12 + $0x480] sm:$0xff]  ;;  %v8419_v43 = vpack.c.bf16 %v4638_v37, %v4630_v19  ;;  %v4637_v41 = vld [vmem:[%s12518_s12 + $0x6d0] sm:$0xff] }
 0x8c1   :  { %8384 = vmatprep.subr.bf16.mxu0 %v8383_v51  ;;  %8322 = vmatpush1.bf16.msra.mxu1 %v8321_v57  ;;  %v4565_v51 = vld [vmem:[%s12518_s12 + $0x490] sm:$0xff]  ;;  %v4423_v37 = vld [vmem:[%s12518_s12 + $0x20] sm:$0xff] }
 0x8dd   :  { %v3863_v61 = vpop.f32.mrb[78].mxu0 }
 0x8de   :  { %v7217_v40 = vpop.f32.mrb[79].mxu0 }
 0x8df   :  { %v4500_v40 = vld [vmem:[%s12518_s12 + $0x288] sm:$0xff] }
 0x8fd   :  { %v3933_v31 = vpop.f32.mrb[80].mxu0 }
 0x8fe   :  { %v11292_v34 = vadd.f32 %v3933_v31, %v3863_v61  ;;  %v7252_v45 = vpop.f32.mrb[81].mxu0  ;;  %v4493_v61 = vld [vmem:[%s12518_s12 + $0x250] sm:$0xff]  ;;  %v4508_v31 = vld [vmem:[%s12518_s12 + $0x2c8] sm:$0xff] }
 0x8ff   :  { %v8385_v59 = vpack.c.bf16 %v4493_v61, %v4485_v2  ;;  %v8323_v60 = vpack.c.bf16 %v4508_v31, %v4500_v40  ;;  %v4571_v2 = vld [vmem:[%s12518_s12 + $0x4c0] sm:$0xff]  ;;  %v8403_v61 = vpack.c.bf16 %v4574_v63, %v4566_v53  ;;  %v4573_v40 = vld [vmem:[%s12518_s12 + $0x4d0] sm:$0xff]  ;;  %v4580_v31 = vld [vmem:[%s12518_s12 + $0x508] sm:$0xff] }
 0x900   :  { %v8405_v57 = vpack.c.bf16 %v4573_v40, %v4565_v51  ;;  %v4651_v40 = vld [vmem:[%s12518_s12 + $0x740] sm:$0xff] }
 0x901   :  { %8386 = vmatpush1.bf16.msra.mxu0 %v8385_v59  ;;  %8324 = vmatprep.subr.bf16.mxu1 %v8323_v60  ;;  %v4579_v60 = vld [vmem:[%s12518_s12 + $0x500] sm:$0xff] }
 0x902   :  { %8388 = vmatprep.subr.bf16.mxu0 %v8387_v7  ;;  %8326 = vmatpush1.bf16.msra.mxu1 %v8325_v11  ;;  %v4589_v7 = vld [vmem:[%s12518_s12 + $0x550] sm:$0xff]  ;;  %v8345_v49 = vpack.c.bf16 %v4587_v29, %v4579_v60 }
 0x903   :  { %8328 = vmatprep.subr.bf16.mxu1 %v8327_v58  ;;  %v8409_v11 = vpack.c.bf16 %v4589_v7, %v4581_v46  ;;  %v4595_v58 = vld [vmem:[%s12518_s12 + $0x580] sm:$0xff]  ;;  %v4660_v46 = vld [vmem:[%s12518_s12 + $0x788] sm:$0xff]  ;;  %v4662_v7 = vld [vmem:[%s12518_s12 + $0x798] sm:$0xff] }
 0x904   :  { %v8349_v21 = vpack.c.bf16 %v4603_v8, %v4595_v58  ;;  %v4661_v58 = vld [vmem:[%s12518_s12 + $0x790] sm:$0xff] }
 0x905   :  { %v4669_v8 = vld [vmem:[%s12518_s12 + $0x7d0] sm:$0xff] }
 0x906   :  { %8330 = vmatpush1.bf16.msra.mxu1 %v8329_v15 }
 0x907   :  { %8332 = vmatprep.subr.bf16.mxu1 %v8331_v32  ;;  %v4611_v32 = vld [vmem:[%s12518_s12 + $0x600] sm:$0xff] }
 0x90a   :  { %8334 = vmatpush1.bf16.msra.mxu1 %v8333_v16 }
 0x90b   :  { %8336 = vmatprep.subr.bf16.mxu1 %v8335_v36  ;;  %v8353_v36 = vpack.c.bf16 %v4619_v48, %v4611_v32 }
 0x90e   :  { %8338 = vmatpush1.bf16.msra.mxu1 %v8337_v6 }
 0x90f   :  { %8340 = vmatprep.subr.bf16.mxu1 %v8339_v54  ;;  %v4644_v54 = vld [vmem:[%s12518_s12 + $0x708] sm:$0xff] }
 0x91d   :  { %v4020_v45 = vpop.f32.mrb[82].mxu0 }
 0x91e   :  { %v11427_v50 = vadd.f32 %v4020_v45, %v11288_v33  ;;  %v7287_v52 = vpop.f32.mrb[83].mxu0  ;;  %v4501_v33 = vld [vmem:[%s12518_s12 + $0x290] sm:$0xff]  ;;  %v4588_v45 = vld [vmem:[%s12518_s12 + $0x548] sm:$0xff] }
 0x91f   :  { %v8389_v56 = vpack.c.bf16 %v4509_v14, %v4501_v33  ;;  %v8341_v52 = vpack.c.bf16 %v4571_v2, %v4563_v12  ;;  %v8343_v59 = vpack.c.bf16 %v4588_v45, %v4580_v31  ;;  %v8407_v33 = vpack.c.bf16 %v4590_v5, %v4582_v44  ;;  %v4596_v14 = vld [vmem:[%s12518_s12 + $0x588] sm:$0xff]  ;;  %v4646_v2 = vld [vmem:[%s12518_s12 + $0x718] sm:$0xff]  ;;  %v4645_v44 = vld [vmem:[%s12518_s12 + $0x710] sm:$0xff] }
 0x920   :  { %v4652_v12 = vld [vmem:[%s12518_s12 + $0x748] sm:$0xff]  ;;  %v4653_v5 = vld [vmem:[%s12518_s12 + $0x750] sm:$0xff] }
 0x921   :  { %8390 = vmatpush1.bf16.msra.mxu0 %v8389_v56  ;;  %8342 = vmatpush1.bf16.msra.mxu1 %v8341_v52  ;;  %v8347_v56 = vpack.c.bf16 %v4604_v0, %v4596_v14  ;;  %v8359_v51 = vpack.c.bf16 %v4652_v12, %v4644_v54  ;;  %v4670_v0 = vld [vmem:[%s12518_s12 + $0x7d8] sm:$0xff]  ;;  %v4439_v54 = vld [vmem:[%s12518_s12 + $0xa0] sm:$0xff] }
 0x922   :  { %8392 = vmatprep.subr.bf16.mxu0 %v8391_v27  ;;  %8344 = vmatprep.subr.bf16.mxu1 %v8343_v59  ;;  %v4605_v27 = vld [vmem:[%s12518_s12 + $0x5d0] sm:$0xff]  ;;  %v8425_v59 = vpack.c.bf16 %v4653_v5, %v4645_v44  ;;  %v4447_v12 = vld [vmem:[%s12518_s12 + $0xe0] sm:$0xff]  ;;  %v4464_v44 = vld [vmem:[%s12518_s12 + $0x168] sm:$0xff] }
 0x923   :  { %v8413_v15 = vpack.c.bf16 %v4605_v27, %v4597_v13  ;;  %v8429_v13 = vpack.c.bf16 %v4669_v8, %v4661_v58  ;;  %v4424_v27 = vld [vmem:[%s12518_s12 + $0x28] sm:$0xff]  ;;  %v4458_v5 = vld [vmem:[%s12518_s12 + $0x138] sm:$0xff]  ;;  %v4471_v58 = vld [vmem:[%s12518_s12 + $0x1a0] sm:$0xff] }
 0x924   :  { %v4479_v8 = vld [vmem:[%s12518_s12 + $0x1e0] sm:$0xff] }
 0x925   :  { %8394 = vmatpush1.bf16.msra.mxu0 %v8393_v25  ;;  %8346 = vmatpush1.bf16.msra.mxu1 %v8345_v49  ;;  %v8351_v25 = vpack.c.bf16 %v4620_v24, %v4612_v20  ;;  %v4432_v20 = vld [vmem:[%s12518_s12 + $0x68] sm:$0xff]  ;;  %v4426_v24 = vld [vmem:[%s12518_s12 + $0x38] sm:$0xff] }
 0x926   :  { %8396 = vmatprep.subr.bf16.mxu0 %v8395_v17  ;;  %8348 = vmatprep.subr.bf16.mxu1 %v8347_v56  ;;  %v4621_v17 = vld [vmem:[%s12518_s12 + $0x650] sm:$0xff]  ;;  %v8365_v56 = vpack.c.bf16 %v4667_v62, %v4659_v42  ;;  %v8431_v47 = vpack.c.bf16 %v4432_v20, %v4424_v27  ;;  %v4480_v42 = vld [vmem:[%s12518_s12 + $0x1e8] sm:$0xff]  ;;  %v4474_v62 = vld [vmem:[%s12518_s12 + $0x1b8] sm:$0xff] }
 0x927   :  { %v8417_v28 = vpack.c.bf16 %v4621_v17, %v4613_v3  ;;  %v4473_v27 = vld [vmem:[%s12518_s12 + $0x1b0] sm:$0xff] }
 0x928   :  { %v4481_v20 = vld [vmem:[%s12518_s12 + $0x1f0] sm:$0xff] }
 0x929   :  { %8398 = vmatpush1.bf16.msra.mxu0 %v8397_v22  ;;  %8350 = vmatpush1.bf16.msra.mxu1 %v8349_v21 }
 0x92a   :  { %8400 = vmatprep.subr.bf16.mxu0 %v8399_v23  ;;  %8352 = vmatprep.subr.bf16.mxu1 %v8351_v25  ;;  %v4635_v23 = vld [vmem:[%s12518_s12 + $0x6c0] sm:$0xff] }
 0x92b   :  { %v8357_v53 = vpack.c.bf16 %v4635_v23, %v4627_v38  ;;  %v4440_v23 = vld [vmem:[%s12518_s12 + $0xa8] sm:$0xff] }
 0x92d   :  { %8402 = vmatpush1.bf16.msra.mxu0 %v8401_v18  ;;  %8354 = vmatpush1.bf16.msra.mxu1 %v8353_v36  ;;  %v4425_v36 = vld [vmem:[%s12518_s12 + $0x30] sm:$0xff] }
 0x92e   :  { %8404 = vmatprep.subr.bf16.mxu0 %v8403_v61  ;;  %8356 = vmatprep.subr.bf16.mxu1 %v8355_v26  ;;  %v4654_v61 = vld [vmem:[%s12518_s12 + $0x758] sm:$0xff] }
 0x92f   :  { %v8423_v31 = vpack.c.bf16 %v4654_v61, %v4646_v2  ;;  %v4441_v61 = vld [vmem:[%s12518_s12 + $0xb0] sm:$0xff] }
 0x931   :  { %8406 = vmatpush1.bf16.msra.mxu0 %v8405_v57  ;;  %8358 = vmatpush1.bf16.msra.mxu1 %v8357_v53  ;;  %v5514_v57 = vld [vmem:[%s12517_s11] ss:$0 sm:$0xff]  ;;  %v4450_v53 = vld [vmem:[%s12518_s12 + $0xf8] sm:$0xff] }
 0x932   :  { %8408 = vmatprep.subr.bf16.mxu0 %v8407_v33  ;;  %8360 = vmatprep.subr.bf16.mxu1 %v8359_v51  ;;  %v4668_v33 = vld [vmem:[%s12518_s12 + $0x7c8] sm:$0xff] }
 0x933   :  { %v8363_v14 = vpack.c.bf16 %v4668_v33, %v4660_v46 }
 0x935   :  { %8410 = vmatpush1.bf16.msra.mxu0 %v8409_v11  ;;  %v8427_v11 = vpack.c.bf16 %v4670_v0, %v4662_v7  ;;  %v4457_v7 = vld [vmem:[%s12518_s12 + $0x130] sm:$0xff]  ;;  %v4472_v0 = vld [vmem:[%s12518_s12 + $0x1a8] sm:$0xff] }
 0x936   :  { %8412 = vmatprep.subr.bf16.mxu0 %v8411_v30 }
 0x939   :  { %8414 = vmatpush1.bf16.msra.mxu0 %v8413_v15  ;;  %v8495_v15 = vpack.c.bf16 %v4434_v55, %v4426_v24  ;;  %v4488_v24 = vld [vmem:[%s12518_s12 + $0x228] sm:$0xff]  ;;  %v4490_v55 = vld [vmem:[%s12518_s12 + $0x238] sm:$0xff] }
 0x93a   :  { %8416 = vmatprep.subr.bf16.mxu0 %v8415_v1 }
 0x93d   :  { %v4108_v39 = vpop.f32.mrb[84].mxu0  ;;  %8418 = vmatpush1.bf16.msra.mxu0 %v8417_v28  ;;  %v4433_v28 = vld [vmem:[%s12518_s12 + $0x70] sm:$0xff] }
 0x93e   :  { %v4112_v16 = vadd.f32 %v4108_v39, %v11292_v34  ;;  %v7322_v22 = vpop.f32.mrb[85].mxu0  ;;  %v4629_v34 = vld [vmem:[%s12518_s12 + $0x690] sm:$0xff]  ;;  %8420 = vmatprep.subr.bf16.mxu0 %v8419_v43 }
 0x93f   :  { %v8421_v63 = vpack.c.bf16 %v4637_v41, %v4629_v34  ;;  %v4431_v22 = vld [vmem:[%s12518_s12 + $0x60] sm:$0xff]  ;;  %v4448_v34 = vld [vmem:[%s12518_s12 + $0xe8] sm:$0xff]  ;;  %v4442_v41 = vld [vmem:[%s12518_s12 + $0xb8] sm:$0xff] }
 0x940   :  { %v4288_v10 = vadd.f32 %v11290_v9, %v4112_v16 }
 0x941   :  { %8422 = vmatpush1.bf16.msra.mxu0 %v8421_v63 }
 0x942   :  { %8424 = vmatprep.subr.bf16.mxu0 %v8423_v31  ;;  %v8435_v31 = vpack.c.bf16 %v4448_v34, %v4440_v23  ;;  %v4505_v23 = vld [vmem:[%s12518_s12 + $0x2b0] sm:$0xff]  ;;  %v4528_v34 = vld [vmem:[%s12518_s12 + $0x368] sm:$0xff] }
 0x945   :  { %8426 = vmatpush1.bf16.msra.mxu0 %v8425_v59 }
 0x946   :  { %8428 = vmatprep.subr.bf16.mxu0 %v8427_v11 }
 0x949   :  { %8430 = vmatpush1.bf16.msra.mxu0 %v8429_v13  ;;  %v8443_v13 = vpack.c.bf16 %v4480_v42, %v4472_v0  ;;  %v4562_v0 = vld [vmem:[%s12518_s12 + $0x478] sm:$0xff] }
 0x94a   :  { %8496 = vmatprep.subr.bf16.mxu0 %v8495_v15  ;;  %v8445_v15 = vpack.c.bf16 %v4479_v8, %v4471_v58  ;;  %v4553_v8 = vld [vmem:[%s12518_s12 + $0x430] sm:$0xff] }
 0x95d   :  { %v4196_v6 = vpop.f32.mrb[86].mxu0 }
 0x95e   :  { %v4200_v9 = vadd.f32 %v4196_v6, %v11427_v50  ;;  %v7357_v18 = vpop.f32.mrb[87].mxu0  ;;  %v4643_v50 = vld [vmem:[%s12518_s12 + $0x700] sm:$0xff] }
 0x95f   :  { %v8361_v45 = vpack.c.bf16 %v4651_v40, %v4643_v50  ;;  %v8497_v18 = vpack.c.bf16 %v4433_v28, %v4425_v36  ;;  %v4449_v50 = vld [vmem:[%s12518_s12 + $0xf0] sm:$0xff]  ;;  %v4456_v40 = vld [vmem:[%s12518_s12 + $0x128] sm:$0xff]  ;;  %v4503_v36 = vld [vmem:[%s12518_s12 + $0x2a0] sm:$0xff] }
 0x960   :  { %v8501_v59 = vpack.c.bf16 %v4449_v50, %v4441_v61  ;;  %v8439_v46 = vpack.c.bf16 %v4464_v44, %v4456_v40  ;;  %v4511_v28 = vld [vmem:[%s12518_s12 + $0x2e0] sm:$0xff]  ;;  %v4529_v61 = vld [vmem:[%s12518_s12 + $0x370] sm:$0xff]  ;;  %v4536_v50 = vld [vmem:[%s12518_s12 + $0x3a8] sm:$0xff] }
 0x961   :  { %8362 = vmatpush1.bf16.msra.mxu1 %v8361_v45  ;;  %v8499_v45 = vpack.c.bf16 %v4450_v53, %v4442_v41  ;;  %v4522_v41 = vld [vmem:[%s12518_s12 + $0x338] sm:$0xff]  ;;  %v4544_v40 = vld [vmem:[%s12518_s12 + $0x3e8] sm:$0xff] }
 0x962   :  { %8364 = vmatprep.subr.bf16.mxu1 %v8363_v14  ;;  %v4465_v14 = vld [vmem:[%s12518_s12 + $0x170] sm:$0xff]  ;;  %v4530_v53 = vld [vmem:[%s12518_s12 + $0x378] sm:$0xff] }
 0x965   :  { %8366 = vmatpush1.bf16.msra.mxu1 %v8365_v56  ;;  %v8505_v56 = vpack.c.bf16 %v4465_v14, %v4457_v7  ;;  %v4560_v7 = vld [vmem:[%s12518_s12 + $0x468] sm:$0xff]  ;;  %v4554_v14 = vld [vmem:[%s12518_s12 + $0x438] sm:$0xff] }
 0x966   :  { %8432 = vmatprep.subr.bf16.mxu1 %v8431_v47  ;;  %v4496_v47 = vld [vmem:[%s12518_s12 + $0x268] sm:$0xff]  ;;  %v8527_v58 = vpack.c.bf16 %v4562_v0, %v4554_v14  ;;  %v4631_v0 = vld [vmem:[%s12518_s12 + $0x6a0] sm:$0xff] }
 0x97d   :  { %v4372_v52 = vpop.f32.mrb[88].mxu0 }
 0x97e   :  { %v4376_v60 = vadd.f32 %v4372_v52, %v4200_v9  ;;  %v7427_v29 = vpop.f32.mrb[89].mxu0  ;;  %v8433_v9 = vpack.c.bf16 %v4431_v22, %v4423_v37  ;;  %v4466_v52 = vld [vmem:[%s12518_s12 + $0x178] sm:$0xff] }
 0x97f   :  { %v4463_v29 = vld [vmem:[%s12518_s12 + $0x160] sm:$0xff]  ;;  %v8503_v33 = vpack.c.bf16 %v4466_v52, %v4458_v5  ;;  %v4514_v37 = vld [vmem:[%s12518_s12 + $0x2f8] sm:$0xff] }
 0x980   :  { %v4377_v49 = vadd.f32 %v4376_v60, %v4288_v10  ;;  %v4455_v60 = vld [vmem:[%s12518_s12 + $0x120] sm:$0xff] }
 0x981   :  { %v8441_v11 = vpack.c.bf16 %v4463_v29, %v4455_v60  ;;  %v4535_v52 = vld [vmem:[%s12518_s12 + $0x3a0] sm:$0xff]  ;;  %v4537_v29 = vld [vmem:[%s12518_s12 + $0x3b0] sm:$0xff] }
 0x982   :  { %v4385_v30 = vadd.f32 %v5514_v57, %v4377_v49  ;;  %v8437_v57 = vpack.c.bf16 %v4447_v12, %v4439_v54  ;;  %v4482_v49 = vld [vmem:[%s12518_s12 + $0x1f8] sm:$0xff]  ;;  %v8519_v12 = vpack.c.bf16 %v4530_v53, %v4522_v41  ;;  %v4599_v53 = vld [vmem:[%s12518_s12 + $0x5a0] sm:$0xff] }
 0x984   :  { %v4386_v21 = vmax.f32 %v4385_v30, 0.0  ;;  %v8507_v30 = vpack.c.bf16 %v4482_v49, %v4474_v62  ;;  %v4551_v49 = vld [vmem:[%s12518_s12 + $0x420] sm:$0xff] }
 0x986   :  { %v4392_v25 = vrot.slane %v4386_v21, 2  ;;  %v4388_v48 = vrot.slane %v4386_v21, 1  ;;  %v4394_v3 = vrot.slane %v4386_v21, 3 }
 0x988   :  { %v8774_v32 = vpack.i.bf16 %v4386_v21, %v4392_v25  ;;  %v8779_v1 = vpack.i.bf16 %v4388_v48, %v4394_v3 }
 0x98a   :  { %8775 = vrot.lane.b32.xlu0 %v8774_v32, %s8815_s30  ;;  %v4487_v32 = vld [vmem:[%s12518_s12 + $0x220] sm:$0xff] }
 0x98e   :  { %8780 = vrot.lane.b32.xlu0 %v8779_v1, %s8815_s30 }
 0x9fc   :  { %v8776_v17 = vpop.permute.xlu0 %8775 }
 0x9fd   :  { %v8778_v4 = vunpack.i.h.bf16 %v8776_v17  ;;  %v8777_v35 = vunpack.i.l.bf16 %v8776_v17  ;;  %v4489_v17 = vld [vmem:[%s12518_s12 + $0x230] sm:$0xff] }
 0x9ff   :  { %v4408_v39 = vsel %vm101_vm0, %v8778_v4, %v4388_v48  ;;  %v4409_v19 = vsel %vm101_vm0, %v8777_v35, %v4394_v3  ;;  %v4495_v48 = vld [vmem:[%s12518_s12 + $0x260] sm:$0xff]  ;;  %v8447_v3 = vpack.c.bf16 %v4496_v47, %v4488_v24  ;;  %v4497_v4 = vld [vmem:[%s12518_s12 + $0x270] sm:$0xff]  ;;  %v4504_v35 = vld [vmem:[%s12518_s12 + $0x2a8] sm:$0xff] }
 0xa00   :  { %v8781_v16 = vpop.permute.xlu0 %8780  ;;  %v4412_v10 = vrot.slane %v4408_v39, 7  ;;  %v4413_v43 = vrot.slane %v4409_v19, 7  ;;  %v4512_v39 = vld [vmem:[%s12518_s12 + $0x2e8] sm:$0xff]  ;;  %v4506_v19 = vld [vmem:[%s12518_s12 + $0x2b8] sm:$0xff]  ;;  %v8513_v22 = vpack.c.bf16 %v4497_v4, %v4489_v17 }
 0xa01   :  { %v8783_v26 = vunpack.i.h.bf16 %v8781_v16  ;;  %v8782_v38 = vunpack.i.l.bf16 %v8781_v16  ;;  %v8449_v16 = vpack.c.bf16 %v4495_v48, %v4487_v32  ;;  %v4578_v24 = vld [vmem:[%s12518_s12 + $0x4f8] sm:$0xff]  ;;  %v4569_v48 = vld [vmem:[%s12518_s12 + $0x4b0] sm:$0xff]  ;;  %v4592_v17 = vld [vmem:[%s12518_s12 + $0x568] sm:$0xff] }
 0xa02   :  { %v4586_v4 = vld [vmem:[%s12518_s12 + $0x538] sm:$0xff] }
 0xa03   :  { %v4398_v63 = vsel %vm101_vm0, %v4386_v21, %v8783_v26  ;;  %v4399_v6 = vsel %vm101_vm0, %v4392_v25, %v8782_v38  ;;  %v4498_v21 = vld [vmem:[%s12518_s12 + $0x278] sm:$0xff]  ;;  %v8509_v25 = vpack.c.bf16 %v4481_v20, %v4473_v27  ;;  %v8451_v26 = vpack.c.bf16 %v4512_v39, %v4504_v35  ;;  %v4576_v27 = vld [vmem:[%s12518_s12 + $0x4e8] sm:$0xff] }
 0xa04   :  { %v4418_v2 = vsel %vm4416_vm3, %v4399_v6, %v4413_v43  ;;  %v11733_v51 = vsel %vm4416_vm3, %v4398_v63, %v4412_v10  ;;  %v8511_v1 = vpack.c.bf16 %v4498_v21, %v4490_v55  ;;  %v8515_v38 = vpack.c.bf16 %v4514_v37, %v4506_v19  ;;  %v4513_v10 = vld [vmem:[%s12518_s12 + $0x2f0] sm:$0xff]  ;;  %v4520_v43 = vld [vmem:[%s12518_s12 + $0x328] sm:$0xff]  ;;  %v4570_v20 = vld [vmem:[%s12518_s12 + $0x4b8] sm:$0xff] }
 0xa05   :  { %4781 = vmatprep.mubr.f32.mxu1 %v4418_v2  ;;  %4852 = vmatprep.mubr.f32.mxu0 %v4418_v2  ;;  %v8453_v63 = vpack.c.bf16 %v4511_v28, %v4503_v36  ;;  %v8517_v6 = vpack.c.bf16 %v4513_v10, %v4505_v23  ;;  %v8455_v54 = vpack.c.bf16 %v4528_v34, %v4520_v43  ;;  %v4567_v21 = vld [vmem:[%s12518_s12 + $0x4a0] sm:$0xff]  ;;  %v4594_v35 = vld [vmem:[%s12518_s12 + $0x578] sm:$0xff]  ;;  %v4585_v28 = vld [vmem:[%s12518_s12 + $0x530] sm:$0xff] }
 0xa06   :  { %4782 = vmatmul.mubr.f32.vlgmr.msra.gmra.mrb[150].mxu1 %v11733_v51  ;;  %4853 = vmatmul.mubr.f32.vlgmr.msra.gmra.mrb[90].mxu0 %v11733_v51  ;;  %v8531_v32 = vpack.c.bf16 %v4578_v24, %v4570_v20  ;;  %v4583_v37 = vld [vmem:[%s12518_s12 + $0x520] sm:$0xff]  ;;  %v8535_v36 = vpack.c.bf16 %v4594_v35, %v4586_v4  ;;  %v4608_v23 = vld [vmem:[%s12518_s12 + $0x5e8] sm:$0xff]  ;;  %v4602_v10 = vld [vmem:[%s12518_s12 + $0x5b8] sm:$0xff] }
 0xa07   :  { %8434 = vmatpush1.bf16.msra.mxu1 %v8433_v9  ;;  %8498 = vmatpush1.bf16.msra.mxu0 %v8497_v18  ;;  %v4519_v9 = vld [vmem:[%s12518_s12 + $0x320] sm:$0xff]  ;;  %v4610_v43 = vld [vmem:[%s12518_s12 + $0x5f8] sm:$0xff] }
 0xa08   :  { %4923 = vmatprep.mubr.f32.mxu1 %v4418_v2  ;;  %4994 = vmatprep.mubr.f32.mxu0 %v4418_v2  ;;  %v4527_v18 = vld [vmem:[%s12518_s12 + $0x360] sm:$0xff]  ;;  %v4521_v2 = vld [vmem:[%s12518_s12 + $0x330] sm:$0xff] }
 0xa09   :  { %8436 = vmatprep.subr.bf16.mxu1 %v8435_v31  ;;  %8500 = vmatprep.subr.bf16.mxu0 %v8499_v45  ;;  %v4538_v31 = vld [vmem:[%s12518_s12 + $0x3b8] sm:$0xff]  ;;  %v8457_v44 = vpack.c.bf16 %v4527_v18, %v4519_v9  ;;  %v8521_v5 = vpack.c.bf16 %v4529_v61, %v4521_v2  ;;  %v8539_v9 = vpack.c.bf16 %v4610_v43, %v4602_v10  ;;  %v4601_v18 = vld [vmem:[%s12518_s12 + $0x5b0] sm:$0xff]  ;;  %v4624_v2 = vld [vmem:[%s12518_s12 + $0x668] sm:$0xff] }
 0xa0a   :  { %v4546_v45 = vld [vmem:[%s12518_s12 + $0x3f8] sm:$0xff]  ;;  %v4647_v24 = vld [vmem:[%s12518_s12 + $0x720] sm:$0xff] }
 0xa0b   :  { %8438 = vmatpush1.bf16.msra.mxu1 %v8437_v57  ;;  %8502 = vmatpush1.bf16.msra.mxu0 %v8501_v59  ;;  %v4543_v57 = vld [vmem:[%s12518_s12 + $0x3e0] sm:$0xff]  ;;  %v8459_v59 = vpack.c.bf16 %v4544_v40, %v4536_v50  ;;  %v8523_v60 = vpack.c.bf16 %v4546_v45, %v4538_v31  ;;  %v4618_v61 = vld [vmem:[%s12518_s12 + $0x638] sm:$0xff] }
 0xa0c   :  { %8440 = vmatprep.subr.bf16.mxu1 %v8439_v46  ;;  %8504 = vmatprep.subr.bf16.mxu0 %v8503_v33  ;;  %v4545_v46 = vld [vmem:[%s12518_s12 + $0x3f0] sm:$0xff]  ;;  %v4552_v33 = vld [vmem:[%s12518_s12 + $0x428] sm:$0xff]  ;;  %v8461_v42 = vpack.c.bf16 %v4543_v57, %v4535_v52  ;;  %v4626_v50 = vld [vmem:[%s12518_s12 + $0x678] sm:$0xff] }
 0xa0d   :  { %v8525_v62 = vpack.c.bf16 %v4545_v46, %v4537_v29  ;;  %v4615_v45 = vld [vmem:[%s12518_s12 + $0x620] sm:$0xff]  ;;  %v8543_v52 = vpack.c.bf16 %v4626_v50, %v4618_v61  ;;  %v4617_v57 = vld [vmem:[%s12518_s12 + $0x630] sm:$0xff]  ;;  %v4640_v29 = vld [vmem:[%s12518_s12 + $0x6e8] sm:$0xff] }
 0xa0e   :  { %v4634_v46 = vld [vmem:[%s12518_s12 + $0x6b8] sm:$0xff]  ;;  %v4663_v35 = vld [vmem:[%s12518_s12 + $0x7a0] sm:$0xff]  ;;  %v5011_v50 = vld [vmem:[%s12520_s14 + $0x10] sm:$0xff] }
 0xa0f   :  { %8442 = vmatpush1.bf16.msra.mxu1 %v8441_v11  ;;  %8506 = vmatpush1.bf16.msra.mxu0 %v8505_v56  ;;  %v4559_v11 = vld [vmem:[%s12518_s12 + $0x460] sm:$0xff]  ;;  %v8463_v56 = vpack.c.bf16 %v4560_v7, %v4552_v33  ;;  %v4642_v33 = vld [vmem:[%s12518_s12 + $0x6f8] sm:$0xff] }
 0xa10   :  { %8444 = vmatprep.subr.bf16.mxu1 %v8443_v13  ;;  %8508 = vmatprep.subr.bf16.mxu0 %v8507_v30  ;;  %v4561_v13 = vld [vmem:[%s12518_s12 + $0x470] sm:$0xff]  ;;  %v4568_v30 = vld [vmem:[%s12518_s12 + $0x4a8] sm:$0xff]  ;;  %v8465_v47 = vpack.c.bf16 %v4559_v11, %v4551_v49  ;;  %v8547_v49 = vpack.c.bf16 %v4642_v33, %v4634_v46  ;;  %v5009_v43 = vld [vmem:[%s12520_s14] sm:$0xff] }
 0xa11   :  { %v8529_v55 = vpack.c.bf16 %v4561_v13, %v4553_v8  ;;  %v4633_v11 = vld [vmem:[%s12518_s12 + $0x6b0] sm:$0xff]  ;;  %v4656_v8 = vld [vmem:[%s12518_s12 + $0x768] sm:$0xff]  ;;  %v4650_v13 = vld [vmem:[%s12518_s12 + $0x738] sm:$0xff] }
 0xa12   :  { %v5013_v33 = vld [vmem:[%s12520_s14 + $0x20] sm:$0xff] }
 0xa13   :  { %8446 = vmatpush1.bf16.msra.mxu1 %v8445_v15  ;;  %8510 = vmatpush1.bf16.msra.mxu0 %v8509_v25  ;;  %v4575_v15 = vld [vmem:[%s12518_s12 + $0x4e0] sm:$0xff]  ;;  %v8467_v25 = vpack.c.bf16 %v4576_v27, %v4568_v30  ;;  %v4658_v30 = vld [vmem:[%s12518_s12 + $0x778] sm:$0xff] }
 0xa14   :  { %8448 = vmatprep.subr.bf16.mxu1 %v8447_v3  ;;  %8512 = vmatprep.subr.bf16.mxu0 %v8511_v1  ;;  %v4577_v3 = vld [vmem:[%s12518_s12 + $0x4f0] sm:$0xff]  ;;  %v4584_v1 = vld [vmem:[%s12518_s12 + $0x528] sm:$0xff]  ;;  %v8469_v39 = vpack.c.bf16 %v4575_v15, %v4567_v21  ;;  %v8551_v21 = vpack.c.bf16 %v4658_v30, %v4650_v13  ;;  %v5016_v30 = vld [vmem:[%s12520_s14 + $0x38] sm:$0xff] }
 0xa15   :  { %v8533_v19 = vpack.c.bf16 %v4577_v3, %v4569_v48  ;;  %v4649_v15 = vld [vmem:[%s12518_s12 + $0x730] sm:$0xff]  ;;  %v4672_v48 = vld [vmem:[%s12518_s12 + $0x7e8] sm:$0xff]  ;;  %v4666_v3 = vld [vmem:[%s12518_s12 + $0x7b8] sm:$0xff] }
 0xa16   :  { %v5015_v13 = vld [vmem:[%s12520_s14 + $0x30] sm:$0xff] }
 0xa17   :  { %8450 = vmatpush1.bf16.msra.mxu1 %v8449_v16  ;;  %8514 = vmatpush1.bf16.msra.mxu0 %v8513_v22  ;;  %v4591_v16 = vld [vmem:[%s12518_s12 + $0x560] sm:$0xff]  ;;  %v8471_v22 = vpack.c.bf16 %v4592_v17, %v4584_v1  ;;  %v4674_v1 = vld [vmem:[%s12518_s12 + $0x7f8] sm:$0xff] }
 0xa18   :  { %8452 = vmatprep.subr.bf16.mxu1 %v8451_v26  ;;  %8516 = vmatprep.subr.bf16.mxu0 %v8515_v38  ;;  %v4593_v26 = vld [vmem:[%s12518_s12 + $0x570] sm:$0xff]  ;;  %v4600_v38 = vld [vmem:[%s12518_s12 + $0x5a8] sm:$0xff]  ;;  %v8473_v34 = vpack.c.bf16 %v4591_v16, %v4583_v37  ;;  %v8555_v37 = vpack.c.bf16 %v4674_v1, %v4666_v3  ;;  %v5017_v3 = vld [vmem:[%s12520_s14 + $0x40] sm:$0xff] }
 0xa19   :  { %v8537_v41 = vpack.c.bf16 %v4593_v26, %v4585_v28  ;;  %v4665_v16 = vld [vmem:[%s12518_s12 + $0x7b0] sm:$0xff]  ;;  %v5026_v28 = vld [vmem:[%s12520_s14 + $0x88] sm:$0xff]  ;;  %v5057_v26 = vld [vmem:[%s12520_s14 + $0x180] sm:$0xff] }
 0xa1a   :  { %v5018_v1 = vld [vmem:[%s12520_s14 + $0x48] sm:$0xff] }
 0xa1b   :  { %8454 = vmatpush1.bf16.msra.mxu1 %v8453_v63  ;;  %8518 = vmatpush1.bf16.msra.mxu0 %v8517_v6  ;;  %v4607_v63 = vld [vmem:[%s12518_s12 + $0x5e0] sm:$0xff]  ;;  %v8475_v6 = vpack.c.bf16 %v4608_v23, %v4600_v38  ;;  %v5058_v38 = vld [vmem:[%s12520_s14 + $0x188] sm:$0xff] }
 0xa1c   :  { %8456 = vmatprep.subr.bf16.mxu1 %v8455_v54  ;;  %8520 = vmatprep.subr.bf16.mxu0 %v8519_v12  ;;  %v4609_v54 = vld [vmem:[%s12518_s12 + $0x5f0] sm:$0xff]  ;;  %v4616_v12 = vld [vmem:[%s12518_s12 + $0x628] sm:$0xff]  ;;  %v8477_v40 = vpack.c.bf16 %v4607_v63, %v4599_v53  ;;  %v8591_v53 = vpack.c.bf16 %v5058_v38, %v5057_v26  ;;  %v5041_v63 = vld [vmem:[%s12520_s14 + $0x100] sm:$0xff] }
 0xa1d   :  { %v8541_v31 = vpack.c.bf16 %v4609_v54, %v4601_v18  ;;  %v5028_v18 = vld [vmem:[%s12520_s14 + $0x98] sm:$0xff]  ;;  %v5059_v54 = vld [vmem:[%s12520_s14 + $0x190] sm:$0xff] }
 0xa1e   :  { %v5019_v26 = vld [vmem:[%s12520_s14 + $0x50] sm:$0xff]  ;;  %v5020_v38 = vld [vmem:[%s12520_s14 + $0x58] sm:$0xff] }
 0xa1f   :  { %8458 = vmatpush1.bf16.msra.mxu1 %v8457_v44  ;;  %8522 = vmatpush1.bf16.msra.mxu0 %v8521_v5  ;;  %v4623_v44 = vld [vmem:[%s12518_s12 + $0x660] sm:$0xff]  ;;  %v8479_v5 = vpack.c.bf16 %v4624_v2, %v4616_v12  ;;  %v5060_v12 = vld [vmem:[%s12520_s14 + $0x198] sm:$0xff] }
 0xa20   :  { %8460 = vmatprep.subr.bf16.mxu1 %v8459_v59  ;;  %8524 = vmatprep.subr.bf16.mxu0 %v8523_v60  ;;  %v4625_v59 = vld [vmem:[%s12518_s12 + $0x670] sm:$0xff]  ;;  %v4632_v60 = vld [vmem:[%s12518_s12 + $0x6a8] sm:$0xff]  ;;  %v8481_v7 = vpack.c.bf16 %v4623_v44, %v4615_v45  ;;  %v8595_v45 = vpack.c.bf16 %v5060_v12, %v5059_v54  ;;  %v5021_v54 = vld [vmem:[%s12520_s14 + $0x60] sm:$0xff] }
 0xa21   :  { %v8545_v14 = vpack.c.bf16 %v4625_v59, %v4617_v57  ;;  %v5043_v44 = vld [vmem:[%s12520_s14 + $0x110] sm:$0xff]  ;;  %v5030_v57 = vld [vmem:[%s12520_s14 + $0xa8] sm:$0xff]  ;;  %v5061_v59 = vld [vmem:[%s12520_s14 + $0x1a0] sm:$0xff] }
 0xa23   :  { %8462 = vmatpush1.bf16.msra.mxu1 %v8461_v42  ;;  %8526 = vmatpush1.bf16.msra.mxu0 %v8525_v62  ;;  %v4639_v42 = vld [vmem:[%s12518_s12 + $0x6e0] sm:$0xff]  ;;  %v8483_v62 = vpack.c.bf16 %v4640_v29, %v4632_v60  ;;  %v5062_v60 = vld [vmem:[%s12520_s14 + $0x1a8] sm:$0xff] }
 0xa24   :  { %8464 = vmatprep.subr.bf16.mxu1 %v8463_v56  ;;  %8528 = vmatprep.subr.bf16.mxu0 %v8527_v58  ;;  %v4641_v56 = vld [vmem:[%s12518_s12 + $0x6f0] sm:$0xff]  ;;  %v4648_v58 = vld [vmem:[%s12518_s12 + $0x728] sm:$0xff]  ;;  %v8485_v27 = vpack.c.bf16 %v4639_v42, %v4631_v0  ;;  %v8599_v0 = vpack.c.bf16 %v5062_v60, %v5061_v59 }
 0xa25   :  { %v8549_v20 = vpack.c.bf16 %v4641_v56, %v4633_v11  ;;  %v5046_v42 = vld [vmem:[%s12520_s14 + $0x128] sm:$0xff]  ;;  %v5063_v11 = vld [vmem:[%s12520_s14 + $0x1b0] sm:$0xff]  ;;  %v5064_v56 = vld [vmem:[%s12520_s14 + $0x1b8] sm:$0xff] }
 0xa26   :  { %v5023_v59 = vld [vmem:[%s12520_s14 + $0x70] sm:$0xff] }
 0xa27   :  { %8466 = vmatpush1.bf16.msra.mxu1 %v8465_v47  ;;  %8530 = vmatpush1.bf16.msra.mxu0 %v8529_v55  ;;  %v4655_v47 = vld [vmem:[%s12518_s12 + $0x760] sm:$0xff]  ;;  %v8487_v55 = vpack.c.bf16 %v4656_v8, %v4648_v58 }
 0xa28   :  { %8468 = vmatprep.subr.bf16.mxu1 %v8467_v25  ;;  %8532 = vmatprep.subr.bf16.mxu0 %v8531_v32  ;;  %v4657_v25 = vld [vmem:[%s12518_s12 + $0x770] sm:$0xff]  ;;  %v4664_v32 = vld [vmem:[%s12518_s12 + $0x7a8] sm:$0xff]  ;;  %v8489_v17 = vpack.c.bf16 %v4655_v47, %v4647_v24  ;;  %v5048_v47 = vld [vmem:[%s12520_s14 + $0x138] sm:$0xff] }
 0xa29   :  { %v8553_v4 = vpack.c.bf16 %v4657_v25, %v4649_v15  ;;  %v5047_v24 = vld [vmem:[%s12520_s14 + $0x130] sm:$0xff]  ;;  %v5065_v15 = vld [vmem:[%s12520_s14 + $0x1c0] sm:$0xff]  ;;  %v5066_v25 = vld [vmem:[%s12520_s14 + $0x1c8] sm:$0xff] }
 0xa2b   :  { %8470 = vmatpush1.bf16.msra.mxu1 %v8469_v39  ;;  %8534 = vmatpush1.bf16.msra.mxu0 %v8533_v19  ;;  %v4671_v39 = vld [vmem:[%s12518_s12 + $0x7e0] sm:$0xff]  ;;  %v8491_v19 = vpack.c.bf16 %v4672_v48, %v4664_v32  ;;  %v8573_v32 = vpack.c.bf16 %v5016_v30, %v5015_v13  ;;  %v8605_v48 = vpack.c.bf16 %v5048_v47, %v5047_v24 }
 0xa2c   :  { %8472 = vmatprep.subr.bf16.mxu1 %v8471_v22  ;;  %8536 = vmatprep.subr.bf16.mxu0 %v8535_v36  ;;  %v4673_v22 = vld [vmem:[%s12518_s12 + $0x7f0] sm:$0xff]  ;;  %v5025_v36 = vld [vmem:[%s12520_s14 + $0x80] sm:$0xff]  ;;  %v8493_v23 = vpack.c.bf16 %v4671_v39, %v4663_v35  ;;  %v5050_v39 = vld [vmem:[%s12520_s14 + $0x148] sm:$0xff] }
 0xa2d   :  { %v8557_v10 = vpack.c.bf16 %v4673_v22, %v4665_v16  ;;  %v5049_v35 = vld [vmem:[%s12520_s14 + $0x140] sm:$0xff]  ;;  %v5067_v16 = vld [vmem:[%s12520_s14 + $0x1d0] sm:$0xff]  ;;  %v5068_v22 = vld [vmem:[%s12520_s14 + $0x1d8] sm:$0xff] }
 0xa2f   :  { %8474 = vmatpush1.bf16.msra.mxu1 %v8473_v34  ;;  %8538 = vmatpush1.bf16.msra.mxu0 %v8537_v41  ;;  %v5010_v34 = vld [vmem:[%s12520_s14 + $0x8] sm:$0xff]  ;;  %v8559_v41 = vpack.c.bf16 %v5026_v28, %v5025_v36  ;;  %v8577_v36 = vpack.c.bf16 %v5018_v1, %v5017_v3  ;;  %v8609_v28 = vpack.c.bf16 %v5050_v39, %v5049_v35  ;;  %v5105_v39 = vld [vmem:[%s12520_s14 + $0x300] sm:$0xff] }
 0xa30   :  { %8476 = vmatprep.subr.bf16.mxu1 %v8475_v6  ;;  %8540 = vmatprep.subr.bf16.mxu0 %v8539_v9  ;;  %v5042_v6 = vld [vmem:[%s12520_s14 + $0x108] sm:$0xff]  ;;  %v5027_v9 = vld [vmem:[%s12520_s14 + $0x90] sm:$0xff]  ;;  %v8561_v2 = vpack.c.bf16 %v5010_v34, %v5009_v43  ;;  %v5052_v34 = vld [vmem:[%s12520_s14 + $0x158] sm:$0xff] }
 0xa31   :  { %v8593_v61 = vpack.c.bf16 %v5042_v6, %v5041_v63  ;;  %v5051_v43 = vld [vmem:[%s12520_s14 + $0x150] sm:$0xff]  ;;  %v5069_v63 = vld [vmem:[%s12520_s14 + $0x1e0] sm:$0xff]  ;;  %v5070_v6 = vld [vmem:[%s12520_s14 + $0x1e8] sm:$0xff] }
 0xa32   :  { %v5074_v3 = vld [vmem:[%s12520_s14 + $0x208] sm:$0xff] }
 0xa33   :  { %8478 = vmatpush1.bf16.msra.mxu1 %v8477_v40  ;;  %8542 = vmatpush1.bf16.msra.mxu0 %v8541_v31  ;;  %v5012_v40 = vld [vmem:[%s12520_s14 + $0x18] sm:$0xff]  ;;  %v8563_v31 = vpack.c.bf16 %v5028_v18, %v5027_v9  ;;  %v8581_v9 = vpack.c.bf16 %v5020_v38, %v5019_v26  ;;  %v8613_v18 = vpack.c.bf16 %v5052_v34, %v5051_v43  ;;  %v5075_v34 = vld [vmem:[%s12520_s14 + $0x210] sm:$0xff] }
 0xa34   :  { %8480 = vmatprep.subr.bf16.mxu1 %v8479_v5  ;;  %8544 = vmatprep.subr.bf16.mxu0 %v8543_v52  ;;  %v5044_v5 = vld [vmem:[%s12520_s14 + $0x118] sm:$0xff]  ;;  %v5029_v52 = vld [vmem:[%s12520_s14 + $0xa0] sm:$0xff]  ;;  %v8565_v29 = vpack.c.bf16 %v5012_v40, %v5011_v50  ;;  %v5054_v40 = vld [vmem:[%s12520_s14 + $0x168] sm:$0xff] }
 0xa35   :  { %v8597_v46 = vpack.c.bf16 %v5044_v5, %v5043_v44  ;;  %v5053_v50 = vld [vmem:[%s12520_s14 + $0x160] sm:$0xff]  ;;  %v5071_v44 = vld [vmem:[%s12520_s14 + $0x1f0] sm:$0xff]  ;;  %v5124_v26 = vld [vmem:[%s12520_s14 + $0x398] sm:$0xff] }
 0xa37   :  { %8482 = vmatpush1.bf16.msra.mxu1 %v8481_v7  ;;  %8546 = vmatpush1.bf16.msra.mxu0 %v8545_v14  ;;  %v5014_v7 = vld [vmem:[%s12520_s14 + $0x28] sm:$0xff]  ;;  %v8567_v14 = vpack.c.bf16 %v5030_v57, %v5029_v52  ;;  %v8617_v52 = vpack.c.bf16 %v5054_v40, %v5053_v50  ;;  %v5072_v57 = vld [vmem:[%s12520_s14 + $0x1f8] sm:$0xff] }
 0xa38   :  { %8484 = vmatprep.subr.bf16.mxu1 %v8483_v62  ;;  %8548 = vmatprep.subr.bf16.mxu0 %v8547_v49  ;;  %v5031_v62 = vld [vmem:[%s12520_s14 + $0xb0] sm:$0xff]  ;;  %v5032_v49 = vld [vmem:[%s12520_s14 + $0xb8] sm:$0xff]  ;;  %v8569_v58 = vpack.c.bf16 %v5014_v7, %v5013_v33  ;;  %v5126_v50 = vld [vmem:[%s12520_s14 + $0x3a8] sm:$0xff] }
 0xa39   :  { %v5055_v33 = vld [vmem:[%s12520_s14 + $0x170] sm:$0xff]  ;;  %v5056_v7 = vld [vmem:[%s12520_s14 + $0x178] sm:$0xff] }
 0xa3b   :  { %8486 = vmatpush1.bf16.msra.mxu1 %v8485_v27  ;;  %8550 = vmatpush1.bf16.msra.mxu0 %v8549_v20  ;;  %v8571_v27 = vpack.c.bf16 %v5032_v49, %v5031_v62  ;;  %v8603_v20 = vpack.c.bf16 %v5064_v56, %v5063_v11  ;;  %v5121_v62 = vld [vmem:[%s12520_s14 + $0x380] sm:$0xff]  ;;  %v5122_v11 = vld [vmem:[%s12520_s14 + $0x388] sm:$0xff] }
 0xa3c   :  { %8488 = vmatprep.subr.bf16.mxu1 %v8487_v55  ;;  %8552 = vmatprep.subr.bf16.mxu0 %v8551_v21  ;;  %v5033_v55 = vld [vmem:[%s12520_s14 + $0xc0] sm:$0xff]  ;;  %v5034_v21 = vld [vmem:[%s12520_s14 + $0xc8] sm:$0xff]  ;;  %v8655_v56 = vpack.c.bf16 %v5122_v11, %v5121_v62  ;;  %v5112_v11 = vld [vmem:[%s12520_s14 + $0x338] sm:$0xff] }
 0xa3f   :  { %8490 = vmatpush1.bf16.msra.mxu1 %v8489_v17  ;;  %8554 = vmatpush1.bf16.msra.mxu0 %v8553_v4  ;;  %v8575_v17 = vpack.c.bf16 %v5034_v21, %v5033_v55  ;;  %v8607_v4 = vpack.c.bf16 %v5066_v25, %v5065_v15 }
 0xa40   :  { %8492 = vmatprep.subr.bf16.mxu1 %v8491_v19  ;;  %8556 = vmatprep.subr.bf16.mxu0 %v8555_v37  ;;  %v5035_v19 = vld [vmem:[%s12520_s14 + $0xd0] sm:$0xff]  ;;  %v5036_v37 = vld [vmem:[%s12520_s14 + $0xd8] sm:$0xff] }
 0xa43   :  { %8494 = vmatpush1.bf16.msra.mxu1 %v8493_v23  ;;  %8558 = vmatpush1.bf16.msra.mxu0 %v8557_v10  ;;  %v8579_v23 = vpack.c.bf16 %v5036_v37, %v5035_v19  ;;  %v8611_v10 = vpack.c.bf16 %v5068_v22, %v5067_v16  ;;  %v5106_v19 = vld [vmem:[%s12520_s14 + $0x308] sm:$0xff]  ;;  %v5091_v37 = vld [vmem:[%s12520_s14 + $0x290] sm:$0xff] }
 0xa44   :  { %8560 = vmatprep.subr.bf16.mxu1 %v8559_v41  ;;  %8592 = vmatprep.subr.bf16.mxu0 %v8591_v53  ;;  %v5037_v41 = vld [vmem:[%s12520_s14 + $0xe0] sm:$0xff]  ;;  %v5038_v53 = vld [vmem:[%s12520_s14 + $0xe8] sm:$0xff]  ;;  %v8657_v43 = vpack.c.bf16 %v5106_v19, %v5105_v39  ;;  %v5083_v39 = vld [vmem:[%s12520_s14 + $0x250] sm:$0xff] }
 0xa45   :  { %v8583_v12 = vpack.c.bf16 %v5038_v53, %v5037_v41  ;;  %v5076_v41 = vld [vmem:[%s12520_s14 + $0x218] sm:$0xff] }
 0xa46   :  { %4924 = vmatmul.mubr.f32.vlgmr.msra.gmra.mrb[152].mxu1 %v11733_v51  ;;  %4995 = vmatmul.mubr.f32.vlgmr.msra.gmra.mrb[92].mxu0 %v11733_v51  ;;  %v5045_v51 = vld [vmem:[%s12520_s14 + $0x120] sm:$0xff]  ;;  %v8629_v40 = vpack.c.bf16 %v5076_v41, %v5075_v34  ;;  %v5084_v19 = vld [vmem:[%s12520_s14 + $0x258] sm:$0xff]  ;;  %v5086_v41 = vld [vmem:[%s12520_s14 + $0x268] sm:$0xff] }
 0xa47   :  { %8562 = vmatpush3.bf16.msra.mxu1 %v8561_v2  ;;  %8594 = vmatpush3.bf16.msra.mxu0 %v8593_v61  ;;  %v8601_v8 = vpack.c.bf16 %v5046_v42, %v5045_v51  ;;  %v8615_v2 = vpack.c.bf16 %v5070_v6, %v5069_v63  ;;  %v5022_v61 = vld [vmem:[%s12520_s14 + $0x68] sm:$0xff]  ;;  %v5089_v51 = vld [vmem:[%s12520_s14 + $0x280] sm:$0xff] }
 0xa48   :  { %8564 = vmatprep.subr.bf16.mxu1 %v8563_v31  ;;  %8596 = vmatprep.subr.bf16.mxu0 %v8595_v45  ;;  %v5039_v31 = vld [vmem:[%s12520_s14 + $0xf0] sm:$0xff]  ;;  %v5040_v45 = vld [vmem:[%s12520_s14 + $0xf8] sm:$0xff]  ;;  %v8585_v5 = vpack.c.bf16 %v5022_v61, %v5021_v54  ;;  %v5090_v42 = vld [vmem:[%s12520_s14 + $0x288] sm:$0xff] }
 0xa49   :  { %v8587_v60 = vpack.c.bf16 %v5040_v45, %v5039_v31  ;;  %v8623_v49 = vpack.c.bf16 %v5090_v42, %v5089_v51  ;;  %v5108_v54 = vld [vmem:[%s12520_s14 + $0x318] sm:$0xff]  ;;  %v5125_v61 = vld [vmem:[%s12520_s14 + $0x3a0] sm:$0xff] }
 0xa4a   :  { %v5077_v45 = vld [vmem:[%s12520_s14 + $0x220] sm:$0xff]  ;;  %v5080_v51 = vld [vmem:[%s12520_s14 + $0x238] sm:$0xff] }
 0xa4b   :  { %8566 = vmatpush3.bf16.msra.mxu1 %v8565_v29  ;;  %8598 = vmatpush3.bf16.msra.mxu0 %v8597_v46  ;;  %v8619_v29 = vpack.c.bf16 %v5072_v57, %v5071_v44  ;;  %v5024_v46 = vld [vmem:[%s12520_s14 + $0x78] sm:$0xff]  ;;  %v5078_v44 = vld [vmem:[%s12520_s14 + $0x228] sm:$0xff]  ;;  %v5109_v57 = vld [vmem:[%s12520_s14 + $0x320] sm:$0xff] }
 0xa4c   :  { %8568 = vmatprep.subr.bf16.mxu1 %v8567_v14  ;;  %8600 = vmatprep.subr.bf16.mxu0 %v8599_v0  ;;  %v8589_v14 = vpack.c.bf16 %v5024_v46, %v5023_v59  ;;  %v8621_v0 = vpack.c.bf16 %v5056_v7, %v5055_v33  ;;  %v5110_v59 = vld [vmem:[%s12520_s14 + $0x328] sm:$0xff]  ;;  %v5127_v46 = vld [vmem:[%s12520_s14 + $0x3b0] sm:$0xff]  ;;  %v5128_v33 = vld [vmem:[%s12520_s14 + $0x3b8] sm:$0xff]  ;;  %v8633_v7 = vpack.c.bf16 %v5078_v44, %v5077_v45 }
 0xa4d   :  { %v8667_v62 = vpack.c.bf16 %v5128_v33, %v5127_v46  ;;  %v5085_v34 = vld [vmem:[%s12520_s14 + $0x260] sm:$0xff]  ;;  %v5088_v44 = vld [vmem:[%s12520_s14 + $0x278] sm:$0xff] }
 0xa4f   :  { %8570 = vmatpush3.bf16.msra.mxu1 %v8569_v58  ;;  %8602 = vmatpush3.bf16.msra.mxu0 %v8601_v8  ;;  %v4677_v58 = vlaneseq }
 0xa50   :  { %8572 = vmatprep.subr.bf16.mxu1 %v8571_v27  ;;  %8604 = vmatprep.subr.bf16.mxu0 %v8603_v20  ;;  %v12292_v27 = vld [vmem:[%s12519_s13] sm:$0xff] }
 0xa51   :  { %v12285_v8 = vshrl.u32 %v4677_v58, 7  ;;  %v5098_v58 = vld [vmem:[%s12520_s14 + $0x2c8] sm:$0xff] }
 0xa53   :  { %8574 = vmatpush3.bf16.msra.mxu1 %v8573_v32  ;;  %8606 = vmatpush3.bf16.msra.mxu0 %v8605_v48  ;;  %v4679_v13 = vsub.s32 0, %v12285_v8  ;;  %v4687_v30 = vsub.s32 2, %v12285_v8  ;;  %v4683_v20 = vsub.s32 1, %v12285_v8  ;;  %v4691_v24 = vsub.s32 3, %v12285_v8  ;;  %v5073_v48 = vld [vmem:[%s12520_s14 + $0x200] sm:$0xff] }
 0xa54   :  { %8576 = vmatprep.subr.bf16.mxu1 %v8575_v17  ;;  %8608 = vmatprep.subr.bf16.mxu0 %v8607_v4  ;;  %v4699_v46 = vsub.s32 5, %v12285_v8  ;;  %v4707_v33 = vsub.s32 7, %v12285_v8 }
 0xa55   :  { %v4680_v47 = vrot.slane %v12292_v27, %v4679_v13  ;;  %v4688_v55 = vrot.slane %v12292_v27, %v4687_v30  ;;  %v4684_v21 = vrot.slane %v12292_v27, %v4683_v20  ;;  %v4692_v15 = vrot.slane %v12292_v27, %v4691_v24  ;;  %v5129_v13 = vld [vmem:[%s12520_s14 + $0x3c0] sm:$0xff]  ;;  %v5130_v30 = vld [vmem:[%s12520_s14 + $0x3c8] sm:$0xff] }
 0xa57   :  { %8578 = vmatpush3.bf16.msra.mxu1 %v8577_v36  ;;  %8610 = vmatpush3.bf16.msra.mxu0 %v8609_v28  ;;  %v5092_v36 = vld [vmem:[%s12520_s14 + $0x298] sm:$0xff]  ;;  %v5123_v28 = vld [vmem:[%s12520_s14 + $0x390] sm:$0xff] }
 0xa58   :  { %8580 = vmatprep.subr.bf16.mxu1 %v8579_v23  ;;  %8612 = vmatprep.subr.bf16.mxu0 %v8611_v10  ;;  %v8625_v10 = vpack.c.bf16 %v5074_v3, %v5073_v48  ;;  %v8627_v6 = vpack.c.bf16 %v5092_v36, %v5091_v37  ;;  %v5099_v48 = vld [vmem:[%s12520_s14 + $0x2d0] sm:$0xff]  ;;  %v5100_v3 = vld [vmem:[%s12520_s14 + $0x2d8] sm:$0xff] }
 0xa59   :  { %v8643_v37 = vpack.c.bf16 %v5100_v3, %v5099_v48  ;;  %v5116_v36 = vld [vmem:[%s12520_s14 + $0x358] sm:$0xff] }
 0xa5b   :  { %8582 = vmatpush3.bf16.msra.mxu1 %v8581_v9  ;;  %8614 = vmatpush3.bf16.msra.mxu0 %v8613_v18  ;;  %v8659_v9 = vpack.c.bf16 %v5124_v26, %v5123_v28  ;;  %v5107_v18 = vld [vmem:[%s12520_s14 + $0x310] sm:$0xff]  ;;  %v5101_v28 = vld [vmem:[%s12520_s14 + $0x2e0] sm:$0xff]  ;;  %v5102_v26 = vld [vmem:[%s12520_s14 + $0x2e8] sm:$0xff] }
 0xa5c   :  { %8584 = vmatprep.subr.bf16.mxu1 %v8583_v12  ;;  %8616 = vmatprep.subr.bf16.mxu0 %v8615_v2  ;;  %v5093_v12 = vld [vmem:[%s12520_s14 + $0x2a0] sm:$0xff]  ;;  %v5094_v2 = vld [vmem:[%s12520_s14 + $0x2a8] sm:$0xff]  ;;  %v8661_v31 = vpack.c.bf16 %v5108_v54, %v5107_v18  ;;  %v5103_v18 = vld [vmem:[%s12520_s14 + $0x2f0] sm:$0xff] }
 0xa5d   :  { %v5104_v54 = vld [vmem:[%s12520_s14 + $0x2f8] sm:$0xff] }
 0xa5f   :  { %8586 = vmatpush3.bf16.msra.mxu1 %v8585_v5  ;;  %8618 = vmatpush3.bf16.msra.mxu0 %v8617_v52  ;;  %v8631_v5 = vpack.c.bf16 %v5094_v2, %v5093_v12  ;;  %v8663_v52 = vpack.c.bf16 %v5126_v50, %v5125_v61  ;;  %v5135_v12 = vld [vmem:[%s12520_s14 + $0x3f0] sm:$0xff]  ;;  %v5136_v2 = vld [vmem:[%s12520_s14 + $0x3f8] sm:$0xff]  ;;  %v8649_v61 = vpack.c.bf16 %v5086_v41, %v5085_v34 }
 0xa60   :  { %8588 = vmatprep.subr.bf16.mxu1 %v8587_v60  ;;  %8620 = vmatprep.subr.bf16.mxu0 %v8619_v29  ;;  %v5095_v60 = vld [vmem:[%s12520_s14 + $0x2b0] sm:$0xff]  ;;  %v5096_v29 = vld [vmem:[%s12520_s14 + $0x2b8] sm:$0xff]  ;;  %v8683_v45 = vpack.c.bf16 %v5136_v2, %v5135_v12 }
 0xa61   :  { %v8635_v42 = vpack.c.bf16 %v5096_v29, %v5095_v60  ;;  %v4695_v60 = vsub.s32 4, %v12285_v8  ;;  %v4703_v29 = vsub.s32 6, %v12285_v8 }
 0xa63   :  { %8590 = vmatpush3.bf16.msra.mxu1 %v8589_v14  ;;  %8622 = vmatpush3.bf16.msra.mxu0 %v8621_v0  ;;  %v8665_v14 = vpack.c.bf16 %v5110_v59, %v5109_v57  ;;  %v5079_v0 = vld [vmem:[%s12520_s14 + $0x230] sm:$0xff] }
 0xa64   :  { %8624 = vmatprep.subr.bf16.mxu1 %v8623_v49  ;;  %8656 = vmatprep.subr.bf16.mxu0 %v8655_v56  ;;  %v5111_v49 = vld [vmem:[%s12520_s14 + $0x330] sm:$0xff]  ;;  %v5097_v56 = vld [vmem:[%s12520_s14 + $0x2c0] sm:$0xff]  ;;  %v8637_v20 = vpack.c.bf16 %v5080_v51, %v5079_v0  ;;  %v4700_v0 = vrot.slane %v12292_v27, %v4699_v46  ;;  %v4708_v51 = vrot.slane %v12292_v27, %v4707_v33 }
 0xa65   :  { %v8669_v24 = vpack.c.bf16 %v5112_v11, %v5111_v49 }
 0xad9   :  { %v4783_v25 = vpop.f32.mrb[150].mxu1  ;;  %v4854_v32 = vpop.f32.mrb[90].mxu0 }
 0xada   :  { %v4784_v1 = vadd.f32 %v4783_v25, %v4680_v47  ;;  %v4855_v17 = vadd.f32 %v4854_v32, %v4688_v55  ;;  %v4785_v4 = vpop.f32.mrb[151].mxu1  ;;  %v4856_v35 = vpop.f32.mrb[91].mxu0  ;;  %v5081_v47 = vld [vmem:[%s12520_s14 + $0x240] sm:$0xff]  ;;  %v5082_v55 = vld [vmem:[%s12520_s14 + $0x248] sm:$0xff] }
 0xadb   :  { %v4786_v16 = vadd.f32 %v4785_v4, %v4684_v21  ;;  %v4857_v22 = vadd.f32 %v4856_v35, %v4692_v15  ;;  %v8639_v21 = vpack.c.bf16 %v5098_v58, %v5097_v56  ;;  %v8671_v15 = vpack.c.bf16 %v5130_v30, %v5129_v13  ;;  %v5113_v25 = vld [vmem:[%s12520_s14 + $0x340] sm:$0xff]  ;;  %v5114_v32 = vld [vmem:[%s12520_s14 + $0x348] sm:$0xff] }
 0xadc   :  { %v5001_v53 = vmax.f32 %v4784_v1, 0.0  ;;  %v5003_v63 = vmax.f32 %v4855_v17, 0.0  ;;  %v5131_v1 = vld [vmem:[%s12520_s14 + $0x3d0] sm:$0xff]  ;;  %v5132_v17 = vld [vmem:[%s12520_s14 + $0x3d8] sm:$0xff]  ;;  %v8641_v4 = vpack.c.bf16 %v5082_v55, %v5081_v47  ;;  %v8673_v35 = vpack.c.bf16 %v5114_v32, %v5113_v25 }
 0xadd   :  { %v5002_v38 = vmax.f32 %v4786_v16, 0.0  ;;  %v5004_v23 = vmax.f32 %v4857_v22, 0.0  ;;  %v8675_v16 = vpack.c.bf16 %v5132_v17, %v5131_v1  ;;  %v5115_v22 = vld [vmem:[%s12520_s14 + $0x350] sm:$0xff] }
 0xadf   :  { %5208 = vmatprep.mubr.f32.mxu1 %v5002_v38  ;;  %5278 = vmatprep.mubr.f32.mxu0 %v5004_v23  ;;  %v5133_v38 = vld [vmem:[%s12520_s14 + $0x3e0] sm:$0xff]  ;;  %v5134_v23 = vld [vmem:[%s12520_s14 + $0x3e8] sm:$0xff] }
 0xae0   :  { %5209 = vmatmul.mubr.f32.vlgmr.msra.gmra.mrb[154].mxu1 %v5001_v53  ;;  %5279 = vmatmul.mubr.f32.vlgmr.msra.gmra.mrb[94].mxu0 %v5003_v63  ;;  %v8647_v53 = vpack.c.bf16 %v5102_v26, %v5101_v28  ;;  %v8679_v63 = vpack.c.bf16 %v5134_v23, %v5133_v38 }
 0xae1   :  { %8626 = vmatpush3.bf16.msra.mxu1 %v8625_v10  ;;  %8658 = vmatpush3.bf16.msra.mxu0 %v8657_v43  ;;  %v8645_v10 = vpack.c.bf16 %v5084_v19, %v5083_v39  ;;  %v8677_v43 = vpack.c.bf16 %v5116_v36, %v5115_v22 }
 0xae2   :  { %8628 = vmatprep.subr.bf16.mxu1 %v8627_v6  ;;  %8660 = vmatprep.subr.bf16.mxu0 %v8659_v9  ;;  %v5117_v6 = vld [vmem:[%s12520_s14 + $0x360] sm:$0xff]  ;;  %v5118_v9 = vld [vmem:[%s12520_s14 + $0x368] sm:$0xff] }
 0xae3   :  { %v8681_v50 = vpack.c.bf16 %v5118_v9, %v5117_v6 }
 0xae5   :  { %8630 = vmatpush3.bf16.msra.mxu1 %v8629_v40  ;;  %8662 = vmatpush3.bf16.msra.mxu0 %v8661_v31  ;;  %v5087_v40 = vld [vmem:[%s12520_s14 + $0x270] sm:$0xff]  ;;  %v8651_v31 = vpack.c.bf16 %v5104_v54, %v5103_v18 }
 0xae6   :  { %8632 = vmatprep.subr.bf16.mxu1 %v8631_v5  ;;  %8664 = vmatprep.subr.bf16.mxu0 %v8663_v52  ;;  %v5119_v5 = vld [vmem:[%s12520_s14 + $0x370] sm:$0xff]  ;;  %v5120_v52 = vld [vmem:[%s12520_s14 + $0x378] sm:$0xff]  ;;  %v8653_v57 = vpack.c.bf16 %v5088_v44, %v5087_v40 }
 0xae7   :  { %v8685_v59 = vpack.c.bf16 %v5120_v52, %v5119_v5 }
 0xae9   :  { %8634 = vmatpush3.bf16.msra.mxu1 %v8633_v7  ;;  %8666 = vmatpush3.bf16.msra.mxu0 %v8665_v14  ;;  %v4696_v7 = vrot.slane %v12292_v27, %v4695_v60  ;;  %v4704_v14 = vrot.slane %v12292_v27, %v4703_v29  ;;  %v5515_v27 = vld [vmem:[%s12521_s15] ss:$0 sm:$0xff]  ;;  %s8816_s15 = smov [#allocation5]  }
 0xaea   :  { %8636 = vmatprep.subr.bf16.mxu1 %v8635_v42  ;;  %8668 = vmatprep.subr.bf16.mxu0 %v8667_v62  ;;  %s5444_s20 = sshll.u32 %s8816_s15, 4  ;;  %s5445_s20 = int_to_ptr.vmem [resolvable:$true] %s5444_s20 }
 0xaeb   :  { %s8788_s30 = scalar_lea.vmem %s5445_s20, 32  ;;  %p8793_p1 = scmp.lt.s32.totalorder %s5445_s20, %s5445_s20 }
 0xaec   :  { %p8789_p0 = scmp.ne.s32.totalorder %s5445_s20, %s8788_s30  ;;  %p8794_p2 = scmp.lt.s32.totalorder %s8788_s30, %s8788_s30 }
 0xaed   :  { %8638 = vmatpush3.bf16.msra.mxu1 %v8637_v20  ;;  %8670 = vmatpush3.bf16.msra.mxu0 %v8669_v24 }
 0xaee   :  { %8640 = vmatprep.subr.bf16.mxu1 %v8639_v21  ;;  %8672 = vmatprep.subr.bf16.mxu0 %v8671_v15  ;;  %p8795_p3 = por %p8794_p2, %p8793_p1 }
 0xaf0   :  { %p8796_p4 = pnand %p8795_p3, %p8789_p0 }
 0xaf1   :  { %8642 = vmatpush3.bf16.msra.mxu1 %v8641_v4  ;;  %8674 = vmatpush3.bf16.msra.mxu0 %v8673_v35 }
 0xaf2   :  { %8644 = vmatprep.subr.bf16.mxu1 %v8643_v37  ;;  %8676 = vmatprep.subr.bf16.mxu0 %v8675_v16 }
 0xaf5   :  { %8646 = vmatpush3.bf16.msra.mxu1 %v8645_v10  ;;  %8678 = vmatpush3.bf16.msra.mxu0 %v8677_v43 }
 0xaf6   :  { %8648 = vmatprep.subr.bf16.mxu1 %v8647_v53  ;;  %8680 = vmatprep.subr.bf16.mxu0 %v8679_v63 }
 0xaf9   :  { %8650 = vmatpush3.bf16.msra.mxu1 %v8649_v61  ;;  %8682 = vmatpush3.bf16.msra.mxu0 %v8681_v50 }
 0xafa   :  { %8652 = vmatprep.subr.bf16.mxu1 %v8651_v31  ;;  %8684 = vmatprep.subr.bf16.mxu0 %v8683_v45 }
 0xafd   :  { %8654 = vmatpush3.bf16.msra.mxu1 %v8653_v57  ;;  %8686 = vmatpush3.bf16.msra.mxu0 %v8685_v59 }
 0xb19   :  { %v4925_v42 = vpop.f32.mrb[152].mxu1  ;;  %v4996_v62 = vpop.f32.mrb[92].mxu0 }
 0xb1a   :  { %v4926_v49 = vadd.f32 %v4925_v42, %v4696_v7  ;;  %v4997_v11 = vadd.f32 %v4996_v62, %v4704_v14  ;;  %v4927_v56 = vpop.f32.mrb[153].mxu1  ;;  %v4998_v58 = vpop.f32.mrb[93].mxu0 }
 0xb1b   :  { %v4928_v13 = vadd.f32 %v4927_v56, %v4700_v0  ;;  %v4999_v30 = vadd.f32 %v4998_v58, %v4708_v51 }
 0xb1c   :  { %v5005_v47 = vmax.f32 %v4926_v49, 0.0  ;;  %v5007_v8 = vmax.f32 %v4997_v11, 0.0 }
 0xb1d   :  { %v5006_v20 = vmax.f32 %v4928_v13, 0.0  ;;  %v5008_v24 = vmax.f32 %v4999_v30, 0.0 }
 0xb1f   :  { %5348 = vmatprep.mubr.f32.mxu1 %v5006_v20  ;;  %5418 = vmatprep.mubr.f32.mxu0 %v5008_v24 }
 0xb20   :  { %5349 = vmatmul.mubr.f32.vlgmr.msra.gmra.mrb[156].mxu1 %v5005_v47  ;;  %5419 = vmatmul.mubr.f32.vlgmr.msra.gmra.mrb[96].mxu0 %v5007_v8 }
 0xbb3   :  { %v6156_v55 = vpop.f32.mrb[154].mxu1  ;;  %v6191_v21 = vpop.f32.mrb[94].mxu0 }
 0xbb4   :  { %v6157_v15 = vpop.f32.mrb[155].mxu1  ;;  %v6192_v25 = vpop.f32.mrb[95].mxu0 }
 0xbb5   :  { %v6158_v32 = vadd.f32 %v6157_v15, %v6156_v55  ;;  %v6193_v48 = vadd.f32 %v6192_v25, %v6191_v21 }
 0xbb7   :  { %v5211_v3 = vadd.f32 %v6158_v32, %v5515_v27 }
 0xbb9   :  { %v5281_v1 = vadd.f32 %v6193_v48, %v5211_v3 }
 0xbf3   :  { %v6226_v17 = vpop.f32.mrb[156].mxu1  ;;  %v6261_v4 = vpop.f32.mrb[96].mxu0 }
 0xbf4   :  { %v6227_v35 = vpop.f32.mrb[157].mxu1  ;;  %v6262_v39 = vpop.f32.mrb[97].mxu0 }
 0xbf5   :  { %v6228_v19 = vadd.f32 %v6227_v35, %v6226_v17  ;;  %v6263_v37 = vadd.f32 %v6262_v39, %v6261_v4 }
 0xbf7   :  { %v5351_v16 = vadd.f32 %v6228_v19, %v5281_v1 }
 0xbf9   :  { %v5421_v22 = vadd.f32 %v6263_v37, %v5351_v16 }
 0xbfb   :  { %v5424_v36 = vmax.f32 %v5421_v22, 0.0 }
 0xbfd   :  { %v5426_v28 = vsel %vm5425_vm4, %v5424_v36, -inf }
 0xbfe   :  { %5427 = vmax.xlane.f32.xlu1 %v5426_v28 }
 0xc8b   :  { %v5428_v26 = vpop.xlane.xlu1 %5427 }
 0xc8c   :  { %v5429_v38 = vsub.f32 %v5424_v36, %v5428_v26 }
 0xc8e   :  { %v5430_v23 = vmul.f32 1.442695, %v5429_v38 }
 0xc90   :  { %8784 = vpow2.f32 %v5430_v23 }
 0xc9a   :  { %v8785_v10 = vpop.eup %8784 }
 0xc9b   :  { %v5432_v43 = vsel %vm5425_vm4, %v8785_v10, 0.0 }
 0xc9c   :  { %5433 = vadd.xlane.f32.xlu1 %v5432_v43 }
 0xd29   :  { %v5434_v34 = vpop.xlane.xlu1 %5433 }
 0xd2a   :  { %8786 = vrcp.f32 %v5434_v34 }
 0xd34   :  { %v8787_v41 = vpop.eup %8786 }
 0xd35   :  { %v5436_v53 = vmul.f32 %v8787_v41, %v8785_v10 }
 0xd37   :  { %5437 = vst.msk [vmem:[#allocation5] sm:$0x3] %vm5425_vm4, %v5436_v53 }
 0xd38   :  { %8799 = shalt.err (!%p8796_p4)
}
 0xd39   :  { %s8800_s17 = scalar_lea.hbm %s12522_s16, 32 }
 0xd3a   :  { %p8801_p5 = scmp.ne.s32.totalorder %s12522_s16, %s8800_s17  ;;  %p8804_p6 = scmp.lt.u32.totalorder %s8800_s17, %s12522_s16 }
 0xd3c   :  { %p8806_p7 = pnand %p8804_p6, %p8801_p5 }
 0xd3e   :  { %8809 = shalt.err (!%p8806_p7)
}
 0xd3f   :  { %5447 = dma.vmem_to_hbm [thread:$0]  %s5445_s20, 32, %s12522_s16, [#allocation6]  }
 0xd40   :  { %8810 = dma.done.wait [#allocation6], 32  }
 0xd41   :  { %8811 = vsyncadd [#allocation6], 4294967264 }
 0xd42   :  { %5451 = vsyncpa [#allocation6], 1 }

</bundles_post_ra>
